<compile_context>
chip_gen: v6e
topology: v6e:2x2x1
jax: 0.10.0
libtpu: 0.0.40
codegen_flags: <defaults>
</compile_context>

<pallas_src>
import functools

import jax
import jax.numpy as jnp
from jax.experimental import pallas as pl
from jax.experimental.pallas import tpu as pltpu


def _vmem_budgets():
    """Generation-aware VMEM sizing (v5e/v6e: 128 MiB, v7x: 64 MiB per TC)."""
    vmem_bytes = 64 * 1024 * 1024  # conservative default (v7x)
    try:
        info = pltpu.get_tpu_info()
        cap = getattr(info, "vmem_capacity_bytes", None)
        if cap:
            vmem_bytes = int(cap)
    except Exception:
        pass
    limit = min(vmem_bytes * 3 // 4, 100 * 1024 * 1024)        # scoped VMEM limit
    tile_budget = min(int(vmem_bytes * 0.22), 28 * 1024 * 1024)  # per-step target
    return limit, tile_budget


def _pick_row_tile(N, H, W, Cin, C1, C2, C4, d, PW, budget_bytes, min_steps=4):
    """Largest row tile TH (divisor of H, >= dilation) under the VMEM budget.

    The folded weights are NOT counted (constant index_map => VMEM-resident,
    not re-DMA'd or double-buffered per step) and scratch is counted once;
    only the pipelined x / out blocks are double-buffered.  Prefers >=
    min_steps grid steps so both TensorCores (v7x) get several steps each.
    """
    f32, f16 = 4, 2

    def footprint(th):
        x_in = 2 * th * W * Cin * f32                       # double-buffered input
        out = 2 * th * W * C4 * f32                         # double-buffered output
        y1p = (th + 2 * d) * (PW + W + 2 * d) * C1 * f16    # padded conv1 scratch (bf16)
        halo = 2 * d * W * Cin * f32                        # halo buffers
        live = th * W * (C2 + C4) * f32                     # conv2 acc / conv3 temps
        return x_in + out + y1p + halo + live

    divisors = [t for t in range(1, H + 1) if H % t == 0 and t >= d]
    if not divisors:
        raise ValueError(f"H={H} has no row tile >= dilation={d}")
    fitting = [t for t in divisors if footprint(t) <= budget_bytes]
    if not fitting:
        raise ValueError(
            f"smallest row tile ({min(divisors)} rows) needs "
            f"{footprint(min(divisors))} B of VMEM; budget is {budget_bytes} B")
    multi = [t for t in fitting if N * (H // t) >= min_steps]
    return max(multi) if multi else max(fitting)


def _bottleneck_kernel(x_ref, x_hbm_ref, w1_ref, b1_ref, w2_ref, b2_ref,
                       w3_ref, b3_ref, o_ref,
                       y1p_ref, xtop_ref, xbot_ref, sem,
                       *, TH, H, W, d, PW, DZ):
    n = pl.program_id(0)
    r = pl.program_id(1)
    R = pl.num_programs(1)
    Cin = x_ref.shape[3]
    C1 = w1_ref.shape[1]
    C4 = w3_ref.shape[1]
    mdt = w1_ref.dtype  # matmul operand dtype (bf16); accumulation stays f32

    # 1) Kick off the halo DMAs (d rows of x directly above / below this row
    #    tile).  Starts are clamped into the image; border tiles fetch
    #    harmless in-bounds rows whose conv1 result is overwritten with zero
    #    padding below, so no conditional DMAs are needed.
    top_src = jnp.maximum(r * TH - d, 0)
    bot_src = jnp.minimum((r + 1) * TH, H - d)
    top_cp = pltpu.make_async_copy(x_hbm_ref.at[n, pl.ds(top_src, d)],
                                   xtop_ref, sem.at[0])
    bot_cp = pltpu.make_async_copy(x_hbm_ref.at[n, pl.ds(bot_src, d)],
                                   xbot_ref, sem.at[1])
    top_cp.start()
    bot_cp.start()
    # TODO(synk): cross-step double-buffering of these tiny DMAs would hide
    # their fixed latency, but "prefetch next grid step" into per-core scratch
    # is unsafe under megacore-parallel grid axes, so they are overlapped with
    # this step's interior conv1 instead.

    # 2) Zero ONLY the left/right pad columns that conv2's taps read (interior
    #    and halo rows are fully overwritten below; border rows are zeroed
    #    under pl.when).  DZ rounds the pad width up to an even sublane count
    #    so the bf16 stores stay packed-pair aligned.
    zcol = jnp.zeros((TH + 2 * d, DZ, C1), y1p_ref.dtype)
    y1p_ref[:, PW - DZ:PW, :] = zcol
    y1p_ref[:, PW + W:PW + W + DZ, :] = zcol

    # Hoisted weight / bias loads (conv1 is applied three times per step).
    w1v = w1_ref[...]
    b1v = b1_ref[...]

    def conv1(xin):  # fused 1x1 conv (bn1 scale folded into w1) + bias + relu
        rows = xin.shape[0]
        y = jnp.dot(xin.reshape(rows * W, Cin).astype(mdt), w1v,
                    preferred_element_type=jnp.float32)
        y = jnp.maximum(y + b1v, 0.0)
        return y.reshape(rows, W, C1).astype(y1p_ref.dtype)

    # 3) conv1 + bn1 + relu: interior rows first (overlaps the halo DMAs),
    #    then the halo rows; everything lands at a sublane-aligned column
    #    offset (PW) of the padded scratch.
    xc = x_ref[0]                                          # (TH, W, Cin) f32
    y1p_ref[d:TH + d, PW:PW + W, :] = conv1(xc)
    top_cp.wait()
    y1p_ref[0:d, PW:PW + W, :] = conv1(xtop_ref[...])
    bot_cp.wait()
    y1p_ref[TH + d:TH + 2 * d, PW:PW + W, :] = conv1(xbot_ref[...])

    # 4) At the image borders the halo rows are zero padding (ordered AFTER
    #    the halo conv1 stores above).
    zrow = jnp.zeros((d, W, C1), y1p_ref.dtype)

    @pl.when(r == 0)
    def _():
        y1p_ref[0:d, PW:PW + W, :] = zrow

    @pl.when(r == R - 1)
    def _():
        y1p_ref[TH + d:TH + 2 * d, PW:PW + W, :] = zrow

    # 5) conv2 (3x3, stride 1, padding=dilation) + bn2 + relu: nine K=C1
    #    matmuls accumulated in f32 straight from the padded scratch taps
    #    (no im2col slab -> no extra VMEM slab write + re-read per step).
    acc = None
    for kh in range(3):
        for kw in range(3):
            tap = y1p_ref[kh * d:kh * d + TH,
                          PW - d + kw * d:PW - d + kw * d + W, :]
            part = jnp.dot(tap.reshape(TH * W, C1), w2_ref[kh * 3 + kw],
                           preferred_element_type=jnp.float32)
            acc = part if acc is None else acc + part
    y2 = jnp.maximum(acc + b2_ref[...], 0.0)
    # TODO(synk): for very large TH*W the y2/y3 live range may spill; if so,
    # split conv2/conv3 over row sub-blocks with lax.fori_loop(unroll=True).

    # 6) conv3 (1x1) + bn3 + identity residual + relu (element-wise in f32).
    y3 = jnp.dot(y2.astype(mdt), w3_ref[...], preferred_element_type=jnp.float32)
    y3 = y3 + b3_ref[...] + xc.reshape(TH * W, C4).astype(jnp.float32)
    o_ref[...] = jnp.maximum(y3, 0.0).reshape(1, TH, W, C4).astype(o_ref.dtype)
    # TODO(synk): for C4 < 128 a lane-dense (N,H,W*C4) out_spec would avoid
    # masked vst.msk stores; skipped here to avoid the in-kernel relayout.


def bottleneck_forward(x_nhwc, w1, s1, b1, w2, s2, b2, w3, s3, b3,
                       *, stride=1, dilation=1, mxu_dtype=jnp.bfloat16):
    """Fused Bottleneck forward (inference BN), identity-residual path.

    x_nhwc: (N, H, W, Cin);  w1: (Cin, C1);  w2: (3, 3, C1, C2) HWIO;
    w3: (C2, C4);  s*/b*: folded BatchNorm scale/bias per channel.
    """
    N, H, W, Cin = x_nhwc.shape
    C1 = w1.shape[1]
    C2 = w2.shape[3]
    C4 = w3.shape[1]
    d = int(dilation)

    # Identity residual (PyTorch downsample=None) preconditions.
    # TODO(synk): downsample / projection shortcut (stride > 1 or channel
    # change) not implemented; only the identity-residual configuration.
    if stride != 1:
        raise NotImplementedError("identity residual requires stride == 1")
    if Cin != C4:
        raise NotImplementedError("identity residual requires inplanes == 4*planes")

    # Fold the (inference-mode) BN scale into the conv weights; matmul
    # operands are bf16, biases stay f32 (accumulation is f32 on the MXU).
    w1f = (w1 * s1[None, :]).astype(mxu_dtype)                          # (Cin, C1)
    w2f = (w2 * s2[None, None, None, :]).reshape(9, C1, C2).astype(mxu_dtype)
    w3f = (w3 * s3[None, :]).astype(mxu_dtype)                          # (C2, C4)
    b1r = b1.reshape(1, C1).astype(jnp.float32)
    b2r = b2.reshape(1, C2).astype(jnp.float32)
    b3r = b3.reshape(1, C4).astype(jnp.float32)

    PW = ((d + 7) // 8) * 8      # sublane-aligned left pad of the conv1 scratch
    DZ = ((d + 1) // 2) * 2      # zero-pad column width rounded to packed pairs

    vmem_limit, tile_budget = _vmem_budgets()
    TH = _pick_row_tile(N, H, W, Cin, C1, C2, C4, d, PW, tile_budget)
    R = H // TH

    grid_spec = pltpu.PrefetchScalarGridSpec(
        num_scalar_prefetch=0,
        grid=(N, R),
        in_specs=[
            # row tile of x (auto-pipelined): conv1 input + residual
            pl.BlockSpec((1, TH, W, Cin), lambda n, r: (n, r, 0, 0)),
            # whole x left in HBM: source for the small halo-row DMAs
            pl.BlockSpec(memory_space=pl.ANY),
            # folded weights / biases (constant index_map => VMEM-resident)
            pl.BlockSpec((Cin, C1), lambda n, r: (0, 0)),
            pl.BlockSpec((1, C1), lambda n, r: (0, 0)),
            pl.BlockSpec((9, C1, C2), lambda n, r: (0, 0, 0)),
            pl.BlockSpec((1, C2), lambda n, r: (0, 0)),
            pl.BlockSpec((C2, C4), lambda n, r: (0, 0)),
            pl.BlockSpec((1, C4), lambda n, r: (0, 0)),
        ],
        out_specs=pl.BlockSpec((1, TH, W, C4), lambda n, r: (n, r, 0, 0)),
        scratch_shapes=[
            pltpu.VMEM((TH + 2 * d, PW + W + DZ, C1), mxu_dtype),  # padded conv1 out
            pltpu.VMEM((d, W, Cin), x_nhwc.dtype),                 # top halo rows
            pltpu.VMEM((d, W, Cin), x_nhwc.dtype),                 # bottom halo rows
            pltpu.SemaphoreType.DMA((2,)),
        ],
    )

    kernel = functools.partial(_bottleneck_kernel, TH=TH, H=H, W=W, d=d,
                               PW=PW, DZ=DZ)
    return pl.pallas_call(
        kernel,
        out_shape=jax.ShapeDtypeStruct((N, H, W, C4), x_nhwc.dtype),
        grid_spec=grid_spec,
        compiler_params=pltpu.CompilerParams(
            dimension_semantics=("parallel", "parallel"),
            vmem_limit_bytes=vmem_limit,
        ),
    )(x_nhwc, x_nhwc, w1f, b1r, w2f, b2r, w3f, b3r)


# ----------------------------------------------------------------------------
# pure-JAX reference (for correctness verification)
# ----------------------------------------------------------------------------
def _ref_forward(x, w1, s1, b1, w2, s2, b2, w3, s3, b3, *, stride, dilation):
    def conv(x, w, stride=1, dilation=1, pad=0):
        return jax.lax.conv_general_dilated(
            x, w, (stride, stride), [(pad, pad), (pad, pad)],
            rhs_dilation=(dilation, dilation),
            dimension_numbers=("NHWC", "HWIO", "NHWC"))

    cin, c1 = w1.shape
    c3 = w3.shape[1]
    out = conv(x, w1.reshape(1, 1, cin, c1))
    out = jnp.maximum(out * s1 + b1, 0.0)
    out = conv(out, w2, stride=stride, dilation=dilation, pad=dilation)
    out = jnp.maximum(out * s2 + b2, 0.0)
    out = conv(out, w3.reshape(1, 1, c1, c3))
    out = out * s3 + b3 + x
    return jnp.maximum(out, 0.0)


if __name__ == "__main__":
    key = jax.random.PRNGKey(0)
    keys = jax.random.split(key, 8)

    # Small shapes consistent with the module: Bottleneck(inplanes=16, planes=4)
    # identity residual => inplanes == planes * 4.
    N, H, W = 2, 16, 16
    inplanes, planes = 16, 4

    x_nchw = jax.random.normal(keys[0], (N, inplanes, H, W), jnp.float32)
    x = jnp.transpose(x_nchw, (0, 2, 3, 1))  # NHWC

    # deterministic parameter init (no checkpoint load)
    w1 = jax.random.normal(keys[1], (inplanes, planes), jnp.float32) * 0.1
    w2 = jax.random.normal(keys[2], (3, 3, planes, planes), jnp.float32) * 0.1
    w3 = jax.random.normal(keys[3], (planes, planes * 4), jnp.float32) * 0.1

    def bn_params(k, c):
        ka, kb, kc, kd = jax.random.split(k, 4)
        gamma = 1.0 + 0.1 * jax.random.normal(ka, (c,), jnp.float32)
        beta = 0.1 * jax.random.normal(kb, (c,), jnp.float32)
        mean = 0.1 * jax.random.normal(kc, (c,), jnp.float32)
        var = jnp.abs(jax.random.normal(kd, (c,), jnp.float32)) + 1.0
        eps = 1e-5
        scale = gamma / jnp.sqrt(var + eps)
        bias = beta - mean * scale
        return scale, bias

    s1, b1 = bn_params(keys[4], planes)
    s2, b2 = bn_params(keys[5], planes)
    s3, b3 = bn_params(keys[6], planes * 4)

    # check both dilation settings (exercises the halo DMAs and padding path);
    # tolerance reflects bf16 matmul operands with f32 accumulation.
    for dilation in (1, 2):
        out = bottleneck_forward(x, w1, s1, b1, w2, s2, b2, w3, s3, b3,
                                 stride=1, dilation=dilation)
        out = jax.block_until_ready(out)
        ref = _ref_forward(x, w1, s1, b1, w2, s2, b2, w3, s3, b3,
                           stride=1, dilation=dilation)
        assert out.shape == (N, H, W, planes * 4)
        assert jnp.allclose(out, ref, atol=2e-2, rtol=2e-2), (
            f"mismatch vs reference (dilation={dilation})")

    print("KERNEL_OK")
</pallas_src>

<mosaic_0001>
module attributes {stable_mosaic.version = 11 : i64} {
  func.func @_bottleneck_kernel(%arg0: i32, %arg1: i32, %arg2: memref<1x8x16x16xf32, #tpu.memory_space<vmem>>, %arg3: memref<2x16x16x16xf32, #tpu.memory_space<any>>, %arg4: memref<16x4xbf16, #tpu.memory_space<vmem>>, %arg5: memref<1x4xf32, #tpu.memory_space<vmem>>, %arg6: memref<9x4x4xbf16, #tpu.memory_space<vmem>>, %arg7: memref<1x4xf32, #tpu.memory_space<vmem>>, %arg8: memref<4x16xbf16, #tpu.memory_space<vmem>>, %arg9: memref<1x16xf32, #tpu.memory_space<vmem>>, %arg10: memref<1x8x16x16xf32, #tpu.memory_space<vmem>>, %arg11: memref<10x26x4xbf16, #tpu.memory_space<vmem>>, %arg12: memref<1x16x16xf32, #tpu.memory_space<vmem>>, %arg13: memref<1x16x16xf32, #tpu.memory_space<vmem>>, %arg14: memref<2x!tpu.dma_semaphore, #tpu.memory_space<semaphore_mem>>) attributes {dimension_semantics = [#tpu.dimension_semantics<parallel>, #tpu.dimension_semantics<parallel>], iteration_bounds = array<i64: 2, 2>, scalar_prefetch = 0 : i64, scratch_operands = 4 : i64, tpu.core_type = #tpu.core_type<tc>, window_params = [{transform_indices = @transform_0, window_bounds = array<i64: 1, 8, 16, 16>}, {}, {pipeline_mode = #tpu.pipeline_mode<synchronous>, transform_indices = @transform_2, window_bounds = array<i64: 16, 4>}, {pipeline_mode = #tpu.pipeline_mode<synchronous>, transform_indices = @transform_3, window_bounds = array<i64: 1, 4>}, {pipeline_mode = #tpu.pipeline_mode<synchronous>, transform_indices = @transform_4, window_bounds = array<i64: 9, 4, 4>}, {pipeline_mode = #tpu.pipeline_mode<synchronous>, transform_indices = @transform_5, window_bounds = array<i64: 1, 4>}, {pipeline_mode = #tpu.pipeline_mode<synchronous>, transform_indices = @transform_6, window_bounds = array<i64: 4, 16>}, {pipeline_mode = #tpu.pipeline_mode<synchronous>, transform_indices = @transform_7, window_bounds = array<i64: 1, 16>}, {transform_indices = @transform_8, window_bounds = array<i64: 1, 8, 16, 16>}]} {
    %c8_i32 = arith.constant 8 : i32
    %0 = arith.muli %arg1, %c8_i32 : i32
    %c1_i32 = arith.constant 1 : i32
    %1 = arith.subi %0, %c1_i32 : i32
    %c0_i32 = arith.constant 0 : i32
    %2 = arith.maxsi %1, %c0_i32 : i32
    %c1_i32_0 = arith.constant 1 : i32
    %3 = arith.addi %arg1, %c1_i32_0 : i32
    %c8_i32_1 = arith.constant 8 : i32
    %4 = arith.muli %3, %c8_i32_1 : i32
    %c15_i32 = arith.constant 15 : i32
    %5 = arith.minsi %4, %c15_i32 : i32
    %c0_i32_2 = arith.constant 0 : i32
    %c0_i32_3 = arith.constant 0 : i32
    %c0_i32_4 = arith.constant 0 : i32
    %6 = tpu.memref_slice %arg3[%arg0, %2, %c0_i32_3, %c0_i32_4] : memref<2x16x16x16xf32, #tpu.memory_space<any>> -> memref<1x1x16x16xf32, #tpu.memory_space<any>>
    %7 = tpu.memref_squeeze %6 : memref<1x1x16x16xf32, #tpu.memory_space<any>> -> memref<1x16x16xf32, #tpu.memory_space<any>>
    %8 = tpu.memref_slice %arg14[%c0_i32_2] : memref<2x!tpu.dma_semaphore, #tpu.memory_space<semaphore_mem>> -> memref<1x!tpu.dma_semaphore, #tpu.memory_space<semaphore_mem>>
    %9 = tpu.memref_squeeze %8 : memref<1x!tpu.dma_semaphore, #tpu.memory_space<semaphore_mem>> -> memref<!tpu.dma_semaphore, #tpu.memory_space<semaphore_mem>>
    tpu.enqueue_dma source(%7 : memref<1x16x16xf32, #tpu.memory_space<any>>) target(%arg12 : memref<1x16x16xf32, #tpu.memory_space<vmem>>) target_semaphore(%9 : memref<!tpu.dma_semaphore, #tpu.memory_space<semaphore_mem>>)
    %c1_i32_5 = arith.constant 1 : i32
    %c0_i32_6 = arith.constant 0 : i32
    %c0_i32_7 = arith.constant 0 : i32
    %10 = tpu.memref_slice %arg3[%arg0, %5, %c0_i32_6, %c0_i32_7] : memref<2x16x16x16xf32, #tpu.memory_space<any>> -> memref<1x1x16x16xf32, #tpu.memory_space<any>>
    %11 = tpu.memref_squeeze %10 : memref<1x1x16x16xf32, #tpu.memory_space<any>> -> memref<1x16x16xf32, #tpu.memory_space<any>>
    %12 = tpu.memref_slice %arg14[%c1_i32_5] : memref<2x!tpu.dma_semaphore, #tpu.memory_space<semaphore_mem>> -> memref<1x!tpu.dma_semaphore, #tpu.memory_space<semaphore_mem>>
    %13 = tpu.memref_squeeze %12 : memref<1x!tpu.dma_semaphore, #tpu.memory_space<semaphore_mem>> -> memref<!tpu.dma_semaphore, #tpu.memory_space<semaphore_mem>>
    tpu.enqueue_dma source(%11 : memref<1x16x16xf32, #tpu.memory_space<any>>) target(%arg13 : memref<1x16x16xf32, #tpu.memory_space<vmem>>) target_semaphore(%13 : memref<!tpu.dma_semaphore, #tpu.memory_space<semaphore_mem>>)
    %cst = arith.constant 0.000000e+00 : bf16
    %14 = vector.broadcast %cst : bf16 to vector<10x2x4xbf16>
    %c0 = arith.constant 0 : index
    %c6 = arith.constant 6 : index
    %c0_8 = arith.constant 0 : index
    %15 = vector.load %arg11[%c0, %c6, %c0_8] : memref<10x26x4xbf16, #tpu.memory_space<vmem>>, vector<10x2x4xbf16>
    tpu.vector_store %arg11[%c0, %c6, %c0_8], %14 {strides = array<i32>} : memref<10x26x4xbf16, #tpu.memory_space<vmem>>, vector<10x2x4xbf16>,
    %c0_9 = arith.constant 0 : index
    %c24 = arith.constant 24 : index
    %c0_10 = arith.constant 0 : index
    %16 = vector.load %arg11[%c0_9, %c24, %c0_10] : memref<10x26x4xbf16, #tpu.memory_space<vmem>>, vector<10x2x4xbf16>
    tpu.vector_store %arg11[%c0_9, %c24, %c0_10], %14 {strides = array<i32>} : memref<10x26x4xbf16, #tpu.memory_space<vmem>>, vector<10x2x4xbf16>,
    %c0_11 = arith.constant 0 : index
    %c0_12 = arith.constant 0 : index
    %17 = vector.load %arg4[%c0_11, %c0_12] : memref<16x4xbf16, #tpu.memory_space<vmem>>, vector<16x4xbf16>
    %c0_13 = arith.constant 0 : index
    %c0_14 = arith.constant 0 : index
    %18 = vector.load %arg5[%c0_13, %c0_14] : memref<1x4xf32, #tpu.memory_space<vmem>>, vector<1x4xf32>
    %c0_15 = arith.constant 0 : index
    %c0_16 = arith.constant 0 : index
    %c0_17 = arith.constant 0 : index
    %c0_18 = arith.constant 0 : index
    %19 = vector.load %arg2[%c0_15, %c0_16, %c0_17, %c0_18] : memref<1x8x16x16xf32, #tpu.memory_space<vmem>>, vector<1x8x16x16xf32>
    %20 = vector.shape_cast %19 : vector<1x8x16x16xf32> to vector<8x16x16xf32>
    %21 = vector.shape_cast %20 : vector<8x16x16xf32> to vector<128x16xf32>
    %22 = arith.truncf %21 : vector<128x16xf32> to vector<128x16xbf16>
    %cst_19 = arith.constant dense<0.000000e+00> : vector<128x4xf32>
    %23 = tpu.matmul %22, %17, %cst_19 {dimension_numbers = #tpu.dot_dimension_numbers<[1], [0], [0], [1], [0, 0, 1, 1], [], []>} : vector<128x16xbf16>, vector<16x4xbf16>, vector<128x4xf32> -> vector<128x4xf32>
    %24 = vector.broadcast %18 : vector<1x4xf32> to vector<128x4xf32>
    %25 = arith.addf %23, %24 : vector<128x4xf32>
    %cst_20 = arith.constant 0.000000e+00 : f32
    %26 = vector.broadcast %cst_20 : f32 to vector<128x4xf32>
    %27 = arith.maximumf %25, %26 : vector<128x4xf32>
    %28 = vector.shape_cast %27 : vector<128x4xf32> to vector<8x16x4xf32>
    %29 = arith.truncf %28 : vector<8x16x4xf32> to vector<8x16x4xbf16>
    %c1 = arith.constant 1 : index
    %c8 = arith.constant 8 : index
    %c0_21 = arith.constant 0 : index
    %30 = vector.load %arg11[%c1, %c8, %c0_21] : memref<10x26x4xbf16, #tpu.memory_space<vmem>>, vector<8x16x4xbf16>
    tpu.vector_store %arg11[%c1, %c8, %c0_21], %29 {strides = array<i32>} : memref<10x26x4xbf16, #tpu.memory_space<vmem>>, vector<8x16x4xbf16>,
    %c0_i32_22 = arith.constant 0 : i32
    %c0_i32_23 = arith.constant 0 : i32
    %c0_i32_24 = arith.constant 0 : i32
    %31 = tpu.memref_slice %arg3[%arg0, %2, %c0_i32_23, %c0_i32_24] : memref<2x16x16x16xf32, #tpu.memory_space<any>> -> memref<1x1x16x16xf32, #tpu.memory_space<any>>
    %32 = tpu.memref_squeeze %31 : memref<1x1x16x16xf32, #tpu.memory_space<any>> -> memref<1x16x16xf32, #tpu.memory_space<any>>
    %33 = tpu.memref_slice %arg14[%c0_i32_22] : memref<2x!tpu.dma_semaphore, #tpu.memory_space<semaphore_mem>> -> memref<1x!tpu.dma_semaphore, #tpu.memory_space<semaphore_mem>>
    %34 = tpu.memref_squeeze %33 : memref<1x!tpu.dma_semaphore, #tpu.memory_space<semaphore_mem>> -> memref<!tpu.dma_semaphore, #tpu.memory_space<semaphore_mem>>
    tpu.wait_dma2 semaphore(%34 : memref<!tpu.dma_semaphore, #tpu.memory_space<semaphore_mem>>) src(%32 : memref<1x16x16xf32, #tpu.memory_space<any>>) dst(%arg12 : memref<1x16x16xf32, #tpu.memory_space<vmem>>)
    %c0_25 = arith.constant 0 : index
    %c0_26 = arith.constant 0 : index
    %c0_27 = arith.constant 0 : index
    %35 = vector.load %arg12[%c0_25, %c0_26, %c0_27] : memref<1x16x16xf32, #tpu.memory_space<vmem>>, vector<1x16x16xf32>
    %36 = vector.shape_cast %35 : vector<1x16x16xf32> to vector<16x16xf32>
    %37 = arith.truncf %36 : vector<16x16xf32> to vector<16x16xbf16>
    %cst_28 = arith.constant dense<0.000000e+00> : vector<16x4xf32>
    %38 = tpu.matmul %37, %17, %cst_28 {dimension_numbers = #tpu.dot_dimension_numbers<[1], [0], [0], [1], [0, 0, 1, 1], [], []>} : vector<16x16xbf16>, vector<16x4xbf16>, vector<16x4xf32> -> vector<16x4xf32>
    %39 = vector.broadcast %18 : vector<1x4xf32> to vector<16x4xf32>
    %40 = arith.addf %38, %39 : vector<16x4xf32>
    %cst_29 = arith.constant 0.000000e+00 : f32
    %41 = vector.broadcast %cst_29 : f32 to vector<16x4xf32>
    %42 = arith.maximumf %40, %41 : vector<16x4xf32>
    %43 = vector.shape_cast %42 : vector<16x4xf32> to vector<1x16x4xf32>
    %44 = arith.truncf %43 : vector<1x16x4xf32> to vector<1x16x4xbf16>
    %c0_30 = arith.constant 0 : index
    %c8_31 = arith.constant 8 : index
    %c0_32 = arith.constant 0 : index
    %45 = vector.load %arg11[%c0_30, %c8_31, %c0_32] : memref<10x26x4xbf16, #tpu.memory_space<vmem>>, vector<1x16x4xbf16>
    tpu.vector_store %arg11[%c0_30, %c8_31, %c0_32], %44 {strides = array<i32>} : memref<10x26x4xbf16, #tpu.memory_space<vmem>>, vector<1x16x4xbf16>,
    %c1_i32_33 = arith.constant 1 : i32
    %c0_i32_34 = arith.constant 0 : i32
    %c0_i32_35 = arith.constant 0 : i32
    %46 = tpu.memref_slice %arg3[%arg0, %5, %c0_i32_34, %c0_i32_35] : memref<2x16x16x16xf32, #tpu.memory_space<any>> -> memref<1x1x16x16xf32, #tpu.memory_space<any>>
    %47 = tpu.memref_squeeze %46 : memref<1x1x16x16xf32, #tpu.memory_space<any>> -> memref<1x16x16xf32, #tpu.memory_space<any>>
    %48 = tpu.memref_slice %arg14[%c1_i32_33] : memref<2x!tpu.dma_semaphore, #tpu.memory_space<semaphore_mem>> -> memref<1x!tpu.dma_semaphore, #tpu.memory_space<semaphore_mem>>
    %49 = tpu.memref_squeeze %48 : memref<1x!tpu.dma_semaphore, #tpu.memory_space<semaphore_mem>> -> memref<!tpu.dma_semaphore, #tpu.memory_space<semaphore_mem>>
    tpu.wait_dma2 semaphore(%49 : memref<!tpu.dma_semaphore, #tpu.memory_space<semaphore_mem>>) src(%47 : memref<1x16x16xf32, #tpu.memory_space<any>>) dst(%arg13 : memref<1x16x16xf32, #tpu.memory_space<vmem>>)
    %c0_36 = arith.constant 0 : index
    %c0_37 = arith.constant 0 : index
    %c0_38 = arith.constant 0 : index
    %50 = vector.load %arg13[%c0_36, %c0_37, %c0_38] : memref<1x16x16xf32, #tpu.memory_space<vmem>>, vector<1x16x16xf32>
    %51 = vector.shape_cast %50 : vector<1x16x16xf32> to vector<16x16xf32>
    %52 = arith.truncf %51 : vector<16x16xf32> to vector<16x16xbf16>
    %cst_39 = arith.constant dense<0.000000e+00> : vector<16x4xf32>
    %53 = tpu.matmul %52, %17, %cst_39 {dimension_numbers = #tpu.dot_dimension_numbers<[1], [0], [0], [1], [0, 0, 1, 1], [], []>} : vector<16x16xbf16>, vector<16x4xbf16>, vector<16x4xf32> -> vector<16x4xf32>
    %54 = vector.broadcast %18 : vector<1x4xf32> to vector<16x4xf32>
    %55 = arith.addf %53, %54 : vector<16x4xf32>
    %cst_40 = arith.constant 0.000000e+00 : f32
    %56 = vector.broadcast %cst_40 : f32 to vector<16x4xf32>
    %57 = arith.maximumf %55, %56 : vector<16x4xf32>
    %58 = vector.shape_cast %57 : vector<16x4xf32> to vector<1x16x4xf32>
    %59 = arith.truncf %58 : vector<1x16x4xf32> to vector<1x16x4xbf16>
    %c9 = arith.constant 9 : index
    %c8_41 = arith.constant 8 : index
    %c0_42 = arith.constant 0 : index
    %60 = vector.load %arg11[%c9, %c8_41, %c0_42] : memref<10x26x4xbf16, #tpu.memory_space<vmem>>, vector<1x16x4xbf16>
    tpu.vector_store %arg11[%c9, %c8_41, %c0_42], %59 {strides = array<i32>} : memref<10x26x4xbf16, #tpu.memory_space<vmem>>, vector<1x16x4xbf16>,
    %cst_43 = arith.constant 0.000000e+00 : bf16
    %61 = vector.broadcast %cst_43 : bf16 to vector<1x16x4xbf16>
    %c0_i32_44 = arith.constant 0 : i32
    %62 = arith.cmpi eq, %arg1, %c0_i32_44 : i32
    %63 = arith.extui %62 : i1 to i32
    %c0_i32_45 = arith.constant 0 : i32
    %64 = arith.cmpi ne, %63, %c0_i32_45 : i32
    scf.if %64 {
      %c0_119 = arith.constant 0 : index
      %c8_120 = arith.constant 8 : index
      %c0_121 = arith.constant 0 : index
      %138 = vector.load %arg11[%c0_119, %c8_120, %c0_121] : memref<10x26x4xbf16, #tpu.memory_space<vmem>>, vector<1x16x4xbf16>
      tpu.vector_store %arg11[%c0_119, %c8_120, %c0_121], %61 {strides = array<i32>} : memref<10x26x4xbf16, #tpu.memory_space<vmem>>, vector<1x16x4xbf16>,
    } else {
    }
    %c1_i32_46 = arith.constant 1 : i32
    %65 = arith.cmpi eq, %arg1, %c1_i32_46 : i32
    %66 = arith.extui %65 : i1 to i32
    %c0_i32_47 = arith.constant 0 : i32
    %67 = arith.cmpi ne, %66, %c0_i32_47 : i32
    scf.if %67 {
      %c9_119 = arith.constant 9 : index
      %c8_120 = arith.constant 8 : index
      %c0_121 = arith.constant 0 : index
      %138 = vector.load %arg11[%c9_119, %c8_120, %c0_121] : memref<10x26x4xbf16, #tpu.memory_space<vmem>>, vector<1x16x4xbf16>
      tpu.vector_store %arg11[%c9_119, %c8_120, %c0_121], %61 {strides = array<i32>} : memref<10x26x4xbf16, #tpu.memory_space<vmem>>, vector<1x16x4xbf16>,
    } else {
    }
    %c0_48 = arith.constant 0 : index
    %c7 = arith.constant 7 : index
    %c0_49 = arith.constant 0 : index
    %68 = vector.load %arg11[%c0_48, %c7, %c0_49] : memref<10x26x4xbf16, #tpu.memory_space<vmem>>, vector<8x16x4xbf16>
    %69 = vector.shape_cast %68 : vector<8x16x4xbf16> to vector<128x4xbf16>
    %c0_50 = arith.constant 0 : index
    %c0_51 = arith.constant 0 : index
    %c0_52 = arith.constant 0 : index
    %70 = vector.load %arg6[%c0_50, %c0_51, %c0_52] : memref<9x4x4xbf16, #tpu.memory_space<vmem>>, vector<1x4x4xbf16>
    %71 = vector.shape_cast %70 : vector<1x4x4xbf16> to vector<4x4xbf16>
    %cst_53 = arith.constant dense<0.000000e+00> : vector<128x4xf32>
    %72 = tpu.matmul %69, %71, %cst_53 {dimension_numbers = #tpu.dot_dimension_numbers<[1], [0], [0], [1], [0, 0, 1, 1], [], []>} : vector<128x4xbf16>, vector<4x4xbf16>, vector<128x4xf32> -> vector<128x4xf32>
    %c0_54 = arith.constant 0 : index
    %c8_55 = arith.constant 8 : index
    %c0_56 = arith.constant 0 : index
    %73 = vector.load %arg11[%c0_54, %c8_55, %c0_56] : memref<10x26x4xbf16, #tpu.memory_space<vmem>>, vector<8x16x4xbf16>
    %74 = vector.shape_cast %73 : vector<8x16x4xbf16> to vector<128x4xbf16>
    %c1_57 = arith.constant 1 : index
    %c0_58 = arith.constant 0 : index
    %c0_59 = arith.constant 0 : index
    %75 = vector.load %arg6[%c1_57, %c0_58, %c0_59] : memref<9x4x4xbf16, #tpu.memory_space<vmem>>, vector<1x4x4xbf16>
    %76 = vector.shape_cast %75 : vector<1x4x4xbf16> to vector<4x4xbf16>
    %cst_60 = arith.constant dense<0.000000e+00> : vector<128x4xf32>
    %77 = tpu.matmul %74, %76, %cst_60 {dimension_numbers = #tpu.dot_dimension_numbers<[1], [0], [0], [1], [0, 0, 1, 1], [], []>} : vector<128x4xbf16>, vector<4x4xbf16>, vector<128x4xf32> -> vector<128x4xf32>
    %78 = arith.addf %72, %77 : vector<128x4xf32>
    %c0_61 = arith.constant 0 : index
    %c9_62 = arith.constant 9 : index
    %c0_63 = arith.constant 0 : index
    %79 = vector.load %arg11[%c0_61, %c9_62, %c0_63] : memref<10x26x4xbf16, #tpu.memory_space<vmem>>, vector<8x16x4xbf16>
    %80 = vector.shape_cast %79 : vector<8x16x4xbf16> to vector<128x4xbf16>
    %c2 = arith.constant 2 : index
    %c0_64 = arith.constant 0 : index
    %c0_65 = arith.constant 0 : index
    %81 = vector.load %arg6[%c2, %c0_64, %c0_65] : memref<9x4x4xbf16, #tpu.memory_space<vmem>>, vector<1x4x4xbf16>
    %82 = vector.shape_cast %81 : vector<1x4x4xbf16> to vector<4x4xbf16>
    %cst_66 = arith.constant dense<0.000000e+00> : vector<128x4xf32>
    %83 = tpu.matmul %80, %82, %cst_66 {dimension_numbers = #tpu.dot_dimension_numbers<[1], [0], [0], [1], [0, 0, 1, 1], [], []>} : vector<128x4xbf16>, vector<4x4xbf16>, vector<128x4xf32> -> vector<128x4xf32>
    %84 = arith.addf %78, %83 : vector<128x4xf32>
    %c1_67 = arith.constant 1 : index
    %c7_68 = arith.constant 7 : index
    %c0_69 = arith.constant 0 : index
    %85 = vector.load %arg11[%c1_67, %c7_68, %c0_69] : memref<10x26x4xbf16, #tpu.memory_space<vmem>>, vector<8x16x4xbf16>
    %86 = vector.shape_cast %85 : vector<8x16x4xbf16> to vector<128x4xbf16>
    %c3 = arith.constant 3 : index
    %c0_70 = arith.constant 0 : index
    %c0_71 = arith.constant 0 : index
    %87 = vector.load %arg6[%c3, %c0_70, %c0_71] : memref<9x4x4xbf16, #tpu.memory_space<vmem>>, vector<1x4x4xbf16>
    %88 = vector.shape_cast %87 : vector<1x4x4xbf16> to vector<4x4xbf16>
    %cst_72 = arith.constant dense<0.000000e+00> : vector<128x4xf32>
    %89 = tpu.matmul %86, %88, %cst_72 {dimension_numbers = #tpu.dot_dimension_numbers<[1], [0], [0], [1], [0, 0, 1, 1], [], []>} : vector<128x4xbf16>, vector<4x4xbf16>, vector<128x4xf32> -> vector<128x4xf32>
    %90 = arith.addf %84, %89 : vector<128x4xf32>
    %c1_73 = arith.constant 1 : index
    %c8_74 = arith.constant 8 : index
    %c0_75 = arith.constant 0 : index
    %91 = vector.load %arg11[%c1_73, %c8_74, %c0_75] : memref<10x26x4xbf16, #tpu.memory_space<vmem>>, vector<8x16x4xbf16>
    %92 = vector.shape_cast %91 : vector<8x16x4xbf16> to vector<128x4xbf16>
    %c4 = arith.constant 4 : index
    %c0_76 = arith.constant 0 : index
    %c0_77 = arith.constant 0 : index
    %93 = vector.load %arg6[%c4, %c0_76, %c0_77] : memref<9x4x4xbf16, #tpu.memory_space<vmem>>, vector<1x4x4xbf16>
    %94 = vector.shape_cast %93 : vector<1x4x4xbf16> to vector<4x4xbf16>
    %cst_78 = arith.constant dense<0.000000e+00> : vector<128x4xf32>
    %95 = tpu.matmul %92, %94, %cst_78 {dimension_numbers = #tpu.dot_dimension_numbers<[1], [0], [0], [1], [0, 0, 1, 1], [], []>} : vector<128x4xbf16>, vector<4x4xbf16>, vector<128x4xf32> -> vector<128x4xf32>
    %96 = arith.addf %90, %95 : vector<128x4xf32>
    %c1_79 = arith.constant 1 : index
    %c9_80 = arith.constant 9 : index
    %c0_81 = arith.constant 0 : index
    %97 = vector.load %arg11[%c1_79, %c9_80, %c0_81] : memref<10x26x4xbf16, #tpu.memory_space<vmem>>, vector<8x16x4xbf16>
    %98 = vector.shape_cast %97 : vector<8x16x4xbf16> to vector<128x4xbf16>
    %c5 = arith.constant 5 : index
    %c0_82 = arith.constant 0 : index
    %c0_83 = arith.constant 0 : index
    %99 = vector.load %arg6[%c5, %c0_82, %c0_83] : memref<9x4x4xbf16, #tpu.memory_space<vmem>>, vector<1x4x4xbf16>
    %100 = vector.shape_cast %99 : vector<1x4x4xbf16> to vector<4x4xbf16>
    %cst_84 = arith.constant dense<0.000000e+00> : vector<128x4xf32>
    %101 = tpu.matmul %98, %100, %cst_84 {dimension_numbers = #tpu.dot_dimension_numbers<[1], [0], [0], [1], [0, 0, 1, 1], [], []>} : vector<128x4xbf16>, vector<4x4xbf16>, vector<128x4xf32> -> vector<128x4xf32>
    %102 = arith.addf %96, %101 : vector<128x4xf32>
    %c2_85 = arith.constant 2 : index
    %c7_86 = arith.constant 7 : index
    %c0_87 = arith.constant 0 : index
    %103 = vector.load %arg11[%c2_85, %c7_86, %c0_87] : memref<10x26x4xbf16, #tpu.memory_space<vmem>>, vector<8x16x4xbf16>
    %104 = vector.shape_cast %103 : vector<8x16x4xbf16> to vector<128x4xbf16>
    %c6_88 = arith.constant 6 : index
    %c0_89 = arith.constant 0 : index
    %c0_90 = arith.constant 0 : index
    %105 = vector.load %arg6[%c6_88, %c0_89, %c0_90] : memref<9x4x4xbf16, #tpu.memory_space<vmem>>, vector<1x4x4xbf16>
    %106 = vector.shape_cast %105 : vector<1x4x4xbf16> to vector<4x4xbf16>
    %cst_91 = arith.constant dense<0.000000e+00> : vector<128x4xf32>
    %107 = tpu.matmul %104, %106, %cst_91 {dimension_numbers = #tpu.dot_dimension_numbers<[1], [0], [0], [1], [0, 0, 1, 1], [], []>} : vector<128x4xbf16>, vector<4x4xbf16>, vector<128x4xf32> -> vector<128x4xf32>
    %108 = arith.addf %102, %107 : vector<128x4xf32>
    %c2_92 = arith.constant 2 : index
    %c8_93 = arith.constant 8 : index
    %c0_94 = arith.constant 0 : index
    %109 = vector.load %arg11[%c2_92, %c8_93, %c0_94] : memref<10x26x4xbf16, #tpu.memory_space<vmem>>, vector<8x16x4xbf16>
    %110 = vector.shape_cast %109 : vector<8x16x4xbf16> to vector<128x4xbf16>
    %c7_95 = arith.constant 7 : index
    %c0_96 = arith.constant 0 : index
    %c0_97 = arith.constant 0 : index
    %111 = vector.load %arg6[%c7_95, %c0_96, %c0_97] : memref<9x4x4xbf16, #tpu.memory_space<vmem>>, vector<1x4x4xbf16>
    %112 = vector.shape_cast %111 : vector<1x4x4xbf16> to vector<4x4xbf16>
    %cst_98 = arith.constant dense<0.000000e+00> : vector<128x4xf32>
    %113 = tpu.matmul %110, %112, %cst_98 {dimension_numbers = #tpu.dot_dimension_numbers<[1], [0], [0], [1], [0, 0, 1, 1], [], []>} : vector<128x4xbf16>, vector<4x4xbf16>, vector<128x4xf32> -> vector<128x4xf32>
    %114 = arith.addf %108, %113 : vector<128x4xf32>
    %c2_99 = arith.constant 2 : index
    %c9_100 = arith.constant 9 : index
    %c0_101 = arith.constant 0 : index
    %115 = vector.load %arg11[%c2_99, %c9_100, %c0_101] : memref<10x26x4xbf16, #tpu.memory_space<vmem>>, vector<8x16x4xbf16>
    %116 = vector.shape_cast %115 : vector<8x16x4xbf16> to vector<128x4xbf16>
    %c8_102 = arith.constant 8 : index
    %c0_103 = arith.constant 0 : index
    %c0_104 = arith.constant 0 : index
    %117 = vector.load %arg6[%c8_102, %c0_103, %c0_104] : memref<9x4x4xbf16, #tpu.memory_space<vmem>>, vector<1x4x4xbf16>
    %118 = vector.shape_cast %117 : vector<1x4x4xbf16> to vector<4x4xbf16>
    %cst_105 = arith.constant dense<0.000000e+00> : vector<128x4xf32>
    %119 = tpu.matmul %116, %118, %cst_105 {dimension_numbers = #tpu.dot_dimension_numbers<[1], [0], [0], [1], [0, 0, 1, 1], [], []>} : vector<128x4xbf16>, vector<4x4xbf16>, vector<128x4xf32> -> vector<128x4xf32>
    %120 = arith.addf %114, %119 : vector<128x4xf32>
    %c0_106 = arith.constant 0 : index
    %c0_107 = arith.constant 0 : index
    %121 = vector.load %arg7[%c0_106, %c0_107] : memref<1x4xf32, #tpu.memory_space<vmem>>, vector<1x4xf32>
    %122 = vector.broadcast %121 : vector<1x4xf32> to vector<128x4xf32>
    %123 = arith.addf %120, %122 : vector<128x4xf32>
    %cst_108 = arith.constant 0.000000e+00 : f32
    %124 = vector.broadcast %cst_108 : f32 to vector<128x4xf32>
    %125 = arith.maximumf %123, %124 : vector<128x4xf32>
    %126 = arith.truncf %125 : vector<128x4xf32> to vector<128x4xbf16>
    %c0_109 = arith.constant 0 : index
    %c0_110 = arith.constant 0 : index
    %127 = vector.load %arg8[%c0_109, %c0_110] : memref<4x16xbf16, #tpu.memory_space<vmem>>, vector<4x16xbf16>
    %cst_111 = arith.constant dense<0.000000e+00> : vector<128x16xf32>
    %128 = tpu.matmul %126, %127, %cst_111 {dimension_numbers = #tpu.dot_dimension_numbers<[1], [0], [0], [1], [0, 0, 1, 1], [], []>} : vector<128x4xbf16>, vector<4x16xbf16>, vector<128x16xf32> -> vector<128x16xf32>
    %c0_112 = arith.constant 0 : index
    %c0_113 = arith.constant 0 : index
    %129 = vector.load %arg9[%c0_112, %c0_113] : memref<1x16xf32, #tpu.memory_space<vmem>>, vector<1x16xf32>
    %130 = vector.broadcast %129 : vector<1x16xf32> to vector<128x16xf32>
    %131 = arith.addf %128, %130 : vector<128x16xf32>
    %132 = vector.shape_cast %20 : vector<8x16x16xf32> to vector<128x16xf32>
    %133 = arith.addf %131, %132 : vector<128x16xf32>
    %cst_114 = arith.constant 0.000000e+00 : f32
    %134 = vector.broadcast %cst_114 : f32 to vector<128x16xf32>
    %135 = arith.maximumf %133, %134 : vector<128x16xf32>
    %136 = vector.shape_cast %135 : vector<128x16xf32> to vector<1x8x16x16xf32>
    %c0_115 = arith.constant 0 : index
    %c0_116 = arith.constant 0 : index
    %c0_117 = arith.constant 0 : index
    %c0_118 = arith.constant 0 : index
    %137 = vector.load %arg10[%c0_115, %c0_116, %c0_117, %c0_118] : memref<1x8x16x16xf32, #tpu.memory_space<vmem>>, vector<1x8x16x16xf32>
    tpu.vector_store %arg10[%c0_115, %c0_116, %c0_117, %c0_118], %136 {strides = array<i32>} : memref<1x8x16x16xf32, #tpu.memory_space<vmem>>, vector<1x8x16x16xf32>,
    return
  }
  func.func @transform_0(%arg0: i32, %arg1: i32) -> (i32, i32, i32, i32) {
    %c0_i32 = arith.constant 0 : i32
    %c0_i32_0 = arith.constant 0 : i32
    %c0_i32_1 = arith.constant 0 : i32
    return %arg0, %arg1, %c0_i32, %c0_i32_0 : i32, i32, i32, i32
  }
  func.func @transform_2(%arg0: i32, %arg1: i32) -> (i32, i32) {
    %c0_i32 = arith.constant 0 : i32
    %c0_i32_0 = arith.constant 0 : i32
    %c0_i32_1 = arith.constant 0 : i32
    return %c0_i32, %c0_i32_0 : i32, i32
  }
  func.func @transform_3(%arg0: i32, %arg1: i32) -> (i32, i32) {
    %c0_i32 = arith.constant 0 : i32
    %c0_i32_0 = arith.constant 0 : i32
    %c0_i32_1 = arith.constant 0 : i32
    return %c0_i32, %c0_i32_0 : i32, i32
  }
  func.func @transform_4(%arg0: i32, %arg1: i32) -> (i32, i32, i32) {
    %c0_i32 = arith.constant 0 : i32
    %c0_i32_0 = arith.constant 0 : i32
    %c0_i32_1 = arith.constant 0 : i32
    %c0_i32_2 = arith.constant 0 : i32
    return %c0_i32, %c0_i32_0, %c0_i32_1 : i32, i32, i32
  }
  func.func @transform_5(%arg0: i32, %arg1: i32) -> (i32, i32) {
    %c0_i32 = arith.constant 0 : i32
    %c0_i32_0 = arith.constant 0 : i32
    %c0_i32_1 = arith.constant 0 : i32
    return %c0_i32, %c0_i32_0 : i32, i32
  }
  func.func @transform_6(%arg0: i32, %arg1: i32) -> (i32, i32) {
    %c0_i32 = arith.constant 0 : i32
    %c0_i32_0 = arith.constant 0 : i32
    %c0_i32_1 = arith.constant 0 : i32
    return %c0_i32, %c0_i32_0 : i32, i32
  }
  func.func @transform_7(%arg0: i32, %arg1: i32) -> (i32, i32) {
    %c0_i32 = arith.constant 0 : i32
    %c0_i32_0 = arith.constant 0 : i32
    %c0_i32_1 = arith.constant 0 : i32
    return %c0_i32, %c0_i32_0 : i32, i32
  }
  func.func @transform_8(%arg0: i32, %arg1: i32) -> (i32, i32, i32, i32) {
    %c0_i32 = arith.constant 0 : i32
    %c0_i32_0 = arith.constant 0 : i32
    %c0_i32_1 = arith.constant 0 : i32
    return %arg0, %arg1, %c0_i32, %c0_i32_0 : i32, i32, i32, i32
  }
}

</mosaic_0001>

<bundles_post_ra>
// kernel: tpu_custom_call.1
= control target key start
LH: loop header
LB: loop body
LE: loop exit
PB: predicated region body
PF: predicated region fallthrough
CT: control target
= control target key end

     0   :  { %s5972_s0 = inlined_call_operand.hbm [shape: f32[2,16,16,16], index: 0, kind: input, shape index: {}]   ;;  %s5973_s1 = inlined_call_operand.hbm [shape: f32[2,16,16,16], index: 1, kind: input, shape index: {}]   ;;  %s5974_s2 = inlined_call_operand.vmem [shape: bf16[16,4], index: 2, kind: input, shape index: {}]   ;;  %s5975_s3 = inlined_call_operand.vmem [shape: f32[1,4], index: 3, kind: input, shape index: {}]   ;;  %s5976_s4 = inlined_call_operand.vmem [shape: bf16[9,4,4], index: 4, kind: input, shape index: {}]   ;;  %s5977_s5 = inlined_call_operand.vmem [shape: f32[1,4], index: 5, kind: input, shape index: {}]   ;;  %s5978_s6 = inlined_call_operand.vmem [shape: bf16[4,16], index: 6, kind: input, shape index: {}]   ;;  %s5979_s7 = inlined_call_operand.vmem [shape: f32[1,16], index: 7, kind: input, shape index: {}]   ;;  %s5980_s8 = inlined_call_operand.hbm [shape: f32[2,16,16,16], index: 8, kind: output, shape index: {}]  }
   0x1   :  { %6003 = sst [smem:[#allocation66_spill]] %s5972_s0 }
   0x2   :  { %6004 = sst [smem:[#allocation67_spill]] %s5974_s2 }
   0x3   :  { %6005 = sst [smem:[#allocation68_spill]] %s5977_s5 }
   0x4   :  { %6006 = sst [smem:[#allocation69_spill]] %s5979_s7 }
   0x5   :  { %6007 = sst [smem:[#allocation70_spill]] %s5980_s8 }
   0x6   :  { %13 = vsyncpa [#allocation7], 0 }
   0x7   :  { %15 = vsyncpa [#allocation7 + $0x1], 0 }
   0x8   :  { %16 = vsyncpa [#allocation8], 0 }
   0x9   :  { %18 = vsyncpa [#allocation8 + $0x1], 0  ;;  %s4845_s27 = smov 0   ;;  %s4847_s28 = smov 0  }
   0xa   :  { %s4849_s29 = smov 0   ;;  %s4851_s30 = smov 0  }
   0xb   :  { %s4853_s9 = smov 0   ;;  %s4855_s10 = smov 0  }
   0xc   :  { %s4857_s11 = smov 0   ;;  %s4859_s12 = smov 0  }
   0xd LB: > { %6008 = sst [smem:[#allocation20_spill]] %s4757_s27  ;;  %s3901_s13 = sadd.s32 4294967295, %s4785_s12   ;;  %s4785_s12 = sphi %s4859_s12, %s24_s12   ;;  %s4781_s11 = sphi %s4857_s11, %s6119_s11   ;;  %s4777_s10 = sphi %s4855_s10, %s6113_s10   ;;  %s4773_s9 = sphi %s4853_s9, %s6118_s9   ;;  %s4769_s30 = sphi %s4851_s30, %s6112_s30   ;;  %s4765_s29 = sphi %s4849_s29, %s6117_s29   ;;  %s4761_s28 = sphi %s4847_s28, %s6116_s28   ;;  %s4757_s27 = sphi %s4845_s27, %s6115_s27  }
   0xe   : > { %6009 = sst [smem:[#allocation21_spill]] %s4777_s10  ;;  %s3902_s14 = sadd.s32 4294967294, %s4785_s12  }
   0xf   : > { %s33_s15 = sadd.s32 1, %s4777_s10  ;;  %s36_s16 = sadd.s32 1, %s4781_s11 }
  0x10   : > { %p34_p0 = scmp.ge.s32.totalorder %s33_s15, 2  ;;  %s45_s17 = sadd.s32 1, %s4765_s29 }
  0x11   : > { %p52_p1 = scmp.ne.s32.totalorder %s4765_s29, %s4761_s28  ;;  %p53_p2 = scmp.eq.s32.totalorder %s4785_s12, 0 }
  0x12   : > { %s6121_s15 = smov (%p34_p0, %s33_s15), 0  ;;  %s6123_s16 = smov (!%p34_p0, %s36_s16), %s4781_s11 }
  0x13   : > { %6010 = sst [smem:[#allocation22_spill]] %s6121_s15  ;;  %s41_s18 = ssub.s32 %s4777_s10, %s6121_s15 }
  0x14   : > { %p4898_p3 = por %p53_p2, %p52_p1  ;;  %p38_p4 = scmp.ge.s32.totalorder %s6123_s16, 2 }
  0x15   : > { %p58_p5 = scmp.ne.s32.totalorder %s4761_s28, %s4757_s27  ;;  %p59_p6 = scmp.eq.s32.totalorder %s3901_s13, 0 }
  0x16   : > { %p210_p7 = scmp.eq.s32.totalorder %s3901_s13, 3  ;;  %s6125_s16 = smov (%p38_p4, %s6123_s16), 0 }
  0x17   : > { %6012 = sst [smem:[#allocation23_spill]] %s6125_s16  ;;  %p4906_p8 = por %p59_p6, %p58_p5 }
  0x18   : > { %p4910_p9 = por %p210_p7, %p52_p1  ;;  %s40_s22 = ssub.s32 %s4781_s11, %s6125_s16 }
  0x19   : > { %p216_p10 = scmp.eq.s32.totalorder %s3902_s14, 3  ;;  %s42_s23 = sor.u32 %s41_s18, %s40_s22 }
  0x1a   : > { %p43_p11 = scmp.eq.s32.totalorder %s42_s23, 0  ;;  %p4511_p13 = scmp.lt.s32.totalorder %s4785_s12, 4 }
  0x1b   : > { %p4916_p12 = por %p216_p10, %p58_p5  ;;  %s254_s25 = sand.u32 1, %s4765_s29  }
  0x1c   : > { %s4923_s26 = scalar_select %p43_p11, %s4765_s29, %s45_s17  }
  0x1d   : > { %s3905_s13 = sshll.u32 %s254_s25, 7  ;;  %s4150_s15 = sshll.u32 %s4777_s10, 4 }
  0x1e   : > { %s3908_s27 = sshll.u32 %s4781_s11, 5  ;;  %s258_s8 = scalar_lea.vmem [#allocation6], %s3905_s13 }
  0x1f   : > { %s268_s7 = sshll.u32 %s258_s8, 4  ;;  %s265_s5 = sadd.s32 %s4150_s15, %s3908_s27  ;;  %s269_s7 = int_to_ptr.vmem [resolvable:$true] %s268_s7 }
  0x20   : > { %s3909_s16 = sshll.u32 %s265_s5, 7  ;;  %p4929_p0 = pnand %p4511_p13, %p4898_p3 }
  0x21   : > { %s6017_s0 = sld [smem:[#allocation66_spill]]  ;;  %s255_s17 = scalar_lea.sflag [#allocation7], %s254_s25 }
  0x22   : > { %p4615_p1 = pneg %p4929_p0  ;;  %s4626_s10 = scalar_lea.vmem %s269_s7, 2048 }
  0x23   : > { %p4627_p2 = scmp.ne.s32.totalorder %s269_s7, %s4626_s10  ;;  %s4787_s8 = smov [#allocation6]  }
  0x24   : > { %s4631_s27 = sshll.u32 %s4787_s8, 4  ;;  %s4632_s27 = int_to_ptr.vmem [resolvable:$false] %s4631_s27 }
  0x25   : > { %p4629_p4 = pnand %p4627_p2, %p4615_p1  ;;  %s4633_s5 = scalar_lea.vmem %s4632_s27, 4096 }
  0x26   : > { %p4634_p3 = scmp.lt.s32.totalorder %s269_s7, %s4632_s27  ;;  %p4635_p6 = scmp.lt.s32.totalorder %s4633_s5, %s4626_s10 }
  0x27   : > { %s267_s23 = scalar_lea.hbm %s6017_s0, %s3909_s16  ;;  %p4630_p5 = pneg %p4629_p4 }
  0x28   : > { %p4636_p7 = por %p4635_p6, %p4634_p3 }
  0x2a   : > { %p4637_p10 = pnand %p4636_p7, %p4630_p5 }
  0x2c   : > { %4640 = shalt.err (!%p4637_p10)
}
  0x2d   : > { %s4788_s15 = smov 128   ;;  %s4789_s16 = smov 8  }
  0x2e   : > { %4506 = dma.hbm_to_vmem [thread:$0]  (!%p4929_p0), %s267_s23, 2048, %s269_s7, %s255_s17, %s4788_s15, %s4788_s15, %s4789_s16  }
  0x2f   : > { %p3910_p11 = scmp.ge.s32.totalorder %s4785_s12, 1  ;;  %p276_p13 = scmp.lt.s32.totalorder %s4785_s12, 5 }
  0x31   : > { %p277_p1 = pnand %p3910_p11, %p276_p13 }
  0x33   : > { %280 = sbr.rel (%p277_p1) target bundleno = 1353 (0x549), region = 48 }
  0x38   : > { %s4943_s19 = sand.u32 1, %s4761_s28  }
  0x39   : > { %s5986_s10 = sshll.u32 %s4943_s19, 7  ;;  %s283_s25 = scalar_lea.sflag [#allocation7], %s4943_s19 }
  0x3a   : > { %s4949_s13 = scalar_lea.vmem [#allocation6], %s5986_s10 }
  0x3b   : > { %4744 = dma.done.wait (%p4906_p8), %s283_s25, 2048  }
  0x3c   : > { %4746 = vsyncadd (%p4906_p8), %s283_s25, 4294965248  ;;  %vm360_vm0 = vcmask 27651   ;;  %vm371_vm1 = vcmask 24576   ;;  %v4790_v0 = vmov 0   ;;  %s6018_s2 = sld [smem:[#allocation67_spill]]  ;;  %v4971_v2 = vld [vmem:[%s4949_s13] sm:$0xff] }
  0x3d   : > { %361 = vst.msk [vmem:[#allocation2] sm:$0x8] %vm360_vm0, %v4790_v0  ;;  %362 = vst.msk [vmem:[#allocation2 + $0x10] sm:$0x8] %vm360_vm0, %v4790_v0  ;;  %v4974_v3 = vld [vmem:[%s4949_s13 + $0x8] sm:$0xff]  ;;  %vm421_vm2 = vcmask 130048  }
  0x3e   : > { %363 = vst.msk [vmem:[#allocation2 + $0x20] sm:$0x8] %vm360_vm0, %v4790_v0  ;;  %364 = vst.msk [vmem:[#allocation2 + $0x30] sm:$0x8] %vm360_vm0, %v4790_v0  ;;  %v4977_v4 = vld [vmem:[%s4949_s13 + $0x10] sm:$0xff]  ;;  %v401_v5 = vpack.c.bf16 %v4974_v3, %v4971_v2  ;;  %v4983_v6 = vld [vmem:[%s4949_s13 + $0x18] sm:$0xff] }
  0x3f   : > { %365 = vst.msk [vmem:[#allocation2 + $0x40] sm:$0x8] %vm360_vm0, %v4790_v0  ;;  %366 = vst.msk [vmem:[#allocation2 + $0x50] sm:$0x8] %vm360_vm0, %v4790_v0  ;;  %v4987_v7 = vld [vmem:[%s4949_s13 + $0x20] sm:$0xff]  ;;  %v4990_v8 = vld [vmem:[%s4949_s13 + $0x28] sm:$0xff]  ;;  %v402_v9 = vpack.c.bf16 %v4983_v6, %v4977_v4 }
  0x40   : > { %367 = vst.msk [vmem:[#allocation2 + $0x60] sm:$0x8] %vm360_vm0, %v4790_v0  ;;  %368 = vst.msk [vmem:[#allocation2 + $0x70] sm:$0x8] %vm360_vm0, %v4790_v0  ;;  %v403_v10 = vpack.c.bf16 %v4990_v8, %v4987_v7  ;;  %v4999_v11 = vld [vmem:[%s4949_s13 + $0x60] sm:$0xff]  ;;  %4279 = vmatprep.mubr.msk.bf16.mxu0 %vm421_vm2, %v401_v5  ;;  %v5003_v12 = vld [vmem:[%s4949_s13 + $0x68] sm:$0xff] }
  0x41   : > { %369 = vst.msk [vmem:[#allocation2 + $0x80] sm:$0x8] %vm360_vm0, %v4790_v0  ;;  %370 = vst.msk [vmem:[#allocation2 + $0x90] sm:$0x8] %vm360_vm0, %v4790_v0  ;;  %v5006_v13 = vld [vmem:[%s4949_s13 + $0x70] sm:$0xff]  ;;  %v5009_v14 = vld [vmem:[%s4949_s13 + $0x78] sm:$0xff]  ;;  %v407_v15 = vpack.c.bf16 %v5003_v12, %v4999_v11 }
  0x42   : > { %372 = vst.msk [vmem:[#allocation2 + $0xc] sm:$0x1] %vm371_vm1, %v4790_v0  ;;  %373 = vst.msk [vmem:[#allocation2 + $0x1c] sm:$0x1] %vm371_vm1, %v4790_v0  ;;  %v4968_v1 = vld [vmem:[%s6018_s2] sm:$0xff]   ;;  %v408_v16 = vpack.c.bf16 %v5009_v14, %v5006_v13  ;;  %v5018_v17 = vld [vmem:[%s4949_s13 + $0x30] sm:$0xff] }
  0x43   : > { %374 = vst.msk [vmem:[#allocation2 + $0x2c] sm:$0x1] %vm371_vm1, %v4790_v0  ;;  %375 = vst.msk [vmem:[#allocation2 + $0x3c] sm:$0x1] %vm371_vm1, %v4790_v0  ;;  %4277 = vmatprep.subr.bf16.mxu0 %v4968_v1  ;;  %4487 = vmatprep.subr.bf16.mxu1 %v4968_v1  ;;  %v5021_v18 = vld [vmem:[%s4949_s13 + $0x38] sm:$0xff]  ;;  %v5026_v19 = vld [vmem:[%s4949_s13 + $0x40] sm:$0xff] }
  0x44   : > { %376 = vst.msk [vmem:[#allocation2 + $0x4c] sm:$0x1] %vm371_vm1, %v4790_v0  ;;  %377 = vst.msk [vmem:[#allocation2 + $0x5c] sm:$0x1] %vm371_vm1, %v4790_v0  ;;  %4278 = vmatpush3.bf16.msra.mxu0 %v4968_v1  ;;  %4488 = vmatpush3.bf16.msra.mxu1 %v4968_v1  ;;  %v5029_v20 = vld [vmem:[%s4949_s13 + $0x48] sm:$0xff]  ;;  %v404_v21 = vpack.c.bf16 %v5021_v18, %v5018_v17  ;;  %v5038_v23 = vld [vmem:[%s4949_s13 + $0x50] sm:$0xff] }
  0x45   : > { %378 = vst.msk [vmem:[#allocation2 + $0x6c] sm:$0x1] %vm371_vm1, %v4790_v0  ;;  %379 = vst.msk [vmem:[#allocation2 + $0x7c] sm:$0x1] %vm371_vm1, %v4790_v0  ;;  %4291 = vmatprep.mubr.msk.bf16.mxu1 %vm421_vm2, %v407_v15  ;;  %v405_v22 = vpack.c.bf16 %v5029_v20, %v5026_v19  ;;  %v5041_v24 = vld [vmem:[%s4949_s13 + $0x58] sm:$0xff]  ;;  %s3913_s14 = sshll.u32 %s4769_s30, 3 }
  0x46   : > { %380 = vst.msk [vmem:[#allocation2 + $0x8c] sm:$0x1] %vm371_vm1, %v4790_v0  ;;  %381 = vst.msk [vmem:[#allocation2 + $0x9c] sm:$0x1] %vm371_vm1, %v4790_v0  ;;  %v406_v25 = vpack.c.bf16 %v5041_v24, %v5038_v23  ;;  %s3914_s18 = sadd.s32 4294967295, %s3913_s14  ;;  %s4152_s22 = sadd.s32 8, %s3913_s14 }
  0x47   : > { %6019 = vst [vmem:[#allocation24_spill] sm:$0xff] %v4971_v2  ;;  %6020 = vst [vmem:[#allocation25_spill] sm:$0xff] %v4974_v3  ;;  %4280 = vmatmul.mubr.msk.bf16.vlgmr.msra.gmra.mxu0 %vm421_vm2, %v402_v9  ;;  %4292 = vmatmul.mubr.msk.bf16.vlgmr.msra.gmra.mxu1 %vm421_vm2, %v408_v16  ;;  %p322_p8 = scmp.gt.s32.totalorder %s3914_s18, 0  ;;  %p326_p0 = scmp.lt.s32.totalorder %s4152_s22, 15 }
  0x48   : > { %6021 = vst [vmem:[#allocation26_spill] sm:$0xff] %v4977_v4  ;;  %6022 = vst [vmem:[#allocation27_spill] sm:$0xff] %v4983_v6  ;;  %4283 = vmatprep.mubr.msk.bf16.mxu0 %vm421_vm2, %v403_v10  ;;  %s3917_s17 = sshll.u32 %s4773_s9, 8  ;;  %s4791_s5 = smov [#allocation3]  }
  0x49   : > { %6023 = vst [vmem:[#allocation28_spill] sm:$0xff] %v4987_v7  ;;  %6024 = vst [vmem:[#allocation29_spill] sm:$0xff] %v4990_v8  ;;  %s6127_s18 = smov (!%p322_p8, %s3914_s18), 0  ;;  %s6129_s22 = smov (!%p326_p0, %s4152_s22), 15 }
  0x4a   : > { %6025 = vst [vmem:[#allocation30_spill] sm:$0xff] %v4999_v11  ;;  %6026 = vst [vmem:[#allocation31_spill] sm:$0xff] %v5003_v12  ;;  %s3916_s23 = sshll.u32 %s6127_s18, 4  ;;  %s340_s15 = sshll.u32 %s4791_s5, 4  ;;  %s341_s15 = int_to_ptr.vmem [resolvable:$true] %s340_s15 }
  0x4b   : > { %6027 = vst [vmem:[#allocation32_spill] sm:$0xff] %v5006_v13  ;;  %6028 = vst [vmem:[#allocation33_spill] sm:$0xff] %v5009_v14  ;;  %s330_s8 = sadd.s32 %s3917_s17, %s3916_s23  ;;  %s4643_s14 = scalar_lea.hbm %s5973_s1, 8192 }
  0x4c   : > { %6029 = vst [vmem:[#allocation34_spill] sm:$0xff] %v5018_v17  ;;  %6030 = vst [vmem:[#allocation35_spill] sm:$0xff] %v5021_v18  ;;  %s3918_s27 = sshll.u32 %s330_s8, 4 }
  0x4d   : > { %6031 = vst [vmem:[#allocation36_spill] sm:$0xff] %v5026_v19  ;;  %6032 = vst [vmem:[#allocation37_spill] sm:$0xff] %v5029_v20  ;;  %s332_s13 = scalar_lea.hbm %s5973_s1, %s3918_s27 }
  0x4e   : > { %6033 = vst [vmem:[#allocation38_spill] sm:$0xff] %v5038_v23  ;;  %6034 = vst [vmem:[#allocation39_spill] sm:$0xff] %v5041_v24  ;;  %s4641_s7 = scalar_lea.hbm %s332_s13, 256  ;;  %p4644_p4 = scmp.lt.s32.totalorder %s332_s13, %s5973_s1 }
  0x4f   : > { %4284 = vmatmul.mubr.msk.bf16.gmra.mxu0 %vm421_vm2, %v404_v21  ;;  %p4642_p2 = scmp.ne.s32.totalorder %s332_s13, %s4641_s7  ;;  %p4645_p5 = scmp.lt.s32.totalorder %s4643_s14, %s4641_s7 }
  0x50   : > { %4287 = vmatprep.mubr.msk.bf16.mxu0 %vm421_vm2, %v405_v22 }
  0x51   : > { %p4646_p3 = por %p4645_p5, %p4644_p4 }
  0x53   : > { %p4647_p6 = pnand %p4646_p3, %p4642_p2 }
  0x57   : > { %4288 = vmatmul.mubr.msk.bf16.gmra.mxu0 %vm421_vm2, %v406_v25 }
  0x58   : > { %4650 = shalt.err (!%p4647_p6)  }
  0x59   : > { %s4651_s18 = scalar_lea.vmem %s341_s15, 256  ;;  %p4656_p10 = scmp.lt.s32.totalorder %s341_s15, %s341_s15 }
  0x5a   : > { %p4652_p7 = scmp.ne.s32.totalorder %s341_s15, %s4651_s18  ;;  %p4657_p11 = scmp.lt.s32.totalorder %s4651_s18, %s4651_s18 }
  0x5c   : > { %p4658_p13 = por %p4657_p11, %p4656_p10 }
  0x5e   : > { %p4659_p1 = pnand %p4658_p13, %p4652_p7 }
  0x60   : > { %4662 = shalt.err (!%p4659_p1)  }
  0x61   : > { %343 = dma.hbm_to_vmem [thread:$0]  %s332_s13, 256, %s341_s15, [#allocation5] }
  0x62   : > { %s3919_s23 = sshll.u32 %s6129_s22, 4  ;;  %s4792_s27 = smov [#allocation4]  }
  0x63   : > { %s345_s8 = sadd.s32 %s3919_s23, %s3917_s17  ;;  %s356_s5 = sshll.u32 %s4792_s27, 4  ;;  %s357_s5 = int_to_ptr.vmem [resolvable:$true] %s356_s5 }
  0x64   : > { %s3920_s10 = sshll.u32 %s345_s8, 4 }
  0x65   : > { %s347_s2 = scalar_lea.hbm %s5973_s1, %s3920_s10 }
  0x66   : > { %s4663_s25 = scalar_lea.hbm %s347_s2, 256  ;;  %p4666_p0 = scmp.lt.s32.totalorder %s347_s2, %s5973_s1 }
  0x67   : > { %p4664_p8 = scmp.ne.s32.totalorder %s347_s2, %s4663_s25  ;;  %p4667_p2 = scmp.lt.s32.totalorder %s4643_s14, %s4663_s25 }
  0x69   : > { %p4668_p4 = por %p4667_p2, %p4666_p0 }
  0x6b   : > { %p4669_p5 = pnand %p4668_p4, %p4664_p8 }
  0x6d   : > { %4672 = shalt.err (!%p4669_p5)  }
  0x6e   : > { %s4673_s22 = scalar_lea.vmem %s357_s5, 256  ;;  %p4678_p6 = scmp.lt.s32.totalorder %s357_s5, %s357_s5 }
  0x6f   : > { %p4674_p3 = scmp.ne.s32.totalorder %s357_s5, %s4673_s22  ;;  %p4679_p7 = scmp.lt.s32.totalorder %s4673_s22, %s4673_s22 }
  0x71   : > { %p4680_p10 = por %p4679_p7, %p4678_p6 }
  0x73   : > { %p4681_p11 = pnand %p4680_p10, %p4674_p3 }
  0x75   : > { %4684 = shalt.err (!%p4681_p11)  }
  0x76   : > { %359 = dma.hbm_to_vmem [thread:$0]  %s347_s2, 256, %s357_s5, [#allocation5 + $0x1]  ;;  %v5066_v26 = vld [vmem:[%s5975_s3] ss:$0 sm:$0xff]  ;;  %vm624_vm3 = vcmask 27648  }
  0x77   : > { %s6035_s13 = sshll.u32 %s4943_s19, 7 }
  0x78   : > { %s5102_s14 = scalar_lea.vmem [#allocation9], %s6035_s13 }
 0x107   : > { %v4281_v27 = vpop.f32.mrf.mxu0  ;;  %v4293_v30 = vpop.f32.mrf.mxu1 }
 0x108   : > { %v489_v28 = vadd.f32 %v4281_v27, %v5066_v26  ;;  %v537_v33 = vadd.f32 %v4293_v30, %v5066_v26 }
 0x109   : > { %v480_v29 = vpop.f32.mrf.mxu0  ;;  %v528_v35 = vpop.f32.mrf.mxu1 }
 0x10a   : > { %v545_v31 = vmax.f32 %v489_v28, 0.0  ;;  %v481_v32 = vadd.f32 %v5066_v26, %v480_v29  ;;  %v557_v39 = vmax.f32 %v537_v33, 0.0  ;;  %v529_v41 = vadd.f32 %v5066_v26, %v528_v35 }
 0x10b   : > { %v4282_v34 = vpop.f32.mrf.mxu0  ;;  %v4294_v42 = vpop.f32.mrf.mxu1 }
 0x10c   : > { %v4155_v36 = vpack.c.bf16 %v545_v31, %v545_v31  ;;  %v543_v37 = vmax.f32 %v481_v32, 0.0  ;;  %v492_v38 = vadd.f32 %v4282_v34, %v5066_v26  ;;  %v4167_v46 = vpack.c.bf16 %v557_v39, %v557_v39 }
 0x10d   : > { %v483_v40 = vpop.f32.mrf.mxu0  ;;  %v555_v48 = vmax.f32 %v529_v41, 0.0  ;;  %v540_v49 = vadd.f32 %v4294_v42, %v5066_v26  ;;  %v531_v50 = vpop.f32.mrf.mxu1 }
 0x10e   : > { %627 = vst.msk [vmem:[#allocation2 + $0x24] sm:$0xf] %vm624_vm3, %v4155_v36  ;;  %v4153_v43 = vpack.c.bf16 %v543_v37, %v543_v37  ;;  %v546_v44 = vmax.f32 %v492_v38, 0.0  ;;  %v484_v45 = vadd.f32 %v5066_v26, %v483_v40  ;;  %639 = vst.msk [vmem:[#allocation2 + $0x84] sm:$0xf] %vm624_vm3, %v4167_v46  ;;  %v532_v54 = vadd.f32 %v5066_v26, %v531_v50 }
 0x10f   : > { %v4285_v47 = vpop.f32.mrf.mxu0  ;;  %v4165_v56 = vpack.c.bf16 %v555_v48, %v555_v48  ;;  %v558_v57 = vmax.f32 %v540_v49, 0.0 }
 0x110   : > { %625 = vst.msk [vmem:[#allocation2 + $0x14] sm:$0xf] %vm624_vm3, %v4153_v43  ;;  %v4156_v51 = vpack.c.bf16 %v546_v44, %v546_v44  ;;  %v544_v52 = vmax.f32 %v484_v45, 0.0  ;;  %v505_v53 = vadd.f32 %v4285_v47, %v5066_v26  ;;  %v556_v61 = vmax.f32 %v532_v54, 0.0 }
 0x111   : > { %v496_v55 = vpop.f32.mrf.mxu0  ;;  %637 = vst.msk [vmem:[#allocation2 + $0x74] sm:$0xf] %vm624_vm3, %v4165_v56  ;;  %v4168_v63 = vpack.c.bf16 %v558_v57, %v558_v57 }
 0x112   : > { %628 = vst.msk [vmem:[#allocation2 + $0x28] sm:$0xf] %vm624_vm3, %v4156_v51  ;;  %v4154_v58 = vpack.c.bf16 %v544_v52, %v544_v52  ;;  %v549_v59 = vmax.f32 %v505_v53, 0.0  ;;  %v497_v60 = vadd.f32 %v5066_v26, %v496_v55  ;;  %v4166_v10 = vpack.c.bf16 %v556_v61, %v556_v61 }
 0x113   : > { %v4286_v62 = vpop.f32.mrf.mxu0  ;;  %640 = vst.msk [vmem:[#allocation2 + $0x88] sm:$0xf] %vm624_vm3, %v4168_v63 }
 0x114   : > { %626 = vst.msk [vmem:[#allocation2 + $0x18] sm:$0xf] %vm624_vm3, %v4154_v58  ;;  %v4159_v0 = vpack.c.bf16 %v549_v59, %v549_v59  ;;  %v547_v5 = vmax.f32 %v497_v60, 0.0  ;;  %v508_v9 = vadd.f32 %v4286_v62, %v5066_v26  ;;  %638 = vst.msk [vmem:[#allocation2 + $0x78] sm:$0xf] %vm624_vm3, %v4166_v10 }
 0x115   : > { %v499_v15 = vpop.f32.mrf.mxu0 }
 0x116   : > { %631 = vst.msk [vmem:[#allocation2 + $0x44] sm:$0xf] %vm624_vm3, %v4159_v0  ;;  %v4157_v16 = vpack.c.bf16 %v547_v5, %v547_v5  ;;  %v550_v21 = vmax.f32 %v508_v9, 0.0  ;;  %v500_v22 = vadd.f32 %v5066_v26, %v499_v15 }
 0x117   : > { %v4289_v25 = vpop.f32.mrf.mxu0 }
 0x118   : > { %629 = vst.msk [vmem:[#allocation2 + $0x34] sm:$0xf] %vm624_vm3, %v4157_v16  ;;  %v4160_v27 = vpack.c.bf16 %v550_v21, %v550_v21  ;;  %v548_v28 = vmax.f32 %v500_v22, 0.0  ;;  %v521_v29 = vadd.f32 %v4289_v25, %v5066_v26 }
 0x119   : > { %v512_v30 = vpop.f32.mrf.mxu0 }
 0x11a   : > { %632 = vst.msk [vmem:[#allocation2 + $0x48] sm:$0xf] %vm624_vm3, %v4160_v27  ;;  %v4158_v31 = vpack.c.bf16 %v548_v28, %v548_v28  ;;  %v553_v32 = vmax.f32 %v521_v29, 0.0  ;;  %v513_v33 = vadd.f32 %v5066_v26, %v512_v30 }
 0x11b   : > { %v4290_v34 = vpop.f32.mrf.mxu0 }
 0x11c   : > { %630 = vst.msk [vmem:[#allocation2 + $0x38] sm:$0xf] %vm624_vm3, %v4158_v31  ;;  %v4163_v35 = vpack.c.bf16 %v553_v32, %v553_v32  ;;  %v551_v36 = vmax.f32 %v513_v33, 0.0  ;;  %v524_v37 = vadd.f32 %v4290_v34, %v5066_v26 }
 0x11d   : > { %v515_v38 = vpop.f32.mrf.mxu0 }
 0x11e   : > { %635 = vst.msk [vmem:[#allocation2 + $0x64] sm:$0xf] %vm624_vm3, %v4163_v35  ;;  %v4161_v39 = vpack.c.bf16 %v551_v36, %v551_v36  ;;  %v554_v40 = vmax.f32 %v524_v37, 0.0  ;;  %v516_v41 = vadd.f32 %v5066_v26, %v515_v38 }
 0x120   : > { %633 = vst.msk [vmem:[#allocation2 + $0x54] sm:$0xf] %vm624_vm3, %v4161_v39  ;;  %v4164_v42 = vpack.c.bf16 %v554_v40, %v554_v40  ;;  %v552_v43 = vmax.f32 %v516_v41, 0.0 }
 0x122   : > { %636 = vst.msk [vmem:[#allocation2 + $0x68] sm:$0xf] %vm624_vm3, %v4164_v42  ;;  %v4162_v44 = vpack.c.bf16 %v552_v43, %v552_v43 }
 0x124   : > { %634 = vst.msk [vmem:[#allocation2 + $0x58] sm:$0xf] %vm624_vm3, %v4162_v44 }
 0x125   : > { %4747 = dma.done.wait [#allocation5], 256 }
 0x126   : > { %4748 = vsyncadd [#allocation5], 4294967040  ;;  %v4793_v45 = vmov 0.0   ;;  %vm4794_vm4 = vmmov 0   ;;  %v645_v46 = vld [vmem:[#allocation3] sm:$0xff]  ;;  %v646_v47 = vld [vmem:[#allocation3 + $0x8] sm:$0xff] }
 0x127   : > { %4295 = vmatprep.subr.bf16.mxu1 %v4793_v45  ;;  %4297 = vmatprep.mubr.msk.bf16.mxu1 %vm4794_vm4, %v4793_v45  ;;  %v647_v48 = vpack.c.bf16 %v646_v47, %v645_v46 }
 0x128   : > { %4296 = vmatpush3.bf16.msra.mxu1 %v4968_v1 }
 0x12b   : > { %4298 = vmatmul.mubr.msk.bf16.vlgmr.msra.gmra.mxu1 %vm421_vm2, %v647_v48 }
 0x1eb   : > { %v685_v49 = vpop.f32.mrf.mxu1 }
 0x1ec   : > { %v686_v50 = vadd.f32 %v5066_v26, %v685_v49 }
 0x1ed   : > { %v4299_v51 = vpop.f32.mrf.mxu1 }
 0x1ee   : > { %v692_v52 = vmax.f32 %v686_v50, 0.0 }
 0x1ef   : > { %v688_v53 = vpop.f32.mrf.mxu1 }
 0x1f0   : > { %v4169_v54 = vpack.c.bf16 %v692_v52, %v692_v52  ;;  %v689_v55 = vadd.f32 %v5066_v26, %v688_v53 }
 0x1f1   : > { %v4300_v56 = vpop.f32.mrf.mxu1 }
 0x1f2   : > { %702 = vst.msk [vmem:[#allocation2 + $0x4] sm:$0xf] %vm624_vm3, %v4169_v54  ;;  %v693_v57 = vmax.f32 %v689_v55, 0.0 }
 0x1f4   : > { %v4170_v58 = vpack.c.bf16 %v693_v57, %v693_v57 }
 0x1f6   : > { %703 = vst.msk [vmem:[#allocation2 + $0x8] sm:$0xf] %vm624_vm3, %v4170_v58 }
 0x1f7   : > { %4749 = dma.done.wait [#allocation5 + $0x1], 256 }
 0x1f8   : > { %4750 = vsyncadd [#allocation5 + $0x1], 4294967040  ;;  %4301 = vmatprep.subr.bf16.mxu1 %v4793_v45  ;;  %4303 = vmatprep.mubr.msk.bf16.mxu1 %vm4794_vm4, %v4793_v45  ;;  %v706_v59 = vld [vmem:[#allocation4] sm:$0xff]  ;;  %v707_v60 = vld [vmem:[#allocation4 + $0x8] sm:$0xff]  ;;  %p3953_p13 = scmp.ne.s32.totalorder %s4769_s30, 0 }
 0x1f9   : > { %4302 = vmatpush3.bf16.msra.mxu1 %v4968_v1  ;;  %v708_v61 = vpack.c.bf16 %v707_v60, %v706_v59 }
 0x1fc   : > { %4304 = vmatmul.mubr.msk.bf16.vlgmr.msra.gmra.mxu1 %vm421_vm2, %v708_v61 }
 0x2bc   : > { %v746_v62 = vpop.f32.mrf.mxu1 }
 0x2bd   : > { %v747_v63 = vadd.f32 %v5066_v26, %v746_v62 }
 0x2be   : > { %v4305_v0 = vpop.f32.mrf.mxu1 }
 0x2bf   : > { %v753_v5 = vmax.f32 %v747_v63, 0.0 }
 0x2c0   : > { %v749_v9 = vpop.f32.mrf.mxu1 }
 0x2c1   : > { %v4171_v10 = vpack.c.bf16 %v753_v5, %v753_v5  ;;  %v750_v15 = vadd.f32 %v5066_v26, %v749_v9 }
 0x2c2   : > { %v4306_v16 = vpop.f32.mrf.mxu1 }
 0x2c3   : > { %764 = vst.msk [vmem:[#allocation2 + $0x94] sm:$0xf] %vm624_vm3, %v4171_v10  ;;  %v754_v21 = vmax.f32 %v750_v15, 0.0  ;;  %769 = sbr.rel (%p3953_p13) target bundleno = 714 (0x2ca), region = 64 }
 0x2c5   : > { %v4172_v22 = vpack.c.bf16 %v754_v21, %v754_v21 }
 0x2c7   : > { %765 = vst.msk [vmem:[#allocation2 + $0x98] sm:$0xf] %vm624_vm3, %v4172_v22 }
 0x2c8   : > { %v4795_v1 = vmov 0  }
 0x2c9   : > { %770 = vst.msk [vmem:[#allocation2 + $0x4] sm:$0xf] %vm624_vm3, %v4795_v1  ;;  %771 = vst.msk [vmem:[#allocation2 + $0x8] sm:$0xf] %vm624_vm3, %v4795_v1 }
 0x2ca PF: > { %p3954_p1 = scmp.ne.s32.totalorder %s4769_s30, 1 }
 0x2cc   : > { %775 = sbr.rel (%p3954_p1) target bundleno = 723 (0x2d3), region = 68 }
 0x2d1   : > { %v4796_v26 = vmov 0  }
 0x2d2   : > { %776 = vst.msk [vmem:[#allocation2 + $0x94] sm:$0xf] %vm624_vm3, %v4796_v26  ;;  %777 = vst.msk [vmem:[#allocation2 + $0x98] sm:$0xf] %vm624_vm3, %v4796_v26 }
 0x2d3 PF: > { %v3963_v25 = vld [vmem:[%s5976_s4 + $0x2] sm:$0x3]  ;;  %vm1049_vm5 = vcmask 1041408   ;;  %v779_v27 = vld [vmem:[#allocation2 + $0x4] sm:$0xf]  ;;  %vm1024_vm6 = vcmask 31744  }
 0x2d4   : > { %4489 = vmatprep.subr.msk.bf16.mxu1 %vm1049_vm5, %v3963_v25  ;;  %v1051_v28 = vsel %vm1049_vm5, %v3963_v25, 0  ;;  %v780_v29 = vld [vmem:[#allocation2 + $0x8] sm:$0xf]  ;;  %v811_v30 = vshrl.u32 %v779_v27, 16  ;;  %v814_v31 = vshll.u32 %v779_v27, 16  ;;  %s6066_s16 = sld [smem:[#allocation68_spill]] }
 0x2d5   : > { %4308 = vmatpush3.bf16.msra.mxu1 %v1051_v28  ;;  %v820_v32 = vshrl.u32 %v780_v29, 16  ;;  %v823_v33 = vshll.u32 %v780_v29, 16  ;;  %v3964_v34 = vcombine.low %v779_v27, %v780_v29  ;;  %v782_v35 = vld [vmem:[#allocation2 + $0x14] sm:$0xf]  ;;  %v783_v36 = vld [vmem:[#allocation2 + $0x18] sm:$0xf] }
 0x2d6   : > { %v813_v37 = vrot.slane %v811_v30, 7  ;;  %v833_v38 = vshrl.u32 %v782_v35, 16  ;;  %v836_v39 = vshll.u32 %v782_v35, 16  ;;  %v842_v40 = vshrl.u32 %v783_v36, 16  ;;  %v3996_v41 = vld [vmem:[%s5976_s4 + $0x4] sm:$0x3] }
 0x2d7   : > { %v822_v42 = vrot.slane %v820_v32, 7  ;;  %4309 = vmatprep.mubr.msk.bf16.mxu1 %vm1024_vm6, %v3964_v34  ;;  %v845_v43 = vshll.u32 %v783_v36, 16  ;;  %v3965_v44 = vcombine.low %v782_v35, %v783_v36  ;;  %4491 = vmatprep.subr.msk.bf16.mxu1 %vm1049_vm5, %v3996_v41  ;;  %v1568_v45 = vsel %vm1049_vm5, %v3996_v41, 0  ;;  %v981_v46 = vld [vmem:[%s5976_s4] sm:$0x3]  ;;  %s6093_s25 = sld [smem:[#allocation69_spill]] }
 0x2d8   : > { %v835_v47 = vrot.slane %v833_v38, 7  ;;  %v844_v48 = vrot.slane %v842_v40, 7  ;;  %4490 = vmatprep.subr.msk.bf16.mxu0 %vm1049_vm5, %v981_v46  ;;  %v1199_v49 = vsel %vm1049_vm5, %v981_v46, 0  ;;  %v778_v50 = vld [vmem:[#allocation2] sm:$0x8]  ;;  %v816_v51 = vor.u32 %v814_v31, %v813_v37  ;;  %s4173_s7 = sshll.u32 %s4769_s30, 4 }
 0x2d9   : > { %4310 = vmatmul.mubr.msk.bf16.vlgmr.msra.gmra.mxu1 %vm1024_vm6, %v3965_v44  ;;  %4326 = vmatpush3.bf16.msra.mxu0 %v1199_v49  ;;  %vm802_vm7 = vsmask.f32 256  ;;  %vm803_vm8 = vsmask.f32 4368  ;;  %v806_v52 = vshrl.u32 %v778_v50, 16  ;;  %v818_v53 = vrot.slane %v813_v37, 4 }
 0x2da   : > { %4344 = vmatpush3.bf16.msra.mxu1 %v1568_v45  ;;  %vm5141_vm9 = vmor %vm802_vm7, %vm803_vm8  ;;  %v825_v55 = vor.u32 %v823_v33, %v822_v42  ;;  %v781_v56 = vld [vmem:[#allocation2 + $0x10] sm:$0x8]  ;;  %v838_v57 = vor.u32 %v836_v39, %v835_v47  ;;  %v840_v58 = vrot.slane %v835_v47, 4  ;;  %v847_v59 = vor.u32 %v845_v43, %v844_v48  ;;  %v785_v60 = vld [vmem:[#allocation2 + $0x24] sm:$0xf]  ;;  %s4144_s20 = sshll.u32 %s4773_s9, 5 }
 0x2db   : > { %v3955_v61 = vrot.slane %v806_v52, 11  ;;  %v828_v62 = vshrl.u32 %v781_v56, 16  ;;  %v786_v63 = vld [vmem:[#allocation2 + $0x28] sm:$0xf]  ;;  %v855_v0 = vshrl.u32 %v785_v60, 16  ;;  %v858_v5 = vshll.u32 %v785_v60, 16  ;;  %s3785_s22 = sadd.s32 %s4173_s7, %s4144_s20 }
 0x2dc   : > { %v826_v9 = vsel %vm5141_vm9, %v818_v53, %v825_v55  ;;  %v848_v10 = vsel %vm5141_vm9, %v840_v58, %v847_v59  ;;  %v864_v15 = vshrl.u32 %v786_v63, 16  ;;  %v867_v16 = vshll.u32 %v786_v63, 16  ;;  %v788_v21 = vld [vmem:[#allocation2 + $0x34] sm:$0xf]  ;;  %v789_v22 = vld [vmem:[#allocation2 + $0x38] sm:$0xf] }
 0x2dd   : > { %v817_v1 = vsel %vm5141_vm9, %v3955_v61, %v816_v51  ;;  %v3956_v26 = vrot.slane %v828_v62, 11  ;;  %v857_v25 = vrot.slane %v855_v0, 7  ;;  %v3966_v27 = vcombine.low %v785_v60, %v786_v63  ;;  %v784_v28 = vld [vmem:[#allocation2 + $0x20] sm:$0x8]  ;;  %v787_v33 = vld [vmem:[#allocation2 + $0x30] sm:$0x8] }
 0x2de   : > { %v3980_v29 = vcombine.low %v817_v1, %v826_v9  ;;  %v866_v30 = vrot.slane %v864_v15, 7  ;;  %v877_v31 = vshrl.u32 %v788_v21, 16  ;;  %v880_v32 = vshll.u32 %v788_v21, 16  ;;  %v791_v38 = vld [vmem:[#allocation2 + $0x44] sm:$0xf]  ;;  %s4145_s30 = sshll.u32 %s3785_s22, 7 }
 0x2df   : > { %v839_v34 = vsel %vm5141_vm9, %v3956_v26, %v838_v57  ;;  %4313 = vmatprep.mubr.msk.bf16.mxu1 %vm1024_vm6, %v3966_v27  ;;  %v886_v35 = vshrl.u32 %v789_v22, 16  ;;  %v889_v36 = vshll.u32 %v789_v22, 16  ;;  %v3967_v37 = vcombine.low %v788_v21, %v789_v22  ;;  %v792_v47 = vld [vmem:[#allocation2 + $0x48] sm:$0xf]  ;;  %v794_v57 = vld [vmem:[#allocation2 + $0x54] sm:$0xf] }
 0x2e0   : > { %4327 = vmatprep.mubr.msk.bf16.mxu0 %vm1024_vm6, %v3980_v29  ;;  %v3981_v39 = vcombine.low %v839_v34, %v848_v10  ;;  %v879_v40 = vrot.slane %v877_v31, 7  ;;  %v850_v41 = vshrl.u32 %v784_v28, 16  ;;  %v860_v42 = vor.u32 %v858_v5, %v857_v25  ;;  %v795_v58 = vld [vmem:[#allocation2 + $0x58] sm:$0xf]  ;;  %v790_v63 = vld [vmem:[#allocation2 + $0x40] sm:$0x8] }
 0x2e1   : > { %v888_v43 = vrot.slane %v886_v35, 7  ;;  %4314 = vmatmul.mubr.msk.bf16.gmra.mxu1 %vm1024_vm6, %v3967_v37  ;;  %v862_v44 = vrot.slane %v857_v25, 4  ;;  %v869_v45 = vor.u32 %v867_v16, %v866_v30  ;;  %v872_v46 = vshrl.u32 %v787_v33, 16  ;;  %v793_v15 = vld [vmem:[#allocation2 + $0x50] sm:$0x8]  ;;  %s3788_s9 = sshll.u32 %s5102_s14, 4  ;;  %s5915_s9 = int_to_ptr.vmem [resolvable:$true] %s3788_s9 }
 0x2e2   : > { %4328 = vmatmul.mubr.msk.bf16.vlgmr.msra.gmra.mxu0 %vm1024_vm6, %v3981_v39  ;;  %v3957_v48 = vrot.slane %v850_v41, 11  ;;  %v882_v49 = vor.u32 %v880_v32, %v879_v40  ;;  %v884_v50 = vrot.slane %v879_v40, 4  ;;  %v899_v51 = vshrl.u32 %v791_v38, 16  ;;  %v5168_v16 = vld [vmem:[%s5976_s4 + $0x6] sm:$0x3]  ;;  %s6110_s13 = sld [smem:[#allocation70_spill]] }
 0x2e3   : > { %v870_v52 = vsel %vm5141_vm9, %v862_v44, %v869_v45  ;;  %v3958_v53 = vrot.slane %v872_v46, 11  ;;  %v891_v55 = vor.u32 %v889_v36, %v888_v43  ;;  %v902_v56 = vshll.u32 %v791_v38, 16  ;;  %v797_v25 = vld [vmem:[#allocation2 + $0x64] sm:$0xf]  ;;  %4492 = vmatprep.subr.msk.bf16.mxu0 %vm1049_vm5, %v5168_v16  ;;  %v800_v44 = vld [vmem:[#allocation2 + $0x74] sm:$0xf] }
 0x2e4   : > { %v861_v59 = vsel %vm5141_vm9, %v3957_v48, %v860_v42  ;;  %v901_v60 = vrot.slane %v899_v51, 7  ;;  %v908_v61 = vshrl.u32 %v792_v47, 16  ;;  %v911_v62 = vshll.u32 %v792_v47, 16  ;;  %v5181_v45 = vld [vmem:[%s5976_s4 + $0x8] sm:$0x3]  ;;  %s3772_s23 = scalar_lea.sflag [#allocation8], %s4943_s19 }
 0x2e5   : > { %v3982_v0 = vcombine.low %v861_v59, %v870_v52  ;;  %v883_v5 = vsel %vm5141_vm9, %v3958_v53, %v882_v49  ;;  %v892_v9 = vsel %vm5141_vm9, %v884_v50, %v891_v55  ;;  %v3968_v10 = vcombine.low %v791_v38, %v792_v47  ;;  %v798_v38 = vld [vmem:[#allocation2 + $0x68] sm:$0xf]  ;;  %v801_v50 = vld [vmem:[#allocation2 + $0x78] sm:$0xf]  ;;  %4493 = vmatprep.subr.msk.bf16.mxu1 %vm1049_vm5, %v5181_v45  ;;  %s4685_s8 = scalar_lea.vmem %s5915_s9, 2048  ;;  %s4797_s10 = smov [#allocation9]  }
 0x2e6   : > { %v3983_v21 = vcombine.low %v883_v5, %v892_v9  ;;  %v910_v22 = vrot.slane %v908_v61, 7  ;;  %v921_v1 = vshrl.u32 %v794_v57, 16  ;;  %v924_v26 = vshll.u32 %v794_v57, 16  ;;  %v799_v61 = vld [vmem:[#allocation2 + $0x70] sm:$0x8]  ;;  %p4686_p8 = scmp.ne.s32.totalorder %s5915_s9, %s4685_s8  ;;  %s4689_s27 = sshll.u32 %s4797_s10, 4  ;;  %s4690_s27 = int_to_ptr.vmem [resolvable:$false] %s4689_s27 }
 0x2e7   : > { %4331 = vmatprep.mubr.msk.bf16.mxu0 %vm1024_vm6, %v3982_v0  ;;  %4317 = vmatprep.mubr.msk.bf16.mxu1 %vm1024_vm6, %v3968_v10  ;;  %v930_v27 = vshrl.u32 %v795_v58, 16  ;;  %v933_v28 = vshll.u32 %v795_v58, 16  ;;  %v3969_v29 = vcombine.low %v794_v57, %v795_v58  ;;  %v894_v30 = vshrl.u32 %v790_v63, 16  ;;  %s4691_s5 = scalar_lea.vmem %s4690_s27, 4096  ;;  %p4692_p4 = scmp.lt.s32.totalorder %s5915_s9, %s4690_s27 }
 0x2e8   : > { %v923_v31 = vrot.slane %v921_v1, 7  ;;  %v904_v32 = vor.u32 %v902_v56, %v901_v60  ;;  %v906_v33 = vrot.slane %v901_v60, 4  ;;  %v913_v34 = vor.u32 %v911_v62, %v910_v22  ;;  %v796_v56 = vld [vmem:[#allocation2 + $0x60] sm:$0x8]  ;;  %v1298_v22 = vld [vmem:[#allocation2 + $0x4] sm:$0xf]  ;;  %s5913_s18 = scalar_lea.hbm %s6110_s13, %s4145_s30  ;;  %p4687_p0 = pnand %p4686_p8, %p4910_p9 }
 0x2e9   : > { %v932_v35 = vrot.slane %v930_v27, 7  ;;  %4318 = vmatmul.mubr.msk.bf16.gmra.mxu1 %vm1024_vm6, %v3969_v29  ;;  %v3959_v36 = vrot.slane %v894_v30, 11  ;;  %v916_v37 = vshrl.u32 %v793_v15, 16  ;;  %v943_v39 = vshrl.u32 %v797_v25, 16  ;;  %p4693_p5 = scmp.lt.s32.totalorder %s4691_s5, %s4685_s8 }
 0x2ea   : > { %4332 = vmatmul.mubr.msk.bf16.gmra.mxu0 %vm1024_vm6, %v3983_v21  ;;  %v914_v40 = vsel %vm5141_vm9, %v906_v33, %v913_v34  ;;  %v926_v41 = vor.u32 %v924_v26, %v923_v31  ;;  %v928_v42 = vrot.slane %v923_v31, 4  ;;  %v946_v43 = vshll.u32 %v797_v25, 16  ;;  %p4688_p2 = pneg %p4687_p0 }
 0x2eb   : > { %v905_v46 = vsel %vm5141_vm9, %v3959_v36, %v904_v32  ;;  %v3960_v47 = vrot.slane %v916_v37, 11  ;;  %v935_v48 = vor.u32 %v933_v28, %v932_v35  ;;  %v945_v49 = vrot.slane %v943_v39, 7  ;;  %v1299_v28 = vld [vmem:[#allocation2 + $0x8] sm:$0xf]  ;;  %v1300_v35 = vld [vmem:[#allocation2 + $0xc] sm:$0x1]  ;;  %p4694_p3 = por %p4693_p5, %p4692_p4 }
 0x2ec   : > { %v3984_v51 = vcombine.low %v905_v46, %v914_v40  ;;  %v952_v52 = vshrl.u32 %v798_v38, 16  ;;  %v955_v53 = vshll.u32 %v798_v38, 16  ;;  %v3970_v55 = vcombine.low %v797_v25, %v798_v38  ;;  %v1301_v40 = vld [vmem:[#allocation2 + $0x14] sm:$0xf]  ;;  %v1302_v46 = vld [vmem:[#allocation2 + $0x18] sm:$0xf] }
 0x2ed   : > { %v927_v57 = vsel %vm5141_vm9, %v3960_v47, %v926_v41  ;;  %v936_v58 = vsel %vm5141_vm9, %v928_v42, %v935_v48  ;;  %v965_v59 = vshrl.u32 %v800_v44, 16  ;;  %v968_v60 = vshll.u32 %v800_v44, 16  ;;  %p4695_p6 = pnand %p4694_p3, %p4688_p2 }
 0x2ee   : > { %4335 = vmatprep.mubr.msk.bf16.mxu0 %vm1024_vm6, %v3984_v51  ;;  %v3985_v62 = vcombine.low %v927_v57, %v936_v58  ;;  %v954_v63 = vrot.slane %v952_v52, 7  ;;  %4321 = vmatprep.mubr.msk.bf16.mxu1 %vm1024_vm6, %v3970_v55  ;;  %v974_v0 = vshrl.u32 %v801_v50, 16  ;;  %v977_v5 = vshll.u32 %v801_v50, 16  ;;  %v1303_v51 = vld [vmem:[#allocation2 + $0x1c] sm:$0x1] }
 0x2ef   : > { %v967_v9 = vrot.slane %v965_v59, 7  ;;  %v3971_v10 = vcombine.low %v800_v44, %v801_v50  ;;  %v938_v15 = vshrl.u32 %v796_v56, 16  ;;  %v948_v21 = vor.u32 %v946_v43, %v945_v49 }
 0x2f0   : > { %v976_v1 = vrot.slane %v974_v0, 7  ;;  %v950_v26 = vrot.slane %v945_v49, 4  ;;  %v957_v25 = vor.u32 %v955_v53, %v954_v63  ;;  %v960_v27 = vshrl.u32 %v799_v61, 16  ;;  %v1683_v61 = vld [vmem:[#allocation2 + $0x10] sm:$0x8] }
 0x2f1   : > { %4322 = vmatmul.mubr.msk.bf16.gmra.mxu1 %vm1024_vm6, %v3971_v10  ;;  %v3961_v29 = vrot.slane %v938_v15, 11  ;;  %v970_v30 = vor.u32 %v968_v60, %v967_v9  ;;  %v972_v31 = vrot.slane %v967_v9, 4  ;;  %vm1322_vm10 = vsmask.f32 3328  ;;  %v5212_v10 = vld [vmem:[#allocation2 + $0x14] sm:$0xf] }
 0x2f2   : > { %4336 = vmatmul.mubr.msk.bf16.gmra.mxu0 %vm1024_vm6, %v3985_v62  ;;  %v958_v32 = vsel %vm5141_vm9, %v950_v26, %v957_v25  ;;  %v3962_v33 = vrot.slane %v960_v27, 11  ;;  %v979_v34 = vor.u32 %v977_v5, %v976_v1  ;;  %vm1323_vm11 = vsmask.f32 7440  ;;  %v5214_v1 = vld [vmem:[#allocation2 + $0x18] sm:$0xf] }
 0x2f3   : > { %v949_v36 = vsel %vm5141_vm9, %v3961_v29, %v948_v21  ;;  %v1326_v37 = vshrl.u32 %v1298_v22, 16  ;;  %v1329_v38 = vshll.u32 %v1298_v22, 16  ;;  %v1335_v39 = vshll.u32 %v1299_v28, 16  ;;  %vm5208_vm12 = vmor %vm1322_vm10, %vm1323_vm11 }
 0x2f4   : > { %v3986_v41 = vcombine.low %v949_v36, %v958_v32  ;;  %v971_v42 = vsel %vm5141_vm9, %v3962_v33, %v970_v30  ;;  %v980_v43 = vsel %vm5141_vm9, %v972_v31, %v979_v34  ;;  %v1339_v44 = vshrl.u32 %v1299_v28, 16  ;;  %v1686_v33 = vld [vmem:[#allocation2 + $0x20] sm:$0x8]  ;;  %v5222_v34 = vld [vmem:[#allocation2 + $0x24] sm:$0xf] }
 0x2f5   : > { %v3987_v47 = vcombine.low %v971_v42, %v980_v43  ;;  %v1328_v48 = vrot.slane %v1326_v37, 4  ;;  %v1331_v49 = vrot.slane %v1329_v38, 5  ;;  %v1337_v50 = vrot.slane %v1335_v39, 5 }
 0x2f6   : > { %4339 = vmatprep.mubr.msk.bf16.mxu0 %vm1024_vm6, %v3986_v41  ;;  %v1341_v52 = vrot.slane %v1339_v44, 4  ;;  %v1345_v53 = vshll.u32 %v1300_v35, 16  ;;  %v1934_v55 = vsel %vm1049_vm5, %v5168_v16, 0  ;;  %v1350_v56 = vshrl.u32 %v1301_v40, 16  ;;  %v5229_v44 = vld [vmem:[#allocation2 + $0x28] sm:$0xf] }
 0x2f7   : > { %v1332_v57 = vor.u32 %v1331_v49, %v1328_v48  ;;  %4362 = vmatpush3.bf16.msra.mxu0 %v1934_v55  ;;  %v1353_v58 = vshll.u32 %v1301_v40, 16  ;;  %v1359_v59 = vshll.u32 %v1302_v46, 16  ;;  %v1363_v60 = vshrl.u32 %v1302_v46, 16 }
 0x2f8   : > { %v1342_v63 = vor.u32 %v1341_v52, %v1337_v50  ;;  %v1347_v0 = vrot.slane %v1345_v53, 5  ;;  %v1352_v5 = vrot.slane %v1350_v56, 4  ;;  %v1369_v9 = vshll.u32 %v1303_v51, 16  ;;  %v1304_v52 = vld [vmem:[#allocation2 + $0x24] sm:$0xf] }
 0x2f9   : > { %v1333_v16 = vrot.slane %v1332_v57, 4  ;;  %v1355_v15 = vrot.slane %v1353_v58, 5  ;;  %v1361_v21 = vrot.slane %v1359_v59, 5  ;;  %v1365_v22 = vrot.slane %v1363_v60, 4  ;;  %v1305_v58 = vld [vmem:[#allocation2 + $0x28] sm:$0xf] }
 0x2fa   : > { %4340 = vmatmul.mubr.msk.bf16.gmra.mxu0 %vm1024_vm6, %v3987_v47  ;;  %v1343_v26 = vrot.slane %v1342_v63, 4  ;;  %v1371_v25 = vrot.slane %v1369_v9, 5  ;;  %v2116_v27 = vsel %vm1049_vm5, %v5181_v45, 0  ;;  %v1708_v28 = vshrl.u32 %v1683_v61, 16 }
 0x2fb   : > { %v1338_v29 = vsel %vm5208_vm12, %v1333_v16, %v1337_v50  ;;  %v1356_v30 = vor.u32 %v1355_v15, %v1352_v5  ;;  %v1366_v31 = vor.u32 %v1365_v22, %v1361_v21  ;;  %v1713_v32 = vshrl.u32 %v5212_v10, 16 }
 0x2fc   : > { %v1348_v35 = vsel %vm5208_vm12, %v1343_v26, %v1347_v0  ;;  %v4013_v36 = vrot.slane %v1708_v28, 11  ;;  %v1716_v37 = vshll.u32 %v5212_v10, 16  ;;  %v1722_v38 = vshrl.u32 %v5214_v1, 16  ;;  %v1306_v0 = vld [vmem:[#allocation2 + $0x2c] sm:$0x1] }
 0x2fd   : > { %v3997_v45 = vcombine.low %v1338_v29, %v1348_v35  ;;  %v1357_v39 = vrot.slane %v1356_v30, 4  ;;  %v1367_v40 = vrot.slane %v1366_v31, 4  ;;  %v1715_v41 = vrot.slane %v1713_v32, 7 }
 0x2fe   : > { %v1724_v42 = vrot.slane %v1722_v38, 7  ;;  %v1725_v43 = vshll.u32 %v5214_v1, 16  ;;  %v1730_v46 = vshrl.u32 %v1686_v33, 16  ;;  %v1735_v47 = vshrl.u32 %v5222_v34, 16  ;;  %v1308_v33 = vld [vmem:[#allocation2 + $0x38] sm:$0xf] }
 0x2ff   : > { %4345 = vmatprep.mubr.msk.bf16.mxu1 %vm1024_vm6, %v3997_v45  ;;  %v1362_v48 = vsel %vm5208_vm12, %v1357_v39, %v1361_v21  ;;  %v1372_v49 = vsel %vm5208_vm12, %v1367_v40, %v1371_v25  ;;  %v1718_v50 = vor.u32 %v1716_v37, %v1715_v41  ;;  %v1720_v51 = vrot.slane %v1715_v41, 4  ;;  %v1307_v21 = vld [vmem:[#allocation2 + $0x34] sm:$0xf]  ;;  %v1309_v38 = vld [vmem:[#allocation2 + $0x3c] sm:$0x1] }
 0x300   : > { %v3998_v53 = vcombine.low %v1362_v48, %v1372_v49  ;;  %v1727_v55 = vor.u32 %v1725_v43, %v1724_v42  ;;  %v4014_v56 = vrot.slane %v1730_v46, 11  ;;  %v1737_v57 = vrot.slane %v1735_v47, 7  ;;  %v1689_v42 = vld [vmem:[#allocation2 + $0x30] sm:$0x8]  ;;  %v5250_v49 = vld [vmem:[#allocation2 + $0x34] sm:$0xf] }
 0x301   : > { %v1719_v59 = vsel %vm5141_vm9, %v4013_v36, %v1718_v50  ;;  %v1738_v60 = vshll.u32 %v5222_v34, 16  ;;  %v1744_v61 = vshrl.u32 %v5229_v44, 16  ;;  %v1747_v63 = vshll.u32 %v5229_v44, 16 }
 0x302   : > { %4346 = vmatmul.mubr.msk.bf16.vlgmr.msra.gmra.mxu1 %vm1024_vm6, %v3998_v53  ;;  %v1728_v5 = vsel %vm5141_vm9, %v1720_v51, %v1727_v55  ;;  %v1742_v9 = vrot.slane %v1737_v57, 4  ;;  %v1374_v16 = vshrl.u32 %v1304_v52, 16  ;;  %v1377_v15 = vshll.u32 %v1304_v52, 16  ;;  %v5252_v55 = vld [vmem:[#allocation2 + $0x38] sm:$0xf] }
 0x303   : > { %4380 = vmatpush3.bf16.msra.mxu1 %v2116_v27  ;;  %v4022_v22 = vcombine.low %v1719_v59, %v1728_v5  ;;  %v1740_v26 = vor.u32 %v1738_v60, %v1737_v57  ;;  %v1746_v25 = vrot.slane %v1744_v61, 7  ;;  %v1383_v28 = vshll.u32 %v1305_v58, 16  ;;  %v1692_v60 = vld [vmem:[#allocation2 + $0x40] sm:$0x8] }
 0x304   : > { %v1376_v29 = vrot.slane %v1374_v16, 4  ;;  %v1379_v30 = vrot.slane %v1377_v15, 5  ;;  %v1387_v31 = vshrl.u32 %v1305_v58, 16  ;;  %v1393_v32 = vshll.u32 %v1306_v0, 16  ;;  %v5266_v16 = vld [vmem:[%s5976_s4 + $0xc] sm:$0x3] }
 0x305   : > { %4363 = vmatprep.mubr.msk.bf16.mxu0 %vm1024_vm6, %v4022_v22  ;;  %v1741_v35 = vsel %vm5141_vm9, %v4014_v56, %v1740_v26  ;;  %v1749_v36 = vor.u32 %v1747_v63, %v1746_v25  ;;  %v1385_v37 = vrot.slane %v1383_v28, 5  ;;  %v1398_v45 = vshrl.u32 %v1307_v21, 16  ;;  %4495 = vmatprep.subr.msk.bf16.mxu1 %vm1049_vm5, %v5266_v16 }
 0x306   : > { %v1380_v39 = vor.u32 %v1379_v30, %v1376_v29  ;;  %v1389_v27 = vrot.slane %v1387_v31, 4  ;;  %v1395_v40 = vrot.slane %v1393_v32, 5  ;;  %v1401_v41 = vshll.u32 %v1307_v21, 16  ;;  %v5276_v31 = vld [vmem:[#allocation2 + $0x44] sm:$0xf] }
 0x307   : > { %v1750_v43 = vsel %vm5141_vm9, %v1742_v9, %v1749_v36  ;;  %v1400_v46 = vrot.slane %v1398_v45, 4  ;;  %v1407_v47 = vshll.u32 %v1308_v33, 16  ;;  %v1411_v48 = vshrl.u32 %v1308_v33, 16  ;;  %v5261_v9 = vld [vmem:[%s5976_s4 + $0xa] sm:$0x3] }
 0x308   : > { %v4023_v50 = vcombine.low %v1741_v35, %v1750_v43  ;;  %v1381_v51 = vrot.slane %v1380_v39, 4  ;;  %v1390_v52 = vor.u32 %v1389_v27, %v1385_v37  ;;  %v1403_v53 = vrot.slane %v1401_v41, 5  ;;  %4494 = vmatprep.subr.msk.bf16.mxu0 %vm1049_vm5, %v5261_v9  ;;  %v5279_v36 = vld [vmem:[#allocation2 + $0x48] sm:$0xf] }
 0x309   : > { %v1409_v56 = vrot.slane %v1407_v47, 5  ;;  %v1413_v57 = vrot.slane %v1411_v48, 4  ;;  %v1417_v58 = vshll.u32 %v1309_v38, 16  ;;  %v1752_v59 = vshrl.u32 %v1689_v42, 16  ;;  %v1311_v47 = vld [vmem:[#allocation2 + $0x48] sm:$0xf] }
 0x30a   : > { %4364 = vmatmul.mubr.msk.bf16.vlgmr.msra.gmra.mxu0 %vm1024_vm6, %v4023_v50  ;;  %v1386_v61 = vsel %vm5208_vm12, %v1381_v51, %v1385_v37  ;;  %v1391_v63 = vrot.slane %v1390_v52, 4  ;;  %v1404_v0 = vor.u32 %v1403_v53, %v1400_v46  ;;  %v1757_v5 = vshrl.u32 %v5250_v49, 16 }
 0x30b   : > { %v1414_v15 = vor.u32 %v1413_v57, %v1409_v56  ;;  %v1419_v21 = vrot.slane %v1417_v58, 5  ;;  %v4015_v22 = vrot.slane %v1752_v59, 11  ;;  %v1760_v26 = vshll.u32 %v5250_v49, 16  ;;  %v1312_v57 = vld [vmem:[#allocation2 + $0x4c] sm:$0x1] }
 0x30c   : > { %v1396_v25 = vsel %vm5208_vm12, %v1391_v63, %v1395_v40  ;;  %v1405_v28 = vrot.slane %v1404_v0, 4  ;;  %v1759_v29 = vrot.slane %v1757_v5, 7  ;;  %v1766_v30 = vshrl.u32 %v5252_v55, 16  ;;  %v1310_v40 = vld [vmem:[#allocation2 + $0x44] sm:$0xf] }
 0x30d   : > { %v3999_v32 = vcombine.low %v1386_v61, %v1396_v25  ;;  %v1415_v33 = vrot.slane %v1414_v15, 4  ;;  %v1769_v35 = vshll.u32 %v5252_v55, 16  ;;  %v1774_v37 = vshrl.u32 %v1692_v60, 16  ;;  %v1313_v5 = vld [vmem:[#allocation2 + $0x54] sm:$0xf] }
 0x30e   : > { %v1410_v38 = vsel %vm5208_vm12, %v1405_v28, %v1409_v56  ;;  %v1762_v45 = vor.u32 %v1760_v26, %v1759_v29  ;;  %v1764_v39 = vrot.slane %v1759_v29, 4  ;;  %v1768_v27 = vrot.slane %v1766_v30, 7  ;;  %v1314_v25 = vld [vmem:[#allocation2 + $0x58] sm:$0xf] }
 0x30f   : > { %4349 = vmatprep.mubr.msk.bf16.mxu1 %vm1024_vm6, %v3999_v32  ;;  %v1420_v41 = vsel %vm5208_vm12, %v1415_v33, %v1419_v21  ;;  %v4016_v42 = vrot.slane %v1774_v37, 11  ;;  %v1779_v43 = vshrl.u32 %v5276_v31, 16  ;;  %v1782_v46 = vshll.u32 %v5276_v31, 16  ;;  %v1315_v37 = vld [vmem:[#allocation2 + $0x5c] sm:$0x1] }
 0x310   : > { %v4000_v48 = vcombine.low %v1410_v38, %v1420_v41  ;;  %v1763_v50 = vsel %vm5141_vm9, %v4015_v22, %v1762_v45  ;;  %v1771_v51 = vor.u32 %v1769_v35, %v1768_v27  ;;  %v1788_v52 = vshrl.u32 %v5279_v36, 16 }
 0x311   : > { %v1781_v53 = vrot.slane %v1779_v43, 7  ;;  %v1791_v56 = vshll.u32 %v5279_v36, 16  ;;  %v1422_v58 = vshrl.u32 %v1310_v40, 16  ;;  %v1425_v59 = vshll.u32 %v1310_v40, 16  ;;  %v1695_v43 = vld [vmem:[#allocation2 + $0x50] sm:$0x8] }
 0x312   : > { %4350 = vmatmul.mubr.msk.bf16.gmra.mxu1 %vm1024_vm6, %v4000_v48  ;;  %v1772_v60 = vsel %vm5141_vm9, %v1764_v39, %v1771_v51  ;;  %v1790_v61 = vrot.slane %v1788_v52, 7  ;;  %v1431_v63 = vshll.u32 %v1311_v47, 16  ;;  %v1435_v0 = vshrl.u32 %v1311_v47, 16 }
 0x313   : > { %v4024_v15 = vcombine.low %v1763_v50, %v1772_v60  ;;  %v1784_v21 = vor.u32 %v1782_v46, %v1781_v53  ;;  %v1786_v22 = vrot.slane %v1781_v53, 4  ;;  %v1424_v26 = vrot.slane %v1422_v58, 4  ;;  %v5300_v46 = vld [vmem:[#allocation2 + $0x54] sm:$0xf] }
 0x314   : > { %v1793_v28 = vor.u32 %v1791_v56, %v1790_v61  ;;  %v1427_v29 = vrot.slane %v1425_v59, 5  ;;  %v1433_v30 = vrot.slane %v1431_v63, 5  ;;  %v1437_v32 = vrot.slane %v1435_v0, 4  ;;  %v5303_v59 = vld [vmem:[#allocation2 + $0x58] sm:$0xf] }
 0x315   : > { %4367 = vmatprep.mubr.msk.bf16.mxu0 %vm1024_vm6, %v4024_v15  ;;  %v1785_v33 = vsel %vm5141_vm9, %v4016_v42, %v1784_v21  ;;  %v1441_v35 = vshll.u32 %v1312_v57, 16  ;;  %v1446_v38 = vshrl.u32 %v1313_v5, 16  ;;  %v1449_v45 = vshll.u32 %v1313_v5, 16  ;;  %v1698_v21 = vld [vmem:[#allocation2 + $0x60] sm:$0x8] }
 0x316   : > { %v1794_v39 = vsel %vm5141_vm9, %v1786_v22, %v1793_v28  ;;  %v1428_v27 = vor.u32 %v1427_v29, %v1424_v26  ;;  %v1438_v40 = vor.u32 %v1437_v32, %v1433_v30  ;;  %v1455_v41 = vshll.u32 %v1314_v25, 16  ;;  %v5311_v22 = vld [vmem:[#allocation2 + $0x64] sm:$0xf] }
 0x317   : > { %v4025_v47 = vcombine.low %v1785_v33, %v1794_v39  ;;  %v1443_v48 = vrot.slane %v1441_v35, 5  ;;  %v1448_v50 = vrot.slane %v1446_v38, 4  ;;  %v1451_v51 = vrot.slane %v1449_v45, 5 }
 0x318   : > { %v1429_v52 = vrot.slane %v1428_v27, 4  ;;  %v1439_v53 = vrot.slane %v1438_v40, 4  ;;  %v1457_v42 = vrot.slane %v1455_v41, 5  ;;  %v1459_v56 = vshrl.u32 %v1314_v25, 16  ;;  %v1316_v40 = vld [vmem:[#allocation2 + $0x64] sm:$0xf] }
 0x319   : > { %4368 = vmatmul.mubr.msk.bf16.gmra.mxu0 %vm1024_vm6, %v4025_v47  ;;  %v1452_v57 = vor.u32 %v1451_v51, %v1448_v50  ;;  %v1465_v58 = vshll.u32 %v1315_v37, 16  ;;  %v1796_v60 = vshrl.u32 %v1695_v43, 16  ;;  %v1801_v61 = vshrl.u32 %v5300_v46, 16 }
 0x31a   : > { %v1434_v63 = vsel %vm5208_vm12, %v1429_v52, %v1433_v30  ;;  %v1444_v0 = vsel %vm5208_vm12, %v1439_v53, %v1443_v48  ;;  %v1461_v5 = vrot.slane %v1459_v56, 4  ;;  %v1804_v15 = vshll.u32 %v5300_v46, 16  ;;  %v5315_v30 = vld [vmem:[#allocation2 + $0x68] sm:$0xf] }
 0x31b   : > { %v4001_v26 = vcombine.low %v1434_v63, %v1444_v0  ;;  %v1453_v25 = vrot.slane %v1452_v57, 4  ;;  %v1467_v28 = vrot.slane %v1465_v58, 5  ;;  %v4017_v29 = vrot.slane %v1796_v60, 11  ;;  %v1317_v56 = vld [vmem:[#allocation2 + $0x68] sm:$0xf] }
 0x31c   : > { %v1462_v32 = vor.u32 %v1461_v5, %v1457_v42  ;;  %v1803_v33 = vrot.slane %v1801_v61, 7  ;;  %v1810_v35 = vshrl.u32 %v5303_v59, 16  ;;  %v1813_v37 = vshll.u32 %v5303_v59, 16 }
 0x31d   : > { %4353 = vmatprep.mubr.msk.bf16.mxu1 %vm1024_vm6, %v4001_v26  ;;  %v1458_v38 = vsel %vm5208_vm12, %v1453_v25, %v1457_v42  ;;  %v1818_v45 = vshrl.u32 %v1698_v21, 16  ;;  %v1823_v39 = vshrl.u32 %v5311_v22, 16  ;;  %v1826_v27 = vshll.u32 %v5311_v22, 16  ;;  %v1319_v21 = vld [vmem:[#allocation2 + $0x74] sm:$0xf] }
 0x31e   : > { %v1463_v41 = vrot.slane %v1462_v32, 4  ;;  %v1806_v43 = vor.u32 %v1804_v15, %v1803_v33  ;;  %v1808_v47 = vrot.slane %v1803_v33, 4  ;;  %v1812_v48 = vrot.slane %v1810_v35, 7  ;;  %v1318_v15 = vld [vmem:[#allocation2 + $0x6c] sm:$0x1] }
 0x31f   : > { %v4018_v50 = vrot.slane %v1818_v45, 11  ;;  %v1825_v51 = vrot.slane %v1823_v39, 7  ;;  %v1832_v52 = vshrl.u32 %v5315_v30, 16  ;;  %v1835_v53 = vshll.u32 %v5315_v30, 16  ;;  %v1320_v35 = vld [vmem:[#allocation2 + $0x78] sm:$0xf] }
 0x320   : > { %v1468_v42 = vsel %vm5208_vm12, %v1463_v41, %v1467_v28  ;;  %v1807_v57 = vsel %vm5141_vm9, %v4017_v29, %v1806_v43  ;;  %v1815_v58 = vor.u32 %v1813_v37, %v1812_v48  ;;  %v1470_v60 = vshrl.u32 %v1316_v40, 16  ;;  %v1321_v45 = vld [vmem:[#allocation2 + $0x7c] sm:$0x1]  ;;  %v1701_v48 = vld [vmem:[#allocation2 + $0x70] sm:$0x8] }
 0x321   : > { %v4002_v61 = vcombine.low %v1458_v38, %v1468_v42  ;;  %v1828_v63 = vor.u32 %v1826_v27, %v1825_v51  ;;  %v1830_v0 = vrot.slane %v1825_v51, 4  ;;  %v1834_v5 = vrot.slane %v1832_v52, 7  ;;  %v5336_v42 = vld [vmem:[#allocation2 + $0x74] sm:$0xf] }
 0x322   : > { %v1816_v26 = vsel %vm5141_vm9, %v1808_v47, %v1815_v58  ;;  %v1472_v25 = vrot.slane %v1470_v60, 4  ;;  %v1473_v32 = vshll.u32 %v1316_v40, 16  ;;  %v1479_v33 = vshll.u32 %v1317_v56, 16 }
 0x323   : > { %4354 = vmatmul.mubr.msk.bf16.gmra.mxu1 %vm1024_vm6, %v4002_v61  ;;  %v4026_v28 = vcombine.low %v1807_v57, %v1816_v26  ;;  %v1829_v29 = vsel %vm5141_vm9, %v4018_v50, %v1828_v63  ;;  %v1837_v37 = vor.u32 %v1835_v53, %v1834_v5  ;;  %v1483_v38 = vshrl.u32 %v1317_v56, 16  ;;  %v5339_v26 = vld [vmem:[#allocation2 + $0x78] sm:$0xf] }
 0x324   : > { %v1475_v39 = vrot.slane %v1473_v32, 5  ;;  %v1481_v27 = vrot.slane %v1479_v33, 5  ;;  %v1489_v41 = vshll.u32 %v1318_v15, 16  ;;  %v1494_v43 = vshrl.u32 %v1319_v21, 16 }
 0x325   : > { %4371 = vmatprep.mubr.msk.bf16.mxu0 %vm1024_vm6, %v4026_v28  ;;  %v1838_v40 = vsel %vm5141_vm9, %v1830_v0, %v1837_v37  ;;  %v1485_v47 = vrot.slane %v1483_v38, 4  ;;  %v1497_v51 = vshll.u32 %v1319_v21, 16  ;;  %v1503_v52 = vshll.u32 %v1320_v35, 16 }
 0x326   : > { %v4027_v57 = vcombine.low %v1829_v29, %v1838_v40  ;;  %v1476_v50 = vor.u32 %v1475_v39, %v1472_v25  ;;  %v1491_v53 = vrot.slane %v1489_v41, 5  ;;  %v1496_v56 = vrot.slane %v1494_v43, 4  ;;  %v1704_v39 = vld [vmem:[#allocation2 + $0x80] sm:$0x8]  ;;  %v5348_v40 = vld [vmem:[#allocation2 + $0x84] sm:$0xf] }
 0x327   : > { %v1486_v58 = vor.u32 %v1485_v47, %v1481_v27  ;;  %v1499_v60 = vrot.slane %v1497_v51, 5  ;;  %v1505_v61 = vrot.slane %v1503_v52, 5  ;;  %v1507_v63 = vshrl.u32 %v1320_v35, 16  ;;  %v5350_v47 = vld [vmem:[#allocation2 + $0x88] sm:$0xf] }
 0x328   : > { %4372 = vmatmul.mubr.msk.bf16.gmra.mxu0 %vm1024_vm6, %v4027_v57  ;;  %v1477_v5 = vrot.slane %v1476_v50, 4  ;;  %v1513_v15 = vshll.u32 %v1321_v45, 16  ;;  %v1840_v0 = vshrl.u32 %v1701_v48, 16  ;;  %v1845_v21 = vshrl.u32 %v5336_v42, 16 }
 0x329   : > { %v1487_v32 = vrot.slane %v1486_v58, 4  ;;  %v1500_v33 = vor.u32 %v1499_v60, %v1496_v56  ;;  %v1509_v28 = vrot.slane %v1507_v63, 4  ;;  %v1848_v25 = vshll.u32 %v5336_v42, 16 }
 0x32a   : > { %v1482_v29 = vsel %vm5208_vm12, %v1477_v5, %v1481_v27  ;;  %v1515_v37 = vrot.slane %v1513_v15, 5  ;;  %v4019_v38 = vrot.slane %v1840_v0, 11  ;;  %v1847_v35 = vrot.slane %v1845_v21, 7 }
 0x32b   : > { %v1492_v45 = vsel %vm5208_vm12, %v1487_v32, %v1491_v53  ;;  %v1501_v41 = vrot.slane %v1500_v33, 4  ;;  %v1510_v43 = vor.u32 %v1509_v28, %v1505_v61  ;;  %v1854_v48 = vshrl.u32 %v5339_v26, 16  ;;  %v2231_v33 = vld [vmem:[#allocation2 + $0x14] sm:$0xf] }
 0x32c   : > { %v4003_v51 = vcombine.low %v1482_v29, %v1492_v45  ;;  %v1850_v52 = vor.u32 %v1848_v25, %v1847_v35  ;;  %v1852_v57 = vrot.slane %v1847_v35, 4  ;;  %v1857_v27 = vshll.u32 %v5339_v26, 16  ;;  %v2232_v35 = vld [vmem:[#allocation2 + $0x18] sm:$0xf] }
 0x32d   : > { %v1506_v50 = vsel %vm5208_vm12, %v1501_v41, %v1505_v61  ;;  %v1511_v56 = vrot.slane %v1510_v43, 4  ;;  %v1856_v58 = vrot.slane %v1854_v48, 7  ;;  %v1862_v60 = vshrl.u32 %v1704_v39, 16  ;;  %v5369_v39 = vld [vmem:[%s5976_s4 + $0xe] sm:$0x3] }
 0x32e   : > { %4357 = vmatprep.mubr.msk.bf16.mxu1 %vm1024_vm6, %v4003_v51  ;;  %v1851_v53 = vsel %vm5141_vm9, %v4019_v38, %v1850_v52  ;;  %v1867_v63 = vshrl.u32 %v5348_v40, 16  ;;  %v1870_v5 = vshll.u32 %v5348_v40, 16  ;;  %v1876_v15 = vshrl.u32 %v5350_v47, 16  ;;  %v2233_v48 = vld [vmem:[#allocation2 + $0x1c] sm:$0x1] }
 0x32f   : > { %v1516_v0 = vsel %vm5208_vm12, %v1511_v56, %v1515_v37  ;;  %v1859_v21 = vor.u32 %v1857_v27, %v1856_v58  ;;  %v4020_v32 = vrot.slane %v1862_v60, 11  ;;  %v1879_v61 = vshll.u32 %v5350_v47, 16  ;;  %v2235_v58 = vld [vmem:[#allocation2 + $0x28] sm:$0xf]  ;;  %v2236_v60 = vld [vmem:[#allocation2 + $0x2c] sm:$0x1] }
 0x330   : > { %v4004_v28 = vcombine.low %v1506_v50, %v1516_v0  ;;  %v1869_v25 = vrot.slane %v1867_v63, 7  ;;  %v1878_v29 = vrot.slane %v1876_v15, 7  ;;  %v4039_v38 = vcombine.low %v5212_v10, %v5214_v1  ;;  %v2234_v10 = vld [vmem:[#allocation2 + $0x24] sm:$0xf] }
 0x331   : > { %v1860_v37 = vsel %vm5141_vm9, %v1852_v57, %v1859_v21  ;;  %v2498_v45 = vsel %vm1049_vm5, %v5261_v9, 0  ;;  %v4040_v41 = vcombine.low %v5222_v34, %v5229_v44  ;;  %v2865_v43 = vsel %vm1049_vm5, %v5266_v16, 0 }
 0x332   : > { %4358 = vmatmul.mubr.msk.bf16.gmra.mxu1 %vm1024_vm6, %v4004_v28  ;;  %v4028_v1 = vcombine.low %v1851_v53, %v1860_v37  ;;  %v1872_v51 = vor.u32 %v1870_v5, %v1869_v25  ;;  %v1874_v52 = vrot.slane %v1869_v25, 4  ;;  %v1881_v27 = vor.u32 %v1879_v61, %v1878_v29  ;;  %4398 = vmatpush3.bf16.msra.mxu0 %v2498_v45 }
 0x333   : > { %4381 = vmatprep.mubr.msk.bf16.mxu1 %vm1024_vm6, %v4039_v38  ;;  %v2256_v57 = vshrl.u32 %v2231_v33, 16  ;;  %v2259_v50 = vshll.u32 %v2231_v33, 16  ;;  %v2265_v9 = vshll.u32 %v2232_v35, 16  ;;  %v2269_v56 = vshrl.u32 %v2232_v35, 16  ;;  %4496 = vmatprep.subr.msk.bf16.mxu0 %vm1049_vm5, %v5369_v39  ;;  %v2237_v35 = vld [vmem:[#allocation2 + $0x34] sm:$0xf] }
 0x334   : > { %4375 = vmatprep.mubr.msk.bf16.mxu0 %vm1024_vm6, %v4028_v1  ;;  %v1873_v34 = vsel %vm5141_vm9, %v4020_v32, %v1872_v51  ;;  %v1882_v44 = vsel %vm5141_vm9, %v1874_v52, %v1881_v27  ;;  %v2275_v16 = vshll.u32 %v2233_v48, 16  ;;  %v2280_v53 = vshrl.u32 %v2234_v10, 16  ;;  %v2238_v51 = vld [vmem:[#allocation2 + $0x38] sm:$0xf] }
 0x335   : > { %v4029_v63 = vcombine.low %v1873_v34, %v1882_v44  ;;  %v2258_v5 = vrot.slane %v2256_v57, 4  ;;  %v2261_v15 = vrot.slane %v2259_v50, 5  ;;  %v2267_v0 = vrot.slane %v2265_v9, 5  ;;  %v5396_v50 = vld [vmem:[%s5976_s4 + $0x10] sm:$0x3] }
 0x336   : > { %v2271_v21 = vrot.slane %v2269_v56, 4  ;;  %v2277_v61 = vrot.slane %v2275_v16, 5  ;;  %v2282_v33 = vrot.slane %v2280_v53, 4  ;;  %v2283_v28 = vshll.u32 %v2234_v10, 16 }
 0x337   : > { %4376 = vmatmul.mubr.msk.bf16.gmra.mxu0 %vm1024_vm6, %v4029_v63  ;;  %v2262_v25 = vor.u32 %v2261_v15, %v2258_v5  ;;  %v2289_v29 = vshll.u32 %v2235_v58, 16  ;;  %v2293_v32 = vshrl.u32 %v2235_v58, 16  ;;  %v2299_v38 = vshll.u32 %v2236_v60, 16  ;;  %v2240_v58 = vld [vmem:[#allocation2 + $0x44] sm:$0xf] }
 0x338   : > { %v2272_v37 = vor.u32 %v2271_v21, %v2267_v0  ;;  %v2285_v45 = vrot.slane %v2283_v28, 5  ;;  %v4041_v48 = vcombine.low %v5250_v49, %v5252_v55  ;;  %v4042_v1 = vcombine.low %v5276_v31, %v5279_v36  ;;  %v2239_v31 = vld [vmem:[#allocation2 + $0x3c] sm:$0x1]  ;;  %v2241_v5 = vld [vmem:[#allocation2 + $0x48] sm:$0xf] }
 0x339   : > { %v2263_v52 = vrot.slane %v2262_v25, 4  ;;  %v2291_v27 = vrot.slane %v2289_v29, 5  ;;  %v2295_v57 = vrot.slane %v2293_v32, 4  ;;  %v2301_v10 = vrot.slane %v2299_v38, 5  ;;  %v2242_v38 = vld [vmem:[#allocation2 + $0x4c] sm:$0x1] }
 0x33a   : > { %4382 = vmatmul.mubr.msk.bf16.vlgmr.msra.gmra.mxu1 %vm1024_vm6, %v4040_v41  ;;  %v2273_v9 = vrot.slane %v2272_v37, 4  ;;  %v2286_v56 = vor.u32 %v2285_v45, %v2282_v33  ;;  %v2304_v34 = vshrl.u32 %v2237_v35, 16  ;;  %v2307_v44 = vshll.u32 %v2237_v35, 16 }
 0x33b   : > { %4416 = vmatpush3.bf16.msra.mxu1 %v2865_v43  ;;  %v2268_v49 = vsel %vm5208_vm12, %v2263_v52, %v2267_v0  ;;  %v2296_v55 = vor.u32 %v2295_v57, %v2291_v27  ;;  %4385 = vmatprep.mubr.msk.bf16.mxu1 %vm1024_vm6, %v4041_v48  ;;  %v2313_v36 = vshll.u32 %v2238_v51, 16  ;;  %v2317_v16 = vshrl.u32 %v2238_v51, 16  ;;  %v2243_v57 = vld [vmem:[#allocation2 + $0x54] sm:$0xf] }
 0x33c   : > { %v2278_v60 = vsel %vm5208_vm12, %v2273_v9, %v2277_v61  ;;  %v2287_v53 = vrot.slane %v2286_v56, 4  ;;  %v2306_v41 = vrot.slane %v2304_v34, 4  ;;  %v2309_v63 = vrot.slane %v2307_v44, 5  ;;  %4497 = vmatprep.subr.msk.bf16.mxu1 %vm1049_vm5, %v5396_v50  ;;  %v2244_v44 = vld [vmem:[#allocation2 + $0x58] sm:$0xf] }
 0x33d   : > { %v4056_v43 = vcombine.low %v2268_v49, %v2278_v60  ;;  %v2297_v15 = vrot.slane %v2296_v55, 4  ;;  %v2315_v0 = vrot.slane %v2313_v36, 5  ;;  %v2319_v21 = vrot.slane %v2317_v16, 4  ;;  %v2245_v60 = vld [vmem:[#allocation2 + $0x5c] sm:$0x1] }
 0x33e   : > { %v2292_v33 = vsel %vm5208_vm12, %v2287_v53, %v2291_v27  ;;  %v2310_v28 = vor.u32 %v2309_v63, %v2306_v41  ;;  %v2323_v25 = vshll.u32 %v2239_v31, 16  ;;  %v2328_v29 = vshrl.u32 %v2240_v58, 16  ;;  %v2246_v41 = vld [vmem:[#allocation2 + $0x64] sm:$0xf] }
 0x33f   : > { %4399 = vmatprep.mubr.msk.bf16.mxu0 %vm1024_vm6, %v4056_v43  ;;  %v2302_v61 = vsel %vm5208_vm12, %v2297_v15, %v2301_v10  ;;  %v2320_v32 = vor.u32 %v2319_v21, %v2315_v0  ;;  %v2331_v35 = vshll.u32 %v2240_v58, 16  ;;  %v2337_v37 = vshll.u32 %v2241_v5, 16  ;;  %v2247_v21 = vld [vmem:[#allocation2 + $0x68] sm:$0xf] }
 0x340   : > { %v4057_v45 = vcombine.low %v2292_v33, %v2302_v61  ;;  %v2311_v48 = vrot.slane %v2310_v28, 4  ;;  %v2325_v51 = vrot.slane %v2323_v25, 5  ;;  %v2330_v52 = vrot.slane %v2328_v29, 4 }
 0x341   : > { %v2321_v9 = vrot.slane %v2320_v32, 4  ;;  %v2333_v56 = vrot.slane %v2331_v35, 5  ;;  %v2339_v27 = vrot.slane %v2337_v37, 5  ;;  %v2341_v34 = vshrl.u32 %v2241_v5, 16  ;;  %v2248_v32 = vld [vmem:[#allocation2 + $0x6c] sm:$0x1] }
 0x342   : > { %4400 = vmatmul.mubr.msk.bf16.vlgmr.msra.gmra.mxu0 %vm1024_vm6, %v4057_v45  ;;  %4386 = vmatmul.mubr.msk.bf16.gmra.mxu1 %vm1024_vm6, %v4042_v1  ;;  %v2316_v10 = vsel %vm5208_vm12, %v2311_v48, %v2315_v0  ;;  %v2347_v49 = vshll.u32 %v2242_v38, 16  ;;  %v4043_v55 = vcombine.low %v5300_v46, %v5303_v59  ;;  %v4044_v31 = vcombine.low %v5311_v22, %v5315_v30 }
 0x343   : > { %v2326_v36 = vsel %vm5208_vm12, %v2321_v9, %v2325_v51  ;;  %v2334_v16 = vor.u32 %v2333_v56, %v2330_v52  ;;  %v2343_v58 = vrot.slane %v2341_v34, 4  ;;  %v2352_v53 = vshrl.u32 %v2243_v57, 16  ;;  %v2249_v56 = vld [vmem:[#allocation2 + $0x74] sm:$0xf] }
 0x344   : > { %v4058_v63 = vcombine.low %v2316_v10, %v2326_v36  ;;  %v2349_v1 = vrot.slane %v2347_v49, 5  ;;  %4389 = vmatprep.mubr.msk.bf16.mxu1 %vm1024_vm6, %v4043_v55  ;;  %v2355_v5 = vshll.u32 %v2243_v57, 16  ;;  %v2361_v43 = vshll.u32 %v2244_v44, 16 }
 0x345   : > { %v2335_v15 = vrot.slane %v2334_v16, 4  ;;  %v2344_v0 = vor.u32 %v2343_v58, %v2339_v27  ;;  %v2354_v46 = vrot.slane %v2352_v53, 4  ;;  %v2365_v59 = vshrl.u32 %v2244_v44, 16  ;;  %v2250_v58 = vld [vmem:[#allocation2 + $0x78] sm:$0xf] }
 0x346   : > { %4403 = vmatprep.mubr.msk.bf16.mxu0 %vm1024_vm6, %v4058_v63  ;;  %v2357_v22 = vrot.slane %v2355_v5, 5  ;;  %v2363_v30 = vrot.slane %v2361_v43, 5  ;;  %v2371_v33 = vshll.u32 %v2245_v60, 16  ;;  %v2376_v28 = vshrl.u32 %v2246_v41, 16 }
 0x347   : > { %v2340_v25 = vsel %vm5208_vm12, %v2335_v15, %v2339_v27  ;;  %v2345_v29 = vrot.slane %v2344_v0, 4  ;;  %v2367_v61 = vrot.slane %v2365_v59, 4  ;;  %v2379_v38 = vshll.u32 %v2246_v41, 16 }
 0x348   : > { %v2358_v35 = vor.u32 %v2357_v22, %v2354_v46  ;;  %v2373_v37 = vrot.slane %v2371_v33, 5  ;;  %v2378_v45 = vrot.slane %v2376_v28, 4  ;;  %v2385_v48 = vshll.u32 %v2247_v21, 16 }
 0x349   : > { %v2350_v51 = vsel %vm5208_vm12, %v2345_v29, %v2349_v1  ;;  %v2368_v52 = vor.u32 %v2367_v61, %v2363_v30  ;;  %v2381_v57 = vrot.slane %v2379_v38, 5  ;;  %v2389_v9 = vshrl.u32 %v2247_v21, 16  ;;  %v2253_v21 = vld [vmem:[#allocation2 + $0x88] sm:$0xf] }
 0x34a   : > { %v4059_v34 = vcombine.low %v2340_v25, %v2350_v51  ;;  %4390 = vmatmul.mubr.msk.bf16.gmra.mxu1 %vm1024_vm6, %v4044_v31  ;;  %v2359_v44 = vrot.slane %v2358_v35, 4  ;;  %v2387_v27 = vrot.slane %v2385_v48, 5  ;;  %v2395_v10 = vshll.u32 %v2248_v32, 16  ;;  %v2251_v31 = vld [vmem:[#allocation2 + $0x7c] sm:$0x1] }
 0x34b   : > { %v2369_v49 = vrot.slane %v2368_v52, 4  ;;  %v2382_v55 = vor.u32 %v2381_v57, %v2378_v45  ;;  %v2391_v36 = vrot.slane %v2389_v9, 4  ;;  %v4045_v16 = vcombine.low %v5336_v42, %v5339_v26  ;;  %v2252_v26 = vld [vmem:[#allocation2 + $0x84] sm:$0xf]  ;;  %v2254_v25 = vld [vmem:[#allocation2 + $0x8c] sm:$0x1] }
 0x34c   : > { %4404 = vmatmul.mubr.msk.bf16.gmra.mxu0 %vm1024_vm6, %v4059_v34  ;;  %v2364_v60 = vsel %vm5208_vm12, %v2359_v44, %v2363_v30  ;;  %v2397_v53 = vrot.slane %v2395_v10, 5  ;;  %v4046_v41 = vcombine.low %v5348_v40, %v5350_v47  ;;  %v2400_v63 = vshrl.u32 %v2249_v56, 16  ;;  %v2614_v45 = vld [vmem:[#allocation2 + $0x20] sm:$0x8]  ;;  %v5443_v48 = vld [vmem:[#allocation2 + $0x24] sm:$0xf] }
 0x34d   : > { %v2374_v1 = vsel %vm5208_vm12, %v2369_v49, %v2373_v37  ;;  %v2383_v5 = vrot.slane %v2382_v55, 4  ;;  %v2392_v43 = vor.u32 %v2391_v36, %v2387_v27  ;;  %4393 = vmatprep.mubr.msk.bf16.mxu1 %vm1024_vm6, %v4045_v16  ;;  %v2403_v42 = vshll.u32 %v2249_v56, 16  ;;  %v2616_v55 = vld [vmem:[#allocation2 + $0x28] sm:$0xf] }
 0x34e   : > { %v4060_v15 = vcombine.low %v2364_v60, %v2374_v1  ;;  %v2402_v0 = vrot.slane %v2400_v63, 4  ;;  %v2409_v46 = vshll.u32 %v2250_v58, 16  ;;  %v2413_v59 = vshrl.u32 %v2250_v58, 16 }
 0x34f   : > { %v2388_v22 = vsel %vm5208_vm12, %v2383_v5, %v2387_v27  ;;  %v2393_v40 = vrot.slane %v2392_v43, 4  ;;  %v2405_v47 = vrot.slane %v2403_v42, 5  ;;  %v2419_v30 = vshll.u32 %v2251_v31, 16  ;;  %v2617_v31 = vld [vmem:[#allocation2 + $0x30] sm:$0x8] }
 0x350   : > { %4407 = vmatprep.mubr.msk.bf16.mxu0 %vm1024_vm6, %v4060_v15  ;;  %v2411_v33 = vrot.slane %v2409_v46, 5  ;;  %v2415_v28 = vrot.slane %v2413_v59, 4  ;;  %v2424_v29 = vshrl.u32 %v2252_v26, 16  ;;  %v2427_v61 = vshll.u32 %v2252_v26, 16  ;;  %v5453_v42 = vld [vmem:[#allocation2 + $0x34] sm:$0xf] }
 0x351   : > { %v2398_v32 = vsel %vm5208_vm12, %v2393_v40, %v2397_v53  ;;  %v2406_v38 = vor.u32 %v2405_v47, %v2402_v0  ;;  %v2421_v35 = vrot.slane %v2419_v30, 5  ;;  %v2433_v37 = vshll.u32 %v2253_v21, 16  ;;  %v5455_v59 = vld [vmem:[#allocation2 + $0x38] sm:$0xf] }
 0x352   : > { %v4061_v51 = vcombine.low %v2388_v22, %v2398_v32  ;;  %4394 = vmatmul.mubr.msk.bf16.gmra.mxu1 %vm1024_vm6, %v4046_v41  ;;  %v2416_v52 = vor.u32 %v2415_v28, %v2411_v33  ;;  %v2426_v57 = vrot.slane %v2424_v29, 4  ;;  %v2429_v9 = vrot.slane %v2427_v61, 5 }
 0x353   : > { %v2407_v56 = vrot.slane %v2406_v38, 4  ;;  %v2435_v34 = vrot.slane %v2433_v37, 5  ;;  %v2437_v44 = vshrl.u32 %v2253_v21, 16  ;;  %v2443_v27 = vshll.u32 %v2254_v25, 16 }
 0x354   : > { %4408 = vmatmul.mubr.msk.bf16.gmra.mxu0 %vm1024_vm6, %v4061_v51  ;;  %v2417_v10 = vrot.slane %v2416_v52, 4  ;;  %v2430_v49 = vor.u32 %v2429_v9, %v2426_v57  ;;  %v2639_v36 = vshrl.u32 %v2614_v45, 16  ;;  %v2644_v16 = vshrl.u32 %v5443_v48, 16  ;;  %v2620_v51 = vld [vmem:[#allocation2 + $0x40] sm:$0x8] }
 0x355   : > { %v2412_v58 = vsel %vm5208_vm12, %v2407_v56, %v2411_v33  ;;  %v2439_v60 = vrot.slane %v2437_v44, 4  ;;  %v2445_v53 = vrot.slane %v2443_v27, 5  ;;  %v2647_v41 = vshll.u32 %v5443_v48, 16  ;;  %v2621_v52 = vld [vmem:[#allocation2 + $0x44] sm:$0xf] }
 0x356   : > { %v2422_v63 = vsel %vm5208_vm12, %v2417_v10, %v2421_v35  ;;  %v2431_v1 = vrot.slane %v2430_v49, 4  ;;  %v4072_v5 = vrot.slane %v2639_v36, 11  ;;  %v2646_v43 = vrot.slane %v2644_v16, 7  ;;  %v2622_v44 = vld [vmem:[#allocation2 + $0x48] sm:$0xf] }
 0x357   : > { %v4062_v26 = vcombine.low %v2412_v58, %v2422_v63  ;;  %v2440_v15 = vor.u32 %v2439_v60, %v2435_v34  ;;  %v2653_v0 = vshrl.u32 %v2616_v55, 16  ;;  %v2656_v46 = vshll.u32 %v2616_v55, 16  ;;  %v2623_v16 = vld [vmem:[#allocation2 + $0x50] sm:$0x8] }
 0x358   : > { %v2436_v21 = vsel %vm5208_vm12, %v2431_v1, %v2435_v34  ;;  %v2649_v22 = vor.u32 %v2647_v41, %v2646_v43  ;;  %v2651_v40 = vrot.slane %v2646_v43, 4  ;;  %v3047_v47 = vsel %vm1049_vm5, %v5369_v39, 0  ;;  %v5483_v1 = vld [vmem:[#allocation2 + $0x58] sm:$0xf] }
 0x359   : > { %4411 = vmatprep.mubr.msk.bf16.mxu0 %vm1024_vm6, %v4062_v26  ;;  %v2441_v30 = vrot.slane %v2440_v15, 4  ;;  %v2655_v33 = vrot.slane %v2653_v0, 7  ;;  %4434 = vmatpush3.bf16.msra.mxu0 %v3047_v47  ;;  %v2661_v28 = vshrl.u32 %v2617_v31, 16  ;;  %v2666_v25 = vshrl.u32 %v5453_v42, 16  ;;  %v5478_v31 = vld [vmem:[#allocation2 + $0x54] sm:$0xf] }
 0x35a   : > { %v2650_v29 = vsel %vm5141_vm9, %v4072_v5, %v2649_v22  ;;  %v2669_v61 = vshll.u32 %v5453_v42, 16  ;;  %v2675_v32 = vshrl.u32 %v5455_v59, 16  ;;  %v2678_v38 = vshll.u32 %v5455_v59, 16 }
 0x35b   : > { %v2446_v39 = vsel %vm5208_vm12, %v2441_v30, %v2445_v53  ;;  %v2658_v35 = vor.u32 %v2656_v46, %v2655_v33  ;;  %v4073_v37 = vrot.slane %v2661_v28, 11  ;;  %v2668_v45 = vrot.slane %v2666_v25, 7  ;;  %v5491_v33 = vld [vmem:[#allocation2 + $0x64] sm:$0xf] }
 0x35c   : > { %v4063_v57 = vcombine.low %v2436_v21, %v2446_v39  ;;  %v2677_v9 = vrot.slane %v2675_v32, 7  ;;  %v3429_v56 = vsel %vm1049_vm5, %v5396_v50, 0  ;;  %v4098_v34 = vcombine.low %v5443_v48, %v2616_v55  ;;  %v2626_v21 = vld [vmem:[#allocation2 + $0x60] sm:$0x8] }
 0x35d   : > { %v2659_v27 = vsel %vm5141_vm9, %v2651_v40, %v2658_v35  ;;  %v2671_v10 = vor.u32 %v2669_v61, %v2668_v45  ;;  %v2673_v49 = vrot.slane %v2668_v45, 4  ;;  %v4099_v36 = vcombine.low %v5453_v42, %v5455_v59  ;;  %v2628_v35 = vld [vmem:[#allocation2 + $0x68] sm:$0xf] }
 0x35e   : > { %4412 = vmatmul.mubr.msk.bf16.gmra.mxu0 %vm1024_vm6, %v4063_v57  ;;  %v4081_v58 = vcombine.low %v2650_v29, %v2659_v27  ;;  %v2680_v60 = vor.u32 %v2678_v38, %v2677_v9  ;;  %v2683_v53 = vshrl.u32 %v2620_v51, 16  ;;  %v2688_v41 = vshrl.u32 %v2621_v52, 16  ;;  %v5502_v27 = vld [vmem:[#allocation2 + $0x74] sm:$0xf] }
 0x35f   : > { %v2672_v50 = vsel %vm5141_vm9, %v4073_v37, %v2671_v10  ;;  %4435 = vmatprep.mubr.msk.bf16.mxu0 %vm1024_vm6, %v4098_v34  ;;  %v2691_v48 = vshll.u32 %v2621_v52, 16  ;;  %v2697_v55 = vshrl.u32 %v2622_v44, 16  ;;  %v2700_v63 = vshll.u32 %v2622_v44, 16  ;;  %v2629_v34 = vld [vmem:[#allocation2 + $0x70] sm:$0x8] }
 0x360   : > { %4417 = vmatprep.mubr.msk.bf16.mxu1 %vm1024_vm6, %v4081_v58  ;;  %v2681_v5 = vsel %vm5141_vm9, %v2673_v49, %v2680_v60  ;;  %v4074_v43 = vrot.slane %v2683_v53, 11  ;;  %v2690_v42 = vrot.slane %v2688_v41, 7  ;;  %v2705_v26 = vshrl.u32 %v2623_v16, 16  ;;  %v5509_v53 = vld [vmem:[#allocation2 + $0x78] sm:$0xf] }
 0x361   : > { %v4082_v15 = vcombine.low %v2672_v50, %v2681_v5  ;;  %v2699_v0 = vrot.slane %v2697_v55, 7  ;;  %v2710_v46 = vshrl.u32 %v5478_v31, 16  ;;  %v2713_v59 = vshll.u32 %v5478_v31, 16  ;;  %v2632_v5 = vld [vmem:[#allocation2 + $0x80] sm:$0x8] }
 0x362   : > { %v2693_v22 = vor.u32 %v2691_v48, %v2690_v42  ;;  %v2695_v40 = vrot.slane %v2690_v42, 4  ;;  %v4075_v47 = vrot.slane %v2705_v26, 11  ;;  %v2719_v30 = vshrl.u32 %v5483_v1, 16 }
 0x363   : > { %4418 = vmatmul.mubr.msk.bf16.vlgmr.msra.gmra.mxu1 %vm1024_vm6, %v4082_v15  ;;  %v2702_v28 = vor.u32 %v2700_v63, %v2699_v0  ;;  %v2712_v25 = vrot.slane %v2710_v46, 7  ;;  %v2722_v29 = vshll.u32 %v5483_v1, 16  ;;  %v4100_v61 = vcombine.low %v2621_v52, %v2622_v44  ;;  %v5520_v46 = vld [vmem:[#allocation2 + $0x88] sm:$0xf] }
 0x364   : > { %4452 = vmatpush3.bf16.msra.mxu1 %v3429_v56  ;;  %v2694_v32 = vsel %vm5141_vm9, %v4074_v43, %v2693_v22  ;;  %v2721_v38 = vrot.slane %v2719_v30, 7  ;;  %v4101_v39 = vcombine.low %v5478_v31, %v5483_v1  ;;  %v2727_v37 = vshrl.u32 %v2626_v21, 16  ;;  %v5516_v43 = vld [vmem:[#allocation2 + $0x84] sm:$0xf] }
 0x365   : > { %v2703_v45 = vsel %vm5141_vm9, %v2695_v40, %v2702_v28  ;;  %v2715_v51 = vor.u32 %v2713_v59, %v2712_v25  ;;  %v2717_v57 = vrot.slane %v2712_v25, 4  ;;  %v2732_v9 = vshrl.u32 %v5491_v33, 16 }
 0x366   : > { %4436 = vmatmul.mubr.msk.bf16.vlgmr.msra.gmra.mxu0 %vm1024_vm6, %v4099_v36  ;;  %v4083_v52 = vcombine.low %v2694_v32, %v2703_v45  ;;  %v2724_v56 = vor.u32 %v2722_v29, %v2721_v38  ;;  %v4076_v44 = vrot.slane %v2727_v37, 11  ;;  %v2735_v10 = vshll.u32 %v5491_v33, 16 }
 0x367   : > { %v2716_v49 = vsel %vm5141_vm9, %v4075_v47, %v2715_v51  ;;  %4439 = vmatprep.mubr.msk.bf16.mxu0 %vm1024_vm6, %v4100_v61  ;;  %v2734_v16 = vrot.slane %v2732_v9, 7  ;;  %v2741_v58 = vshrl.u32 %v2628_v35, 16  ;;  %v2744_v60 = vshll.u32 %v2628_v35, 16  ;;  %v2635_v47 = vld [vmem:[#allocation2 + $0x90] sm:$0x8] }
 0x368   : > { %4421 = vmatprep.mubr.msk.bf16.mxu1 %vm1024_vm6, %v4083_v52  ;;  %v2725_v36 = vsel %vm5141_vm9, %v2717_v57, %v2724_v56  ;;  %v2749_v41 = vshrl.u32 %v2629_v34, 16  ;;  %v2754_v31 = vshrl.u32 %v5502_v27, 16  ;;  %v2757_v50 = vshll.u32 %v5502_v27, 16  ;;  %v5528_v61 = vld [vmem:[#allocation2 + $0x94] sm:$0xf] }
 0x369   : > { %v4084_v48 = vcombine.low %v2716_v49, %v2725_v36  ;;  %v2737_v55 = vor.u32 %v2735_v10, %v2734_v16  ;;  %v2739_v63 = vrot.slane %v2734_v16, 4  ;;  %v2743_v1 = vrot.slane %v2741_v58, 7  ;;  %v3162_v36 = vld [vmem:[#allocation2 + $0x24] sm:$0xf] }
 0x36a   : > { %v4077_v42 = vrot.slane %v2749_v41, 11  ;;  %v2756_v26 = vrot.slane %v2754_v31, 7  ;;  %v2763_v15 = vshrl.u32 %v5509_v53, 16  ;;  %v2766_v0 = vshll.u32 %v5509_v53, 16 }
 0x36b   : > { %4422 = vmatmul.mubr.msk.bf16.gmra.mxu1 %vm1024_vm6, %v4084_v48  ;;  %v2738_v59 = vsel %vm5141_vm9, %v4076_v44, %v2737_v55  ;;  %v2746_v21 = vor.u32 %v2744_v60, %v2743_v1  ;;  %v4102_v22 = vcombine.low %v5491_v33, %v2628_v35  ;;  %v4103_v40 = vcombine.low %v5502_v27, %v5509_v53  ;;  %v5535_v33 = vld [vmem:[#allocation2 + $0x98] sm:$0xf]  ;;  %v3163_v55 = vld [vmem:[#allocation2 + $0x28] sm:$0xf] }
 0x36c   : > { %v2759_v30 = vor.u32 %v2757_v50, %v2756_v26  ;;  %v2761_v28 = vrot.slane %v2756_v26, 4  ;;  %v2765_v25 = vrot.slane %v2763_v15, 7  ;;  %v2771_v29 = vshrl.u32 %v2632_v5, 16  ;;  %v3164_v26 = vld [vmem:[#allocation2 + $0x2c] sm:$0x1] }
 0x36d   : > { %v2747_v32 = vsel %vm5141_vm9, %v2739_v63, %v2746_v21  ;;  %v2776_v38 = vshrl.u32 %v5516_v43, 16  ;;  %v2779_v37 = vshll.u32 %v5516_v43, 16  ;;  %v2785_v45 = vshrl.u32 %v5520_v46, 16  ;;  %v3165_v15 = vld [vmem:[#allocation2 + $0x34] sm:$0xf] }
 0x36e   : > { %4440 = vmatmul.mubr.msk.bf16.gmra.mxu0 %vm1024_vm6, %v4101_v39  ;;  %v4085_v35 = vcombine.low %v2738_v59, %v2747_v32  ;;  %v2760_v51 = vsel %vm5141_vm9, %v4077_v42, %v2759_v30  ;;  %v2768_v57 = vor.u32 %v2766_v0, %v2765_v25  ;;  %v4078_v9 = vrot.slane %v2771_v29, 11  ;;  %v3167_v32 = vld [vmem:[#allocation2 + $0x3c] sm:$0x1] }
 0x36f   : > { %4443 = vmatprep.mubr.msk.bf16.mxu0 %vm1024_vm6, %v4102_v22  ;;  %v2778_v34 = vrot.slane %v2776_v38, 7  ;;  %v2787_v27 = vrot.slane %v2785_v45, 7  ;;  %v2788_v52 = vshll.u32 %v5520_v46, 16  ;;  %v2793_v56 = vshrl.u32 %v2635_v47, 16 }
 0x370   : > { %4425 = vmatprep.mubr.msk.bf16.mxu1 %vm1024_vm6, %v4085_v35  ;;  %v2769_v44 = vsel %vm5141_vm9, %v2761_v28, %v2768_v57  ;;  %v2798_v39 = vshrl.u32 %v5528_v61, 16  ;;  %v2801_v10 = vshll.u32 %v5528_v61, 16  ;;  %v2807_v49 = vshrl.u32 %v5535_v33, 16 }
 0x371   : > { %v4086_v16 = vcombine.low %v2760_v51, %v2769_v44  ;;  %v2781_v58 = vor.u32 %v2779_v37, %v2778_v34  ;;  %v2783_v60 = vrot.slane %v2778_v34, 4  ;;  %v2790_v53 = vor.u32 %v2788_v52, %v2787_v27  ;;  %v3168_v51 = vld [vmem:[#allocation2 + $0x44] sm:$0xf] }
 0x372   : > { %v4079_v41 = vrot.slane %v2793_v56, 11  ;;  %v2800_v31 = vrot.slane %v2798_v39, 7  ;;  %v2809_v50 = vrot.slane %v2807_v49, 7  ;;  %v2810_v48 = vshll.u32 %v5535_v33, 16 }
 0x373   : > { %4426 = vmatmul.mubr.msk.bf16.gmra.mxu1 %vm1024_vm6, %v4086_v16  ;;  %v2782_v63 = vsel %vm5141_vm9, %v4078_v9, %v2781_v58  ;;  %v2791_v1 = vsel %vm5141_vm9, %v2783_v60, %v2790_v53  ;;  %v4104_v5 = vcombine.low %v5516_v43, %v5520_v46  ;;  %v4105_v42 = vcombine.low %v5528_v61, %v5535_v33  ;;  %v3166_v61 = vld [vmem:[#allocation2 + $0x38] sm:$0xf] }
 0x374   : > { %v4087_v0 = vcombine.low %v2782_v63, %v2791_v1  ;;  %v2803_v59 = vor.u32 %v2801_v10, %v2800_v31  ;;  %v2805_v21 = vrot.slane %v2800_v31, 4  ;;  %v2812_v22 = vor.u32 %v2810_v48, %v2809_v50  ;;  %v3169_v10 = vld [vmem:[#allocation2 + $0x48] sm:$0xf] }
 0x375   : > { %v3187_v47 = vshrl.u32 %v3162_v36, 16  ;;  %v3190_v30 = vshll.u32 %v3162_v36, 16  ;;  %v3196_v28 = vshll.u32 %v3163_v55, 16  ;;  %v3200_v25 = vshrl.u32 %v3163_v55, 16 }
 0x376   : > { %4444 = vmatmul.mubr.msk.bf16.gmra.mxu0 %vm1024_vm6, %v4103_v40  ;;  %4429 = vmatprep.mubr.msk.bf16.mxu1 %vm1024_vm6, %v4087_v0  ;;  %v2804_v43 = vsel %vm5141_vm9, %v4079_v41, %v2803_v59  ;;  %v2813_v46 = vsel %vm5141_vm9, %v2805_v21, %v2812_v22  ;;  %v3206_v29 = vshll.u32 %v3164_v26, 16  ;;  %v3211_v38 = vshrl.u32 %v3165_v15, 16  ;;  %v3170_v41 = vld [vmem:[#allocation2 + $0x4c] sm:$0x1] }
 0x377   : > { %v4088_v37 = vcombine.low %v2804_v43, %v2813_v46  ;;  %4447 = vmatprep.mubr.msk.bf16.mxu0 %vm1024_vm6, %v4104_v5  ;;  %v3189_v45 = vrot.slane %v3187_v47, 4  ;;  %v3192_v33 = vrot.slane %v3190_v30, 5  ;;  %v3198_v35 = vrot.slane %v3196_v28, 5  ;;  %v3172_v47 = vld [vmem:[#allocation2 + $0x58] sm:$0xf] }
 0x378   : > { %v3202_v40 = vrot.slane %v3200_v25, 4  ;;  %v3208_v57 = vrot.slane %v3206_v29, 5  ;;  %v3213_v9 = vrot.slane %v3211_v38, 4  ;;  %v3214_v34 = vshll.u32 %v3165_v15, 16  ;;  %v3171_v15 = vld [vmem:[#allocation2 + $0x54] sm:$0xf] }
 0x379   : > { %v3193_v27 = vor.u32 %v3192_v33, %v3189_v45  ;;  %v3220_v52 = vshll.u32 %v3166_v61, 16  ;;  %v3224_v56 = vshrl.u32 %v3166_v61, 16  ;;  %v3230_v54 = vshll.u32 %v3167_v32, 16  ;;  %v3173_v32 = vld [vmem:[#allocation2 + $0x5c] sm:$0x1] }
 0x37a   : > { %v3203_v44 = vor.u32 %v3202_v40, %v3198_v35  ;;  %v3216_v39 = vrot.slane %v3214_v34, 5  ;;  %v3235_v49 = vshrl.u32 %v3168_v51, 16  ;;  %v3238_v16 = vshll.u32 %v3168_v51, 16  ;;  %v3175_v51 = vld [vmem:[#allocation2 + $0x68] sm:$0xf] }
 0x37b   : > { %4430 = vmatmul.mubr.msk.bf16.gmra.mxu1 %vm1024_vm6, %v4088_v37  ;;  %v3194_v58 = vrot.slane %v3193_v27, 4  ;;  %v3222_v60 = vrot.slane %v3220_v52, 5  ;;  %v3226_v53 = vrot.slane %v3224_v56, 4  ;;  %v3232_v36 = vrot.slane %v3230_v54, 5 }
 0x37c   : > { %v3204_v31 = vrot.slane %v3203_v44, 4  ;;  %v3217_v50 = vor.u32 %v3216_v39, %v3213_v9  ;;  %v3237_v48 = vrot.slane %v3235_v49, 4  ;;  %v3240_v55 = vrot.slane %v3238_v16, 5  ;;  %v3176_v39 = vld [vmem:[#allocation2 + $0x6c] sm:$0x1] }
 0x37d   : > { %v3199_v63 = vsel %vm5208_vm12, %v3194_v58, %v3198_v35  ;;  %v3227_v1 = vor.u32 %v3226_v53, %v3222_v60  ;;  %v3244_v5 = vshll.u32 %v3169_v10, 16  ;;  %v3248_v26 = vshrl.u32 %v3169_v10, 16  ;;  %v3174_v35 = vld [vmem:[#allocation2 + $0x64] sm:$0xf] }
 0x37e   : > { %4448 = vmatmul.mubr.msk.bf16.gmra.mxu0 %vm1024_vm6, %v4105_v42  ;;  %v3209_v0 = vsel %vm5208_vm12, %v3204_v31, %v3208_v57  ;;  %v3218_v59 = vrot.slane %v3217_v50, 4  ;;  %v3241_v21 = vor.u32 %v3240_v55, %v3237_v48  ;;  %v3254_v22 = vshll.u32 %v3170_v41, 16  ;;  %v3177_v41 = vld [vmem:[#allocation2 + $0x74] sm:$0xf] }
 0x37f   : > { %v4115_v30 = vcombine.low %v3199_v63, %v3209_v0  ;;  %v3228_v28 = vrot.slane %v3227_v1, 4  ;;  %v3246_v25 = vrot.slane %v3244_v5, 5  ;;  %v3250_v43 = vrot.slane %v3248_v26, 4  ;;  %v3178_v63 = vld [vmem:[#allocation2 + $0x78] sm:$0xf] }
 0x380   : > { %v3223_v46 = vsel %vm5208_vm12, %v3218_v59, %v3222_v60  ;;  %v3242_v29 = vrot.slane %v3241_v21, 4  ;;  %v3256_v61 = vrot.slane %v3254_v22, 5  ;;  %v3259_v38 = vshrl.u32 %v3171_v15, 16 }
 0x381   : > { %4453 = vmatprep.mubr.msk.bf16.mxu1 %vm1024_vm6, %v4115_v30  ;;  %v3233_v42 = vsel %vm5208_vm12, %v3228_v28, %v3232_v36  ;;  %v3251_v37 = vor.u32 %v3250_v43, %v3246_v25  ;;  %v3262_v45 = vshll.u32 %v3171_v15, 16  ;;  %v3268_v33 = vshll.u32 %v3172_v47, 16 }
 0x382   : > { %v4116_v40 = vcombine.low %v3223_v46, %v3233_v42  ;;  %v3247_v57 = vsel %vm5208_vm12, %v3242_v29, %v3246_v25  ;;  %v3261_v9 = vrot.slane %v3259_v38, 4  ;;  %v3272_v34 = vshrl.u32 %v3172_v47, 16  ;;  %v3179_v25 = vld [vmem:[#allocation2 + $0x7c] sm:$0x1]  ;;  %v3180_v46 = vld [vmem:[#allocation2 + $0x84] sm:$0xf] }
 0x383   : > { %v3252_v27 = vrot.slane %v3251_v37, 4  ;;  %v3264_v52 = vrot.slane %v3262_v45, 5  ;;  %v3270_v56 = vrot.slane %v3268_v33, 5  ;;  %v3278_v54 = vshll.u32 %v3173_v32, 16  ;;  %v3181_v42 = vld [vmem:[#allocation2 + $0x88] sm:$0xf] }
 0x384   : > { %4454 = vmatmul.mubr.msk.bf16.vlgmr.msra.gmra.mxu1 %vm1024_vm6, %v4116_v40  ;;  %v3274_v44 = vrot.slane %v3272_v34, 4  ;;  %v3283_v10 = vshrl.u32 %v3174_v35, 16  ;;  %v3286_v49 = vshll.u32 %v3174_v35, 16  ;;  %v3292_v16 = vshll.u32 %v3175_v51, 16 }
 0x385   : > { %v3257_v58 = vsel %vm5208_vm12, %v3252_v27, %v3256_v61  ;;  %v3265_v60 = vor.u32 %v3264_v52, %v3261_v9  ;;  %v3280_v53 = vrot.slane %v3278_v54, 5  ;;  %v3296_v36 = vshrl.u32 %v3175_v51, 16  ;;  %v3182_v9 = vld [vmem:[#allocation2 + $0x8c] sm:$0x1] }
 0x386   : > { %v4117_v31 = vcombine.low %v3247_v57, %v3257_v58  ;;  %v3275_v50 = vor.u32 %v3274_v44, %v3270_v56  ;;  %v3285_v48 = vrot.slane %v3283_v10, 4  ;;  %v3288_v55 = vrot.slane %v3286_v49, 5  ;;  %v3183_v44 = vld [vmem:[#allocation2 + $0x94] sm:$0xf]  ;;  %v3184_v58 = vld [vmem:[#allocation2 + $0x98] sm:$0xf] }
 0x387   : > { %v3266_v1 = vrot.slane %v3265_v60, 4  ;;  %v3294_v5 = vrot.slane %v3292_v16, 5  ;;  %v3298_v26 = vrot.slane %v3296_v36, 4  ;;  %v3302_v15 = vshll.u32 %v3176_v39, 16 }
 0x388   : > { %4457 = vmatprep.mubr.msk.bf16.mxu1 %vm1024_vm6, %v4117_v31  ;;  %v3276_v0 = vrot.slane %v3275_v50, 4  ;;  %v3289_v59 = vor.u32 %v3288_v55, %v3285_v48  ;;  %v3307_v21 = vshrl.u32 %v3177_v41, 16  ;;  %v3310_v22 = vshll.u32 %v3177_v41, 16 }
 0x389   : > { %v3271_v47 = vsel %vm5208_vm12, %v3266_v1, %v3270_v56  ;;  %v3299_v30 = vor.u32 %v3298_v26, %v3294_v5  ;;  %v3304_v28 = vrot.slane %v3302_v15, 5  ;;  %v3316_v43 = vshll.u32 %v3178_v63, 16  ;;  %v3185_v26 = vld [vmem:[#allocation2 + $0x9c] sm:$0x1] }
 0x38a   : > { %v3281_v29 = vsel %vm5208_vm12, %v3276_v0, %v3280_v53  ;;  %v3290_v61 = vrot.slane %v3289_v59, 4  ;;  %v3309_v32 = vrot.slane %v3307_v21, 4  ;;  %v3312_v38 = vrot.slane %v3310_v22, 5 }
 0x38b   : > { %v4118_v37 = vcombine.low %v3271_v47, %v3281_v29  ;;  %v3300_v45 = vrot.slane %v3299_v30, 4  ;;  %v3318_v33 = vrot.slane %v3316_v43, 5  ;;  %v3320_v35 = vshrl.u32 %v3178_v63, 16 }
 0x38c   : > { %v3295_v51 = vsel %vm5208_vm12, %v3290_v61, %v3294_v5  ;;  %v3313_v40 = vor.u32 %v3312_v38, %v3309_v32  ;;  %v3326_v57 = vshll.u32 %v3179_v25, 16  ;;  %v3331_v34 = vshrl.u32 %v3180_v46, 16 }
 0x38d   : > { %4458 = vmatmul.mubr.msk.bf16.gmra.mxu1 %vm1024_vm6, %v4118_v37  ;;  %v3305_v27 = vsel %vm5208_vm12, %v3300_v45, %v3304_v28  ;;  %v3322_v52 = vrot.slane %v3320_v35, 4  ;;  %v3334_v56 = vshll.u32 %v3180_v46, 16  ;;  %v3340_v54 = vshll.u32 %v3181_v42, 16 }
 0x38e   : > { %v4119_v39 = vcombine.low %v3295_v51, %v3305_v27  ;;  %v3314_v10 = vrot.slane %v3313_v40, 4  ;;  %v3328_v49 = vrot.slane %v3326_v57, 5  ;;  %v3333_v16 = vrot.slane %v3331_v34, 4 }
 0x38f   : > { %v3323_v60 = vor.u32 %v3322_v52, %v3318_v33  ;;  %v3336_v53 = vrot.slane %v3334_v56, 5  ;;  %v3342_v36 = vrot.slane %v3340_v54, 5  ;;  %v3344_v41 = vshrl.u32 %v3181_v42, 16 }
 0x390   : > { %4461 = vmatprep.mubr.msk.bf16.mxu1 %vm1024_vm6, %v4119_v39  ;;  %v3319_v31 = vsel %vm5208_vm12, %v3314_v10, %v3318_v33  ;;  %v3350_v50 = vshll.u32 %v3182_v9, 16  ;;  %v3355_v48 = vshrl.u32 %v3183_v44, 16  ;;  %v3358_v55 = vshll.u32 %v3183_v44, 16 }
 0x391   : > { %v3324_v63 = vrot.slane %v3323_v60, 4  ;;  %v3337_v1 = vor.u32 %v3336_v53, %v3333_v16  ;;  %v3346_v5 = vrot.slane %v3344_v41, 4  ;;  %v3364_v15 = vshll.u32 %v3184_v58, 16 }
 0x392   : > { %v3352_v0 = vrot.slane %v3350_v50, 5  ;;  %v3357_v59 = vrot.slane %v3355_v48, 4  ;;  %v3360_v21 = vrot.slane %v3358_v55, 5  ;;  %v3368_v22 = vshrl.u32 %v3184_v58, 16 }
 0x393   : > { %v3329_v47 = vsel %vm5208_vm12, %v3324_v63, %v3328_v49  ;;  %v3338_v30 = vrot.slane %v3337_v1, 4  ;;  %v3347_v28 = vor.u32 %v3346_v5, %v3342_v36  ;;  %v3366_v25 = vrot.slane %v3364_v15, 5 }
 0x394   : > { %v4120_v43 = vcombine.low %v3319_v31, %v3329_v47  ;;  %v3361_v46 = vor.u32 %v3360_v21, %v3357_v59  ;;  %v3370_v29 = vrot.slane %v3368_v22, 4  ;;  %v3374_v61 = vshll.u32 %v3185_v26, 16 }
 0x395   : > { %v3343_v32 = vsel %vm5208_vm12, %v3338_v30, %v3342_v36  ;;  %v3348_v38 = vrot.slane %v3347_v28, 4 }
 0x396   : > { %4462 = vmatmul.mubr.msk.bf16.gmra.mxu1 %vm1024_vm6, %v4120_v43  ;;  %v3362_v42 = vrot.slane %v3361_v46, 4  ;;  %v3371_v37 = vor.u32 %v3370_v29, %v3366_v25  ;;  %v3376_v45 = vrot.slane %v3374_v61, 5 }
 0x397   : > { %v3353_v33 = vsel %vm5208_vm12, %v3348_v38, %v3352_v0 }
 0x398   : > { %v4121_v35 = vcombine.low %v3343_v32, %v3353_v33  ;;  %v3367_v51 = vsel %vm5208_vm12, %v3362_v42, %v3366_v25  ;;  %v3372_v40 = vrot.slane %v3371_v37, 4  ;;  %v3591_v25 = vld [vmem:[%s5978_s6] sm:$0x3] }
 0x399   : > { %v4311_v57 = vpop.f32.mrf.mxu1  ;;  %4498 = vmatprep.subr.msk.bf16.mxu0 %vm1049_vm5, %v3591_v25  ;;  %v3624_v46 = vsel %vm1049_vm5, %v3591_v25, 0 }
 0x39a   : > { %4465 = vmatprep.mubr.msk.bf16.mxu1 %vm1024_vm6, %v4121_v35  ;;  %v3377_v9 = vsel %vm5208_vm12, %v3372_v40, %v3376_v45  ;;  %4470 = vmatpush3.bf16.msra.mxu0 %v3624_v46 }
 0x39b   : > { %v4122_v34 = vcombine.low %v3367_v51, %v3377_v9  ;;  %v1087_v27 = vpop.f32.mrf.mxu1 }
 0x39d   : > { %v4312_v52 = vpop.f32.mrf.mxu1 }
 0x39e   : > { %4466 = vmatmul.mubr.msk.bf16.gmra.mxu1 %vm1024_vm6, %v4122_v34 }
 0x39f   : > { %v1090_v56 = vpop.f32.mrf.mxu1 }
 0x3a1   : > { %v4315_v54 = vpop.f32.mrf.mxu1 }
 0x3a2   : > { %v4329_v44 = vpop.f32.mrf.mxu0 }
 0x3a3   : > { %v1244_v39 = vadd.f32 %v4329_v44, %v4311_v57  ;;  %v1103_v10 = vpop.f32.mrf.mxu1 }
 0x3a4   : > { %v1235_v49 = vpop.f32.mrf.mxu0 }
 0x3a5   : > { %v1236_v16 = vadd.f32 %v1235_v49, %v1087_v27  ;;  %v4316_v58 = vpop.f32.mrf.mxu1 }
 0x3a6   : > { %v4330_v60 = vpop.f32.mrf.mxu0 }
 0x3a7   : > { %v1247_v53 = vadd.f32 %v4330_v60, %v4312_v52  ;;  %v1106_v36 = vpop.f32.mrf.mxu1 }
 0x3a8   : > { %v1238_v41 = vpop.f32.mrf.mxu0 }
 0x3a9   : > { %v1239_v31 = vadd.f32 %v1238_v41, %v1090_v56  ;;  %v4319_v62 = vpop.f32.mrf.mxu1 }
 0x3aa   : > { %v4333_v50 = vpop.f32.mrf.mxu0 }
 0x3ab   : > { %v1260_v48 = vadd.f32 %v4333_v50, %v4315_v54  ;;  %v1119_v55 = vpop.f32.mrf.mxu1 }
 0x3ac   : > { %v1251_v63 = vpop.f32.mrf.mxu0 }
 0x3ad   : > { %v1252_v1 = vadd.f32 %v1251_v63, %v1103_v10  ;;  %v4320_v5 = vpop.f32.mrf.mxu1 }
 0x3ae   : > { %v4334_v26 = vpop.f32.mrf.mxu0 }
 0x3af   : > { %v1263_v15 = vadd.f32 %v4334_v26, %v4316_v58  ;;  %v1122_v0 = vpop.f32.mrf.mxu1 }
 0x3b0   : > { %v1254_v59 = vpop.f32.mrf.mxu0 }
 0x3b1   : > { %v1255_v21 = vadd.f32 %v1254_v59, %v1106_v36  ;;  %v4323_v47 = vpop.f32.mrf.mxu1 }
 0x3b2   : > { %v4337_v22 = vpop.f32.mrf.mxu0 }
 0x3b3   : > { %v1276_v30 = vadd.f32 %v4337_v22, %v4319_v62  ;;  %v1135_v29 = vpop.f32.mrf.mxu1 }
 0x3b4   : > { %v1267_v28 = vpop.f32.mrf.mxu0 }
 0x3b5   : > { %v1268_v43 = vadd.f32 %v1267_v28, %v1119_v55  ;;  %v4324_v37 = vpop.f32.mrf.mxu1 }
 0x3b6   : > { %v4338_v61 = vpop.f32.mrf.mxu0 }
 0x3b7   : > { %v1279_v32 = vadd.f32 %v4338_v61, %v4320_v5  ;;  %v1138_v40 = vpop.f32.mrf.mxu1 }
 0x3b8   : > { %v1270_v38 = vpop.f32.mrf.mxu0 }
 0x3b9   : > { %v1271_v42 = vadd.f32 %v1270_v38, %v1122_v0 }
 0x3ba   : > { %v4341_v45 = vpop.f32.mrf.mxu0 }
 0x3bb   : > { %v1292_v33 = vadd.f32 %v4341_v45, %v4323_v47 }
 0x3bc   : > { %v1283_v35 = vpop.f32.mrf.mxu0 }
 0x3bd   : > { %v1284_v51 = vadd.f32 %v1283_v35, %v1135_v29 }
 0x3be   : > { %v4342_v57 = vpop.f32.mrf.mxu0 }
 0x3bf   : > { %v1295_v9 = vadd.f32 %v4342_v57, %v4324_v37 }
 0x3c0   : > { %v1286_v34 = vpop.f32.mrf.mxu0 }
 0x3c1   : > { %v1287_v27 = vadd.f32 %v1286_v34, %v1138_v40 }
 0x3c2   : > { %v4347_v52 = vpop.f32.mrf.mxu1 }
 0x3c3   : > { %v5612_v56 = vadd.f32 %v4347_v52, %v1244_v39 }
 0x3c4   : > { %v1604_v54 = vpop.f32.mrf.mxu1 }
 0x3c5   : > { %v5614_v44 = vadd.f32 %v1604_v54, %v1236_v16 }
 0x3c6   : > { %v4348_v10 = vpop.f32.mrf.mxu1 }
 0x3c7   : > { %v5616_v49 = vadd.f32 %v4348_v10, %v1247_v53 }
 0x3c8   : > { %v1607_v58 = vpop.f32.mrf.mxu1 }
 0x3c9   : > { %v5618_v60 = vadd.f32 %v1607_v58, %v1239_v31 }
 0x3ca   : > { %v5620_v36 = vpop.f32.mrf.mxu0 }
 0x3cc   : > { %v5622_v41 = vpop.f32.mrf.mxu0 }
 0x3ce   : > { %v5624_v62 = vpop.f32.mrf.mxu0 }
 0x3d0   : > { %v5628_v5 = vpop.f32.mrf.mxu0 }
 0x3d2   : > { %v4351_v50 = vpop.f32.mrf.mxu1 }
 0x3d3   : > { %v1673_v55 = vadd.f32 %v4351_v50, %v1260_v48 }
 0x3d4   : > { %v1620_v63 = vpop.f32.mrf.mxu1 }
 0x3d5   : > { %v5626_v39 = vadd.f32 %v1620_v63, %v1252_v1 }
 0x3d6   : > { %v4352_v16 = vpop.f32.mrf.mxu1 }
 0x3d7   : > { %v5630_v26 = vadd.f32 %v4352_v16, %v1263_v15 }
 0x3d8   : > { %v1623_v53 = vpop.f32.mrf.mxu1 }
 0x3d9   : > { %v5632_v0 = vadd.f32 %v1623_v53, %v1255_v21  ;;  %v4369_v31 = vpop.f32.mrf.mxu0 }
 0x3da   : > { %v2039_v59 = vadd.f32 %v4369_v31, %v1673_v55 }
 0x3db   : > { %v5634_v22 = vpop.f32.mrf.mxu0 }
 0x3dd   : > { %v5636_v47 = vpop.f32.mrf.mxu0 }
 0x3df   : > { %v5638_v48 = vpop.f32.mrf.mxu0 }
 0x3e3   : > { %v4355_v28 = vpop.f32.mrf.mxu1 }
 0x3e4   : > { %v1677_v25 = vadd.f32 %v4355_v28, %v1276_v30 }
 0x3e5   : > { %v1636_v1 = vpop.f32.mrf.mxu1 }
 0x3e6   : > { %v5640_v46 = vadd.f32 %v1636_v1, %v1268_v43 }
 0x3e7   : > { %v4356_v29 = vpop.f32.mrf.mxu1 }
 0x3e8   : > { %v5642_v61 = vadd.f32 %v4356_v29, %v1279_v32  ;;  %v4373_v15 = vpop.f32.mrf.mxu0 }
 0x3e9   : > { %v1639_v38 = vpop.f32.mrf.mxu1  ;;  %v2043_v21 = vadd.f32 %v4373_v15, %v1677_v25 }
 0x3ea   : > { %v5644_v37 = vadd.f32 %v1639_v38, %v1271_v42  ;;  %v5646_v45 = vpop.f32.mrf.mxu0 }
 0x3ec   : > { %v5648_v35 = vpop.f32.mrf.mxu0 }
 0x3ee   : > { %v5650_v30 = vpop.f32.mrf.mxu0 }
 0x3ef   : > { %6040 = vst [vmem:[#allocation40_spill] sm:$0xff] %v5650_v30 }
 0x3f2   : > { %v4359_v40 = vpop.f32.mrf.mxu1 }
 0x3f3   : > { %v1681_v57 = vadd.f32 %v4359_v40, %v1292_v33 }
 0x3f4   : > { %v1652_v34 = vpop.f32.mrf.mxu1 }
 0x3f5   : > { %v5652_v52 = vadd.f32 %v1652_v34, %v1284_v51 }
 0x3f6   : > { %v4360_v43 = vpop.f32.mrf.mxu1 }
 0x3f7   : > { %6041 = vst [vmem:[#allocation41_spill] sm:$0xff] %v5652_v52  ;;  %v5654_v54 = vadd.f32 %v4360_v43, %v1295_v9  ;;  %v4377_v32 = vpop.f32.mrf.mxu0 }
 0x3f8   : > { %v1655_v10 = vpop.f32.mrf.mxu1  ;;  %v2047_v58 = vadd.f32 %v4377_v32, %v1681_v57 }
 0x3f9   : > { %6042 = vst [vmem:[#allocation42_spill] sm:$0xff] %v5654_v54  ;;  %v5656_v50 = vadd.f32 %v1655_v10, %v1287_v27  ;;  %v5658_v42 = vpop.f32.mrf.mxu0  ;;  %v2035_v54 = vadd.f32 %v5620_v36, %v5612_v56  ;;  %v2034_v56 = vadd.f32 %v5628_v5, %v5618_v60  ;;  %v2037_v60 = vadd.f32 %v5634_v22, %v5626_v39 }
 0x3fa   : > { %6044 = vst [vmem:[#allocation44_spill] sm:$0xff] %v5658_v42  ;;  %v4383_v55 = vpop.f32.mrf.mxu1  ;;  %v2033_v42 = vadd.f32 %v5622_v41, %v5614_v44 }
 0x3fb   : > { %6043 = vst [vmem:[#allocation43_spill] sm:$0xff] %v5656_v50  ;;  %v5660_v63 = vpop.f32.mrf.mxu0  ;;  %v2217_v52 = vadd.f32 %v4383_v55, %v2035_v54 }
 0x3fc   : > { %6045 = vst [vmem:[#allocation45_spill] sm:$0xff] %v5660_v63  ;;  %v2152_v16 = vpop.f32.mrf.mxu1 }
 0x3fd   : > { %v5662_v33 = vpop.f32.mrf.mxu0 }
 0x3fe   : > { %6046 = vst [vmem:[#allocation46_spill] sm:$0xff] %v5662_v33  ;;  %v5664_v53 = vpop.f32.mrf.mxu1 }
 0x400   : > { %v5666_v51 = vpop.f32.mrf.mxu1 }
 0x401   : > { %v2216_v41 = vadd.f32 %v5666_v51, %v2034_v56 }
 0x402   : > { %v4401_v31 = vpop.f32.mrf.mxu0  ;;  %v4387_v9 = vpop.f32.mrf.mxu1 }
 0x403   : > { %v5668_v28 = vadd.f32 %v4387_v9, %v2039_v59 }
 0x404   : > { %v2534_v25 = vpop.f32.mrf.mxu0  ;;  %v5670_v1 = vpop.f32.mrf.mxu1 }
 0x406   : > { %v4402_v27 = vpop.f32.mrf.mxu0  ;;  %v5672_v29 = vpop.f32.mrf.mxu1 }
 0x408   : > { %v5674_v15 = vpop.f32.mrf.mxu0  ;;  %v5676_v38 = vpop.f32.mrf.mxu1 }
 0x40a   : > { %v4391_v40 = vpop.f32.mrf.mxu1 }
 0x40b   : > { %v5678_v57 = vadd.f32 %v4391_v40, %v2043_v21 }
 0x40c   : > { %v5680_v34 = vpop.f32.mrf.mxu0  ;;  %v5682_v43 = vpop.f32.mrf.mxu1 }
 0x40e   : > { %v5684_v32 = vpop.f32.mrf.mxu0  ;;  %v5686_v59 = vpop.f32.mrf.mxu1 }
 0x40f   : > { %6047 = vst [vmem:[#allocation47_spill] sm:$0xff] %v5686_v59 }
 0x410   : > { %v5688_v10 = vpop.f32.mrf.mxu0  ;;  %v5690_v9 = vpop.f32.mrf.mxu1 }
 0x411   : > { %6048 = vst [vmem:[#allocation48_spill] sm:$0xff] %v5690_v9 }
 0x412   : > { %v5692_v12 = vpop.f32.mrf.mxu0  ;;  %v4395_v14 = vpop.f32.mrf.mxu1 }
 0x413   : > { %v5694_v11 = vadd.f32 %v4395_v14, %v2047_v58 }
 0x414   : > { %v5696_v13 = vpop.f32.mrf.mxu0  ;;  %v5700_v40 = vpop.f32.mrf.mxu1 }
 0x415   : > { %6049 = vst [vmem:[#allocation49_spill] sm:$0xff] %v5694_v11  ;;  %6051 = vst [vmem:[#allocation51_spill] sm:$0xff] %v5700_v40 }
 0x416   : > { %v5698_v21 = vpop.f32.mrf.mxu0  ;;  %v5706_v19 = vpop.f32.mrf.mxu1 }
 0x417   : > { %6050 = vst [vmem:[#allocation50_spill] sm:$0xff] %v5698_v21  ;;  %6054 = vst [vmem:[#allocation54_spill] sm:$0xff] %v5706_v19  ;;  %v2599_v21 = vadd.f32 %v4401_v31, %v2217_v52 }
 0x418   : > { %v5702_v20 = vpop.f32.mrf.mxu0  ;;  %v5710_v8 = vpop.f32.mrf.mxu1 }
 0x419   : > { %6052 = vst [vmem:[#allocation52_spill] sm:$0xff] %v5702_v20  ;;  %6056 = vst [vmem:[#allocation56_spill] sm:$0xff] %v5710_v8 }
 0x41a   : > { %v5704_v24 = vpop.f32.mrf.mxu0 }
 0x41b   : > { %6053 = vst [vmem:[#allocation53_spill] sm:$0xff] %v5704_v24 }
 0x41e   : > { %v5708_v23 = vpop.f32.mrf.mxu0 }
 0x41f   : > { %6055 = vst [vmem:[#allocation55_spill] sm:$0xff] %v5708_v23 }
 0x420   : > { %v5712_v18 = vpop.f32.mrf.mxu0 }
 0x421   : > { %6057 = vst [vmem:[#allocation57_spill] sm:$0xff] %v5712_v18 }
 0x422   : > { %v5714_v14 = vpop.f32.mrf.mxu0 }
 0x423   : > { %6058 = vst [vmem:[#allocation58_spill] sm:$0xff] %v5714_v14  ;;  %v4419_v58 = vpop.f32.mrf.mxu1 }
 0x424   : > { %v5716_v7 = vpop.f32.mrf.mxu0  ;;  %v2966_v30 = vadd.f32 %v4419_v58, %v2599_v21 }
 0x425   : > { %6059 = vst [vmem:[#allocation59_spill] sm:$0xff] %v5716_v7  ;;  %v2901_v17 = vpop.f32.mrf.mxu1 }
 0x426   : > { %v4437_v3 = vpop.f32.mrf.mxu0 }
 0x427   : > { %v4420_v6 = vpop.f32.mrf.mxu1 }
 0x428   : > { %v3083_v2 = vpop.f32.mrf.mxu0 }
 0x429   : > { %v2904_v4 = vpop.f32.mrf.mxu1 }
 0x42a   : > { %v4438_v50 = vpop.f32.mrf.mxu0 }
 0x42b   : > { %v4423_v33 = vpop.f32.mrf.mxu1 }
 0x42c   : > { %v3086_v23 = vpop.f32.mrf.mxu0 }
 0x42d   : > { %v2917_v11 = vpop.f32.mrf.mxu1 }
 0x42e   : > { %v4441_v18 = vpop.f32.mrf.mxu0 }
 0x42f   : > { %v5718_v19 = vpop.f32.mrf.mxu1 }
 0x430   : > { %v3099_v7 = vpop.f32.mrf.mxu0 }
 0x431   : > { %v5720_v40 = vpop.f32.mrf.mxu1 }
 0x432   : > { %v5734_v9 = vpop.f32.mrf.mxu0 }
 0x433   : > { %v5722_v8 = vpop.f32.mrf.mxu1 }
 0x434   : > { %6060 = vst [vmem:[#allocation60_spill] sm:$0xff] %v5722_v8 }
 0x435   : > { %v5724_v14 = vpop.f32.mrf.mxu1 }
 0x436   : > { %6061 = vst [vmem:[#allocation61_spill] sm:$0xff] %v5724_v14  ;;  %v2036_v14 = vadd.f32 %v5624_v62, %v5616_v49  ;;  %v3148_v49 = vadd.f32 %v4437_v3, %v2966_v30  ;;  %v2219_v30 = vadd.f32 %v5670_v1, %v2037_v60  ;;  %v6068_v60 = vld [vmem:[#allocation47_spill] sm:$0xff] }
 0x437   : > { %v5726_v24 = vpop.f32.mrf.mxu1 }
 0x438   : > { %6062 = vst [vmem:[#allocation62_spill] sm:$0xff] %v5726_v24  ;;  %v2215_v24 = vadd.f32 %v2152_v16, %v2033_v42  ;;  %v2218_v36 = vadd.f32 %v5664_v53, %v2036_v14  ;;  %v2598_v42 = vadd.f32 %v5674_v15, %v2216_v41  ;;  %v2041_v41 = vadd.f32 %v5646_v45, %v5640_v46 }
 0x439   : > { %v5728_v63 = vpop.f32.mrf.mxu1 }
 0x43a   : > { %6063 = vst [vmem:[#allocation63_spill] sm:$0xff] %v5728_v63  ;;  %v5744_v63 = vpop.f32.mrf.mxu0  ;;  %v2600_v54 = vadd.f32 %v4402_v27, %v2218_v36  ;;  %v2965_v53 = vadd.f32 %v2904_v4, %v2598_v42  ;;  %v2038_v4 = vadd.f32 %v5638_v48, %v5632_v0  ;;  %v2601_v27 = vadd.f32 %v5684_v32, %v2219_v30 }
 0x43b   : > { %v5732_v20 = vpop.f32.mrf.mxu1 }
 0x43c   : > { %6064 = vst [vmem:[#allocation64_spill] sm:$0xff] %v5732_v20  ;;  %v2597_v20 = vadd.f32 %v2534_v25, %v2215_v24  ;;  %v5752_v62 = vpop.f32.mrf.mxu0  ;;  %v2967_v16 = vadd.f32 %v4420_v6, %v2600_v54  ;;  %v5760_v24 = vld [vmem:[%s6066_s16] ss:$0 sm:$0xff]  ;;  %v3147_v22 = vadd.f32 %v3086_v23, %v2965_v53  ;;  %v6069_v53 = vld [vmem:[#allocation50_spill] sm:$0xff] }
 0x43d   : > { %v5738_v8 = vpop.f32.mrf.mxu1 }
 0x43e   : > { %v2964_v55 = vadd.f32 %v2901_v17, %v2597_v20  ;;  %v3149_v17 = vadd.f32 %v4438_v50, %v2967_v16  ;;  %v2040_v20 = vadd.f32 %v5636_v47, %v5630_v26  ;;  %v5767_v6 = vpop.f32.mrf.mxu0 }
 0x43f   : > { %v5742_v59 = vpop.f32.mrf.mxu1 }
 0x440   : > { %6065 = vst [vmem:[#allocation65_spill] sm:$0xff] %v5742_v59  ;;  %v3146_v31 = vadd.f32 %v3083_v2, %v2964_v55  ;;  %v2603_v2 = vadd.f32 %v5680_v34, %v5668_v28  ;;  %v2222_v50 = vadd.f32 %v5672_v29, %v2040_v20  ;;  %v2220_v34 = vadd.f32 %v5676_v38, %v2038_v4  ;;  %v4446_v14 = vpop.f32.mrf.mxu0 }
 0x441   : > { %v5749_v44 = vpop.f32.mrf.mxu1 }
 0x442   : > { %v2970_v26 = vadd.f32 %v4423_v33, %v2603_v2  ;;  %v2604_v23 = vadd.f32 %v5688_v10, %v2222_v50  ;;  %v2602_v33 = vadd.f32 %v5692_v12, %v2220_v34  ;;  %v2044_v12 = vadd.f32 %v5648_v35, %v5642_v61  ;;  %v6070_v61 = vld [vmem:[#allocation60_spill] sm:$0xff] }
 0x444   : > { %v4455_v52 = vpop.f32.mrf.mxu1  ;;  %v3152_v21 = vadd.f32 %v4441_v18, %v2970_v26  ;;  %v2971_v32 = vadd.f32 %v5718_v19, %v2604_v23  ;;  %v2969_v18 = vadd.f32 %v5720_v40, %v2602_v33  ;;  %v2223_v19 = vadd.f32 %v5682_v43, %v2041_v41  ;;  %v6067_v40 = vld [vmem:[#allocation40_spill] sm:$0xff]  ;;  %v6077_v26 = vld [vmem:[#allocation45_spill] sm:$0xff] }
 0x445   : > { %v3530_v59 = vadd.f32 %v4455_v52, %v3148_v49  ;;  %v3118_v49 = vpop.f32.mrf.mxu0  ;;  %v6078_v23 = vld [vmem:[#allocation53_spill] sm:$0xff] }
 0x446   : > { %v3465_v5 = vpop.f32.mrf.mxu1  ;;  %v3153_v55 = vadd.f32 %v5734_v9, %v2971_v32  ;;  %v3151_v45 = vadd.f32 %v5744_v63, %v2969_v18  ;;  %v2042_v9 = vadd.f32 %v6067_v40, %v5644_v37  ;;  %v6073_v37 = vld [vmem:[#allocation48_spill] sm:$0xff] }
 0x447   : > { %v3528_v3 = vadd.f32 %v3465_v5, %v3146_v31  ;;  %v3553_v51 = vadd.f32 %v5760_v24, %v3530_v59  ;;  %v2968_v59 = vadd.f32 %v2917_v11, %v2601_v27  ;;  %v2226_v5 = vadd.f32 %v6068_v60, %v2044_v12  ;;  %v4449_v20 = vpop.f32.mrf.mxu0  ;;  %v6076_v27 = vld [vmem:[#allocation42_spill] sm:$0xff]  ;;  %v6084_v12 = vld [vmem:[#allocation43_spill] sm:$0xff]  ;;  %v6088_v40 = vld [vmem:[#allocation64_spill] sm:$0xff] }
 0x448   : > { %v4456_v39 = vpop.f32.mrf.mxu1 }
 0x449   : > { %v3531_v25 = vadd.f32 %v4456_v39, %v3149_v17  ;;  %v3551_v1 = vadd.f32 %v5760_v24, %v3528_v3  ;;  %v3569_v58 = vmax.f32 %v3553_v51, 0.0  ;;  %v3150_v56 = vadd.f32 %v3099_v7, %v2968_v59  ;;  %v3131_v32 = vpop.f32.mrf.mxu0 }
 0x44a   : > { %v3468_v47 = vpop.f32.mrf.mxu1  ;;  %v2607_v7 = vadd.f32 %v5696_v13, %v5678_v57  ;;  %v2605_v17 = vadd.f32 %v6069_v53, %v2223_v19  ;;  %v6071_v13 = vld [vmem:[#allocation41_spill] sm:$0xff]  ;;  %v6072_v57 = vld [vmem:[#allocation44_spill] sm:$0xff]  ;;  %v2224_v39 = vadd.f32 %v6073_v37, %v2042_v9  ;;  %v6085_v19 = vld [vmem:[#allocation46_spill] sm:$0xff] }
 0x44b   : > { %v3554_v28 = vadd.f32 %v5760_v24, %v3531_v25  ;;  %v3529_v15 = vadd.f32 %v3468_v47, %v3147_v22  ;;  %v3567_v38 = vmax.f32 %v3551_v1, 0.0  ;;  %v2045_v3 = vadd.f32 %v6072_v57, %v6071_v13  ;;  %v6074_v22 = vld [vmem:[#allocation52_spill] sm:$0xff]  ;;  %v6075_v25 = vld [vmem:[#allocation61_spill] sm:$0xff]  ;;  %v4450_v13 = vpop.f32.mrf.mxu0 }
 0x44c   : > { %v2974_v35 = vadd.f32 %v6070_v61, %v2607_v7  ;;  %v2608_v51 = vadd.f32 %v6074_v22, %v2226_v5  ;;  %v2972_v4 = vadd.f32 %v6075_v25, %v2605_v17  ;;  %v2048_v47 = vadd.f32 %v6077_v26, %v6076_v27  ;;  %v6089_v17 = vld [vmem:[#allocation56_spill] sm:$0xff] }
 0x44d   : > { %v3570_v0 = vmax.f32 %v3554_v28, 0.0  ;;  %v3552_v48 = vadd.f32 %v5760_v24, %v3529_v15  ;;  %v4459_v29 = vpop.f32.mrf.mxu1  ;;  %v2606_v59 = vadd.f32 %v6078_v23, %v2224_v39  ;;  %v2046_v7 = vadd.f32 %v6085_v19, %v6084_v12  ;;  %v6092_v39 = vld [vmem:[#allocation65_spill] sm:$0xff] }
 0x44e   : > { %v3534_v36 = vadd.f32 %v4459_v29, %v3152_v21  ;;  %v3156_v50 = vadd.f32 %v5752_v62, %v2974_v35  ;;  %v6079_v21 = vld [vmem:[#allocation62_spill] sm:$0xff]  ;;  %v6080_v29 = vld [vmem:[#allocation51_spill] sm:$0xff] }
 0x44f   : > { %v3584_v54 = vpack.c.bf16 %v3570_v0, %v3569_v58  ;;  %v3568_v10 = vmax.f32 %v3552_v48, 0.0  ;;  %v3481_v11 = vpop.f32.mrf.mxu1  ;;  %v2975_v58 = vadd.f32 %v6079_v21, %v2608_v51  ;;  %v3154_v0 = vadd.f32 %v5767_v6, %v2972_v4  ;;  %v6090_v35 = vld [vmem:[#allocation58_spill] sm:$0xff] }
 0x450   : > { %v3532_v52 = vadd.f32 %v3481_v11, %v3150_v56  ;;  %v3557_v16 = vadd.f32 %v5760_v24, %v3534_v36  ;;  %v2227_v33 = vadd.f32 %v6080_v29, %v2045_v3  ;;  %v6083_v11 = vld [vmem:[#allocation63_spill] sm:$0xff]  ;;  %v2228_v61 = vadd.f32 %v6089_v17, %v2046_v7 }
 0x451   : > { %v3583_v42 = vpack.c.bf16 %v3568_v10, %v3567_v38  ;;  %v4460_v46 = vpop.f32.mrf.mxu1  ;;  %v6081_v38 = vld [vmem:[#allocation49_spill] sm:$0xff]  ;;  %v2973_v18 = vadd.f32 %v6083_v11, %v2606_v59  ;;  %v5845_v11 = vld [vmem:[%s6093_s25] ss:$0 sm:$0xff] }
 0x452   : > { %v3535_v31 = vadd.f32 %v4460_v46, %v3153_v55  ;;  %v3555_v63 = vadd.f32 %v5760_v24, %v3532_v52  ;;  %v3573_v1 = vmax.f32 %v3557_v16, 0.0  ;;  %v3157_v55 = vadd.f32 %v4446_v14, %v2975_v58  ;;  %v6087_v46 = vld [vmem:[#allocation57_spill] sm:$0xff] }
 0x453   : > { %v3484_v43 = vpop.f32.mrf.mxu1  ;;  %4471 = vmatprep.mubr.msk.bf16.mxu0 %vm1024_vm6, %v3583_v42  ;;  %v6086_v42 = vld [vmem:[#allocation54_spill] sm:$0xff]  ;;  %v3155_v60 = vadd.f32 %v3118_v49, %v2973_v18  ;;  %v6091_v49 = vld [vmem:[#allocation59_spill] sm:$0xff] }
 0x454   : > { %v3558_v30 = vadd.f32 %v5760_v24, %v3535_v31  ;;  %v3533_v2 = vadd.f32 %v3484_v43, %v3151_v45  ;;  %4472 = vmatmul.mubr.msk.bf16.vlgmr.msra.gmra.mxu0 %vm1024_vm6, %v3584_v54  ;;  %v3571_v56 = vmax.f32 %v3555_v63, 0.0  ;;  %v6082_v54 = vld [vmem:[#allocation55_spill] sm:$0xff]  ;;  %v2230_v6 = vadd.f32 %v6086_v42, %v2048_v47  ;;  %v3134_v47 = vpop.f32.mrf.mxu0 }
 0x455   : > { %v2611_v10 = vadd.f32 %v6082_v54, %v6081_v38  ;;  %v2609_v45 = vadd.f32 %v6087_v46, %v2227_v33  ;;  %v2610_v37 = vadd.f32 %v6091_v49, %v2228_v61 }
 0x456   : > { %v3574_v28 = vmax.f32 %v3558_v30, 0.0  ;;  %v3556_v15 = vadd.f32 %v5760_v24, %v3533_v2  ;;  %v4463_v34 = vpop.f32.mrf.mxu1  ;;  %v2612_v14 = vadd.f32 %v6090_v35, %v2230_v6  ;;  %v6095_v6 = vld [vmem:[#allocation24_spill] sm:$0xff] }
 0x457   : > { %v3538_v48 = vadd.f32 %v4463_v34, %v3156_v50  ;;  %v2978_v9 = vadd.f32 %v6088_v40, %v2611_v10  ;;  %v2976_v43 = vadd.f32 %v5738_v8, %v2609_v45  ;;  %v6096_v40 = vld [vmem:[#allocation27_spill] sm:$0xff] }
 0x458   : > { %v3586_v62 = vpack.c.bf16 %v3574_v28, %v3573_v1  ;;  %v3572_v36 = vmax.f32 %v3556_v15, 0.0  ;;  %v3497_v41 = vpop.f32.mrf.mxu1  ;;  %v2979_v22 = vadd.f32 %v6092_v39, %v2612_v14 }
 0x459   : > { %v3536_v52 = vadd.f32 %v3497_v41, %v3154_v0  ;;  %v3561_v5 = vadd.f32 %v5760_v24, %v3538_v48  ;;  %v3160_v3 = vadd.f32 %v4449_v20, %v2978_v9  ;;  %v3158_v51 = vadd.f32 %v3131_v32, %v2976_v43 }
 0x45a   : > { %v3585_v16 = vpack.c.bf16 %v3572_v36, %v3571_v56  ;;  %v4464_v31 = vpop.f32.mrf.mxu1  ;;  %v2977_v20 = vadd.f32 %v5749_v44, %v2610_v37  ;;  %v3161_v26 = vadd.f32 %v4450_v13, %v2979_v22  ;;  %v6098_v13 = vld [vmem:[#allocation34_spill] sm:$0xff] }
 0x45b   : > { %v3539_v53 = vadd.f32 %v4464_v31, %v3157_v55  ;;  %v3559_v63 = vadd.f32 %v5760_v24, %v3536_v52  ;;  %v3577_v4 = vmax.f32 %v3561_v5, 0.0 }
 0x45c   : > { %v3500_v57 = vpop.f32.mrf.mxu1  ;;  %4475 = vmatprep.mubr.msk.bf16.mxu0 %vm1024_vm6, %v3585_v16  ;;  %v3159_v21 = vadd.f32 %v3134_v47, %v2977_v20 }
 0x45d   : > { %v3562_v30 = vadd.f32 %v5760_v24, %v3539_v53  ;;  %v3537_v2 = vadd.f32 %v3500_v57, %v3155_v60  ;;  %4476 = vmatmul.mubr.msk.bf16.gmra.mxu0 %vm1024_vm6, %v3586_v62  ;;  %v3575_v28 = vmax.f32 %v3559_v63, 0.0  ;;  %v6097_v53 = vld [vmem:[#allocation25_spill] sm:$0xff] }
 0x45e   : > { %v4467_v25 = vpop.f32.mrf.mxu1 }
 0x45f   : > { %v3578_v8 = vmax.f32 %v3562_v30, 0.0  ;;  %v3560_v50 = vadd.f32 %v5760_v24, %v3537_v2  ;;  %v3542_v27 = vadd.f32 %v4467_v25, %v3160_v3  ;;  %v6099_v2 = vld [vmem:[#allocation28_spill] sm:$0xff] }
 0x460   : > { %v3513_v1 = vpop.f32.mrf.mxu1 }
 0x461   : > { %v3588_v15 = vpack.c.bf16 %v3578_v8, %v3577_v4  ;;  %v3576_v34 = vmax.f32 %v3560_v50, 0.0  ;;  %v3540_v23 = vadd.f32 %v3513_v1, %v3158_v51  ;;  %v3565_v0 = vadd.f32 %v5760_v24, %v3542_v27  ;;  %v6100_v51 = vld [vmem:[#allocation35_spill] sm:$0xff]  ;;  %v6101_v50 = vld [vmem:[#allocation29_spill] sm:$0xff] }
 0x462   : > { %v4468_v59 = vpop.f32.mrf.mxu1 }
 0x463   : > { %v3587_v58 = vpack.c.bf16 %v3576_v34, %v3575_v28  ;;  %v3543_v48 = vadd.f32 %v4468_v59, %v3161_v26  ;;  %v3563_v33 = vadd.f32 %v5760_v24, %v3540_v23  ;;  %v3581_v44 = vmax.f32 %v3565_v0, 0.0  ;;  %v6102_v28 = vld [vmem:[#allocation38_spill] sm:$0xff] }
 0x464   : > { %v3516_v29 = vpop.f32.mrf.mxu1 }
 0x465   : > { %v3566_v32 = vadd.f32 %v5760_v24, %v3543_v48  ;;  %v3541_v56 = vadd.f32 %v3516_v29, %v3159_v21  ;;  %4479 = vmatprep.mubr.msk.bf16.mxu0 %vm1024_vm6, %v3587_v58  ;;  %v3579_v41 = vmax.f32 %v3563_v33, 0.0  ;;  %v6103_v21 = vld [vmem:[#allocation36_spill] sm:$0xff]  ;;  %v6104_v33 = vld [vmem:[#allocation39_spill] sm:$0xff] }
 0x466   : > { %4480 = vmatmul.mubr.msk.bf16.gmra.mxu0 %vm1024_vm6, %v3588_v15 }
 0x467   : > { %v3582_v62 = vmax.f32 %v3566_v32, 0.0  ;;  %v3564_v36 = vadd.f32 %v5760_v24, %v3541_v56  ;;  %v6094_v24 = vld [vmem:[#allocation26_spill] sm:$0xff] }
 0x469   : > { %v3590_v38 = vpack.c.bf16 %v3582_v62, %v3581_v44  ;;  %v3580_v54 = vmax.f32 %v3564_v36, 0.0  ;;  %v6105_v36 = vld [vmem:[#allocation37_spill] sm:$0xff] }
 0x46b   : > { %v3589_v10 = vpack.c.bf16 %v3580_v54, %v3579_v41 }
 0x46d   : > { %4483 = vmatprep.mubr.msk.bf16.mxu0 %vm1024_vm6, %v3589_v10 }
 0x46e   : > { %4484 = vmatmul.mubr.msk.bf16.gmra.mxu0 %vm1024_vm6, %v3590_v38 }
 0x514   : > { %v4473_v18 = vpop.f32.mrf.mxu0 }
 0x515   : > { %v3669_v55 = vadd.f32 %v4473_v18, %v5845_v11  ;;  %v6106_v18 = vld [vmem:[#allocation32_spill] sm:$0xff] }
 0x516   : > { %v3660_v52 = vpop.f32.mrf.mxu0 }
 0x517   : > { %v3725_v12 = vadd.f32 %v3669_v55, %v6094_v24  ;;  %v3661_v19 = vadd.f32 %v5845_v11, %v3660_v52 }
 0x518   : > { %v4474_v7 = vpop.f32.mrf.mxu0 }
 0x519   : > { %v3741_v42 = vmax.f32 %v3725_v12, 0.0  ;;  %v3723_v46 = vadd.f32 %v3661_v19, %v6095_v6  ;;  %v3672_v45 = vadd.f32 %v4474_v7, %v5845_v11  ;;  %v6107_v19 = vld [vmem:[#allocation30_spill] sm:$0xff] }
 0x51a   : > { %v3663_v16 = vpop.f32.mrf.mxu0 }
 0x51b   : > { %3757 = vst.msk [vmem:[%s5102_s14 + $0x10] sm:$0xff] %vm421_vm2, %v3741_v42  ;;  %v3739_v31 = vmax.f32 %v3723_v46, 0.0  ;;  %v3726_v9 = vadd.f32 %v3672_v45, %v6096_v40  ;;  %v3664_v60 = vadd.f32 %v5845_v11, %v3663_v16  ;;  %v6108_v45 = vld [vmem:[#allocation33_spill] sm:$0xff] }
 0x51d   : > { %3755 = vst.msk [vmem:[%s5102_s14] sm:$0xff] %vm421_vm2, %v3739_v31  ;;  %v3742_v5 = vmax.f32 %v3726_v9, 0.0  ;;  %v3724_v17 = vadd.f32 %v3664_v60, %v6097_v53  ;;  %v4477_v61 = vpop.f32.mrf.mxu0  ;;  %v6109_v9 = vld [vmem:[#allocation31_spill] sm:$0xff] }
 0x51e   : > { %v3685_v35 = vadd.f32 %v4477_v61, %v5845_v11 }
 0x51f   : > { %3758 = vst.msk [vmem:[%s5102_s14 + $0x18] sm:$0xff] %vm421_vm2, %v3742_v5  ;;  %v3740_v14 = vmax.f32 %v3724_v17, 0.0  ;;  %v3676_v43 = vpop.f32.mrf.mxu0 }
 0x520   : > { %v3729_v57 = vadd.f32 %v3685_v35, %v6098_v13  ;;  %v3677_v3 = vadd.f32 %v5845_v11, %v3676_v43 }
 0x521   : > { %3756 = vst.msk [vmem:[%s5102_s14 + $0x8] sm:$0xff] %vm421_vm2, %v3740_v14  ;;  %v4478_v63 = vpop.f32.mrf.mxu0 }
 0x522   : > { %v3745_v30 = vmax.f32 %v3729_v57, 0.0  ;;  %v3727_v49 = vadd.f32 %v3677_v3, %v6099_v2  ;;  %v3688_v37 = vadd.f32 %v4478_v63, %v5845_v11 }
 0x523   : > { %v3679_v39 = vpop.f32.mrf.mxu0 }
 0x524   : > { %3761 = vst.msk [vmem:[%s5102_s14 + $0x30] sm:$0xff] %vm421_vm2, %v3745_v30  ;;  %v3743_v22 = vmax.f32 %v3727_v49, 0.0  ;;  %v3730_v25 = vadd.f32 %v3688_v37, %v6100_v51  ;;  %v3680_v4 = vadd.f32 %v5845_v11, %v3679_v39 }
 0x526   : > { %3759 = vst.msk [vmem:[%s5102_s14 + $0x20] sm:$0xff] %vm421_vm2, %v3743_v22  ;;  %v3746_v8 = vmax.f32 %v3730_v25, 0.0  ;;  %v3728_v27 = vadd.f32 %v3680_v4, %v6101_v50  ;;  %v4481_v20 = vpop.f32.mrf.mxu0 }
 0x527   : > { %v3701_v26 = vadd.f32 %v4481_v20, %v5845_v11 }
 0x528   : > { %3762 = vst.msk [vmem:[%s5102_s14 + $0x38] sm:$0xff] %vm421_vm2, %v3746_v8  ;;  %v3744_v47 = vmax.f32 %v3728_v27, 0.0  ;;  %v3692_v1 = vpop.f32.mrf.mxu0 }
 0x529   : > { %v3733_v15 = vadd.f32 %v3701_v26, %v6102_v28  ;;  %v3693_v34 = vadd.f32 %v5845_v11, %v3692_v1 }
 0x52a   : > { %3760 = vst.msk [vmem:[%s5102_s14 + $0x28] sm:$0xff] %vm421_vm2, %v3744_v47  ;;  %v4482_v23 = vpop.f32.mrf.mxu0 }
 0x52b   : > { %v3749_v59 = vmax.f32 %v3733_v15, 0.0  ;;  %v3731_v58 = vadd.f32 %v3693_v34, %v6103_v21  ;;  %v3704_v0 = vadd.f32 %v4482_v23, %v5845_v11 }
 0x52c   : > { %v3695_v48 = vpop.f32.mrf.mxu0 }
 0x52d   : > { %3765 = vst.msk [vmem:[%s5102_s14 + $0x50] sm:$0xff] %vm421_vm2, %v3749_v59  ;;  %v3747_v29 = vmax.f32 %v3731_v58, 0.0  ;;  %v3734_v32 = vadd.f32 %v3704_v0, %v6104_v33  ;;  %v3696_v56 = vadd.f32 %v5845_v11, %v3695_v48 }
 0x52e   : > { %v4485_v44 = vpop.f32.mrf.mxu0 }
 0x52f   : > { %3763 = vst.msk [vmem:[%s5102_s14 + $0x40] sm:$0xff] %vm421_vm2, %v3747_v29  ;;  %v3750_v62 = vmax.f32 %v3734_v32, 0.0  ;;  %v3732_v41 = vadd.f32 %v3696_v56, %v6105_v36  ;;  %v3717_v38 = vadd.f32 %v4485_v44, %v5845_v11 }
 0x530   : > { %v3708_v54 = vpop.f32.mrf.mxu0 }
 0x531   : > { %3766 = vst.msk [vmem:[%s5102_s14 + $0x58] sm:$0xff] %vm421_vm2, %v3750_v62  ;;  %v3748_v10 = vmax.f32 %v3732_v41, 0.0  ;;  %v3737_v55 = vadd.f32 %v3717_v38, %v6106_v18  ;;  %v3709_v52 = vadd.f32 %v5845_v11, %v3708_v54 }
 0x532   : > { %v4486_v24 = vpop.f32.mrf.mxu0 }
 0x533   : > { %3764 = vst.msk [vmem:[%s5102_s14 + $0x48] sm:$0xff] %vm421_vm2, %v3748_v10  ;;  %v3753_v12 = vmax.f32 %v3737_v55, 0.0  ;;  %v3735_v7 = vadd.f32 %v3709_v52, %v6107_v19  ;;  %v3720_v42 = vadd.f32 %v4486_v24, %v5845_v11 }
 0x534   : > { %v3711_v6 = vpop.f32.mrf.mxu0 }
 0x535   : > { %3769 = vst.msk [vmem:[%s5102_s14 + $0x70] sm:$0xff] %vm421_vm2, %v3753_v12  ;;  %v3751_v46 = vmax.f32 %v3735_v7, 0.0  ;;  %v3738_v16 = vadd.f32 %v3720_v42, %v6108_v45  ;;  %v3712_v31 = vadd.f32 %v5845_v11, %v3711_v6 }
 0x537   : > { %3767 = vst.msk [vmem:[%s5102_s14 + $0x60] sm:$0xff] %vm421_vm2, %v3751_v46  ;;  %v3754_v40 = vmax.f32 %v3738_v16, 0.0  ;;  %v3736_v60 = vadd.f32 %v3712_v31, %v6109_v9 }
 0x539   : > { %3770 = vst.msk [vmem:[%s5102_s14 + $0x78] sm:$0xff] %vm421_vm2, %v3754_v40  ;;  %v3752_v11 = vmax.f32 %v3736_v60, 0.0 }
 0x53b   : > { %3768 = vst.msk [vmem:[%s5102_s14 + $0x68] sm:$0xff] %vm421_vm2, %v3752_v11 }
 0x53c   : > { %4698 = shalt.err (!%p4695_p6)
}
 0x53d   : > { %s4699_s14 = scalar_lea.hbm %s5913_s18, 2048  ;;  %s4703_s2 = scalar_lea.hbm %s6110_s13, 8192 }
 0x53e   : > { %p4700_p7 = scmp.ne.s32.totalorder %s5913_s18, %s4699_s14  ;;  %p4704_p13 = scmp.lt.s32.totalorder %s5913_s18, %s6110_s13 }
 0x53f   : > { %p4705_p1 = scmp.lt.s32.totalorder %s4703_s2, %s4699_s14 }
 0x540   : > { %p4701_p10 = pnand %p4700_p7, %p4910_p9 }
 0x541   : > { %p4706_p8 = por %p4705_p1, %p4704_p13 }
 0x542   : > { %p4702_p11 = pneg %p4701_p10 }
 0x544   : > { %p4707_p0 = pnand %p4706_p8, %p4702_p11 }
 0x546   : > { %4710 = shalt.err (!%p4707_p0)
}
 0x547   : > { %s4798_s20 = smov 128   ;;  %s4799_s22 = smov 8  }
 0x548   : > { %4501 = dma.vmem_to_hbm [thread:$0]  (%p4910_p9), %s5915_s9, 2048, %s5913_s18, %s3772_s23, %s4798_s20, %s4798_s20, %s4799_s22  }
 0x549 PF: > { %s6111_s30 = sld [smem:[#allocation20_spill]]  ;;  %p4512_p2 = scmp.ge.s32.totalorder %s4785_s12, 2 }
 0x54b   : > { %p4508_p4 = pnand %p4512_p2, %p4916_p12 }
 0x54d   : > { %p4509_p5 = pneg %p4508_p4 }
 0x54f   : > { %s3803_s17 = sand.u32 1, %s6111_s30  }
 0x550   : > { %s3804_s15 = scalar_lea.sflag [#allocation8], %s3803_s17 }
 0x551   : > { %4752 = dma.done.wait (%p4509_p5), %s3804_s15, 2048  }
 0x552   : > { %4754 = vsyncadd (%p4509_p5), %s3804_s15, 4294965248  ;;  %s24_s12 = sadd.s32 1, %s4785_s12   ;;  %s6112_s30 = sld [smem:[#allocation21_spill]] }
 0x553   : > { %p21_p3 = scmp.ge.s32.totalorder %s24_s12, 6   ;;  %s6113_s10 = sld [smem:[#allocation22_spill]] }
 0x554   : > { %s6114_s21 = sld [smem:[#allocation23_spill]]  ;;  %s6115_s27 = smov %s4761_s28 }
 0x555   : > { %s6116_s28 = smov %s4765_s29  ;;  %s6117_s29 = smov %s4923_s26 }
 0x556   : > { %s6118_s9 = smov %s4781_s11  ;;  %23 = sbr.rel (!%p21_p3) target bundleno = 13 (0xd), region = 124 }
 0x55a   : > { %s6119_s11 = smov %s6114_s21 }
 0x55b   :  { %3809 = vsyncpa [#allocation7], 1 }
 0x55c   :  { %3811 = vsyncpa [#allocation7 + $0x1], 1 }
 0x55d   :  { %3812 = vsyncpa [#allocation8], 1 }
 0x55e   :  { %3814 = vsyncpa [#allocation8 + $0x1], 1 }
 0x55f   :  { %3815 = vsyncmov [#allocation5] }
 0x562   :  { %s3816_s24 = vpop.sfrf %3815 }
 0x563   :  { %p4148_p9 = scmp.ne.s32.totalorder %s3816_s24, 0 }
 0x565   :  { %3820 = shalt.err (%p4148_p9)  }
 0x566   :  { %3822 = vsyncmov [#allocation5 + $0x1] }
 0x569   :  { %s3823_s26 = vpop.sfrf %3822 }
 0x56a   :  { %p4149_p12 = scmp.ne.s32.totalorder %s3823_s26, 0 }
 0x56c   :  { %3827 = shalt.err (%p4149_p12)  }

</bundles_post_ra>
